<compile_context>
chip_gen: v7x
topology: tpu7x:2x2x1
jax: 0.10.0
libtpu: 0.0.40
codegen_flags: <defaults>
</compile_context>

<pallas_src>
import functools
import math

import jax
import jax.numpy as jnp
import numpy as np
from jax.experimental import pallas as pl
from jax.experimental.pallas import tpu as pltpu

NUM_HEADS = 8


def _round_up(x, m):
    return ((x + m - 1) // m) * m


def _two_tensorcores():
    """True only for chips with 2 TensorCores per device (v4 / v5p / v7x)."""
    try:
        kind = jax.devices()[0].device_kind.lower()
    except Exception:
        return False
    return any(tag in kind for tag in ("v4", "v5p", "v7", "7x"))


def _interaction_kernel(slot_ref, intent_ref,
                        wq_ref, bq_ref,      # (E, E) bf16 pre-scaled+transposed, (1, E) f32
                        wk_ref, bk_ref,      # (E, E) bf16 transposed, (1, E) f32
                        wv_ref, bv_ref,      # (E, E) bf16 transposed, (1, E) f32
                        wg1_ref,             # (E, E) bf16  slot -> gate
                        wog_ref,             # (E, E) bf16  ctx -> gate (out-proj folded in)
                        bf_ref,              # (1, E) f32   folded bias  (bo @ Wg2 + bg)
                        out_ref,             # (BT*L, E) f32
                        ctx_ref,             # VMEM scratch (BT*L, E) f32
                        *, L, S):
    E = slot_ref.shape[-1]
    D = E // NUM_HEADS
    BT = slot_ref.shape[0] // L

    slot = slot_ref[...]                     # (BT*L, E) bf16
    intent = intent_ref[...]                 # (BT*S, E) bf16

    # --- input projections (query scale folded into wq/bq); f32 accumulation ---
    q = jnp.dot(slot, wq_ref[...], preferred_element_type=jnp.float32) + bq_ref[...]
    k = jnp.dot(intent, wk_ref[...], preferred_element_type=jnp.float32) + bk_ref[...]
    v = jnp.dot(intent, wv_ref[...], preferred_element_type=jnp.float32) + bv_ref[...]

    q3 = q.astype(jnp.bfloat16).reshape(BT, L, E)
    k3 = k.astype(jnp.bfloat16).reshape(BT, S, E)
    v3 = v.astype(jnp.bfloat16).reshape(BT, S, E)

    # --- multi-head attention; each head's context lands in the ctx scratch slab
    # (no live-vreg list, no lane concat) ---
    for h in range(NUM_HEADS):
        lo, hi = h * D, (h + 1) * D
        qh = q3[:, :, lo:hi]                 # (BT, L, D)
        kh = k3[:, :, lo:hi]                 # (BT, S, D)
        vh = v3[:, :, lo:hi]                 # (BT, S, D)
        s = jnp.einsum('bld,bsd->bls', qh, kh,
                       preferred_element_type=jnp.float32)       # (BT, L, S) f32
        s = s - jnp.max(s, axis=-1, keepdims=True)
        p = jnp.exp(s)
        p = p * pl.reciprocal(jnp.sum(p, axis=-1, keepdims=True), approx=True)
        ctx_h = jnp.einsum('bls,bsd->bld', p.astype(jnp.bfloat16), vh,
                           preferred_element_type=jnp.float32)   # (BT, L, D) f32
        ctx_ref[:, lo:hi] = ctx_h.reshape(BT * L, D)

    # --- gate with the MHA out-projection folded in ---
    ctx = ctx_ref[...].astype(jnp.bfloat16)                      # (BT*L, E)
    gate = (jnp.dot(slot, wg1_ref[...], preferred_element_type=jnp.float32)
            + jnp.dot(ctx, wog_ref[...], preferred_element_type=jnp.float32)
            + bf_ref[...])
    out_ref[...] = jnp.tanh(gate).astype(out_ref.dtype)


def base_interaction1(slot_hidden, intent_hidden, params, *, batch_tile=None):
    """slot_hidden: (L, N, E), intent_hidden: (S, N, E) (PyTorch MHA layout).

    Returns (new_slot_hidden, new_intent_hidden) in the same layout.
    """
    L, N, E = slot_hidden.shape
    S = intent_hidden.shape[0]
    assert E % NUM_HEADS == 0
    D = E // NUM_HEADS
    f32 = jnp.float32

    # ---- trace-time weight prep: transpose, fold scale, fold out-proj into gate,
    # cast matmul operands to bf16 (accumulation stays f32 in-kernel) ----
    wq, wk, wv = jnp.split(params["in_proj_weight"].astype(f32), 3, axis=0)
    bq, bk, bv = jnp.split(params["in_proj_bias"].astype(f32), 3, axis=0)
    scale = 1.0 / math.sqrt(D)
    wq_t = (wq * scale).T.astype(jnp.bfloat16)                   # (E, E)
    bq_s = (bq * scale).reshape(1, E)
    wk_t = wk.T.astype(jnp.bfloat16)
    wv_t = wv.T.astype(jnp.bfloat16)
    bk_r = bk.reshape(1, E)
    bv_r = bv.reshape(1, E)

    wo_t = params["out_proj_weight"].astype(f32).T               # (E, E)
    bo = params["out_proj_bias"].astype(f32)                     # (E,)
    wg_t = params["gate_weight"].astype(f32).T                   # (2E, E)
    bg = params["gate_bias"].astype(f32)
    wg1 = wg_t[:E]                                               # slot -> gate
    wg2 = wg_t[E:]                                               # attn_out -> gate
    wg1_b = wg1.astype(jnp.bfloat16)
    wog = (wo_t @ wg2).astype(jnp.bfloat16)                      # out-proj folded into gate
    b_fold = (bo @ wg2 + bg).reshape(1, E)

    # ---- batch tiling: ~2048 rows/step, bt multiple of 8; second grid step only
    # where a second TensorCore exists ----
    n8 = _round_up(N, 8)
    if batch_tile is None:
        batch_tile = max(8, _round_up(max(2048 // max(L, 1), 1), 8))
    bt = min(_round_up(batch_tile, 8), n8)
    if _two_tensorcores() and _round_up(n8, bt) // bt < 2 and bt >= 16:
        bt = _round_up(bt // 2, 8)
    n_pad = _round_up(n8, bt)
    grid = n_pad // bt

    # (L, N, E) -> (N, L, E); bf16 cast fused into the same XLA pass (halves DMA).
    # TODO(synk): block directly over the middle N axis to drop this transpose
    # once in-kernel (l,b)<->(b,l) reordering is safely lowerable.
    slot_b = jnp.transpose(slot_hidden, (1, 0, 2)).astype(jnp.bfloat16)
    intent_b = jnp.transpose(intent_hidden, (1, 0, 2)).astype(jnp.bfloat16)
    if n_pad != N:
        slot_b = jnp.pad(slot_b, ((0, n_pad - N), (0, 0), (0, 0)))
        intent_b = jnp.pad(intent_b, ((0, n_pad - N), (0, 0), (0, 0)))
    slot_flat = slot_b.reshape(n_pad * L, E)
    intent_flat = intent_b.reshape(n_pad * S, E)

    wspec = lambda shape: pl.BlockSpec(shape, lambda b: (0, 0))
    kernel = functools.partial(_interaction_kernel, L=L, S=S)

    gated_flat = pl.pallas_call(
        kernel,
        out_shape=jax.ShapeDtypeStruct((n_pad * L, E), slot_hidden.dtype),
        grid_spec=pltpu.PrefetchScalarGridSpec(
            num_scalar_prefetch=0,
            grid=(grid,),
            in_specs=[
                pl.BlockSpec((bt * L, E), lambda b: (b, 0)),     # slot rows
                pl.BlockSpec((bt * S, E), lambda b: (b, 0)),     # intent rows
                wspec((E, E)), wspec((1, E)),                    # wq_t, bq
                wspec((E, E)), wspec((1, E)),                    # wk_t, bk
                wspec((E, E)), wspec((1, E)),                    # wv_t, bv
                wspec((E, E)),                                   # wg1
                wspec((E, E)),                                   # wog
                wspec((1, E)),                                   # b_fold
            ],
            out_specs=pl.BlockSpec((bt * L, E), lambda b: (b, 0)),
            scratch_shapes=[pltpu.VMEM((bt * L, E), jnp.float32)],
        ),
        compiler_params=pltpu.CompilerParams(
            dimension_semantics=("parallel",)),
    )(slot_flat, intent_flat, wq_t, bq_s, wk_t, bk_r, wv_t, bv_r,
      wg1_b, wog, b_fold)

    gated = gated_flat.reshape(n_pad, L, E)[:N]
    new_slot = jnp.transpose(gated, (1, 0, 2))                   # back to (L, N, E)
    new_intent = intent_hidden                                   # eval dropout == identity
    return new_slot, new_intent


def _reference(slot_hidden, intent_hidden, params):
    """Pure-JAX f32 reference mirroring torch.nn.MultiheadAttention + gate (eval)."""
    L, N, E = slot_hidden.shape
    S = intent_hidden.shape[0]
    H, D = NUM_HEADS, E // NUM_HEADS
    slot = jnp.transpose(slot_hidden, (1, 0, 2))
    intent = jnp.transpose(intent_hidden, (1, 0, 2))
    wq, wk, wv = jnp.split(params["in_proj_weight"], 3, axis=0)
    bq, bk, bv = jnp.split(params["in_proj_bias"], 3, axis=0)
    q = slot @ wq.T + bq
    k = intent @ wk.T + bk
    v = intent @ wv.T + bv
    q = q.reshape(N, L, H, D).transpose(0, 2, 1, 3)
    k = k.reshape(N, S, H, D).transpose(0, 2, 1, 3)
    v = v.reshape(N, S, H, D).transpose(0, 2, 1, 3)
    s = (q @ k.transpose(0, 1, 3, 2)) / math.sqrt(D)
    p = jax.nn.softmax(s, axis=-1)
    ctx = (p @ v).transpose(0, 2, 1, 3).reshape(N, L, E)
    attn_out = ctx @ params["out_proj_weight"].T + params["out_proj_bias"]
    combined = jnp.concatenate([slot, attn_out], axis=-1)
    gated = jnp.tanh(combined @ params["gate_weight"].T + params["gate_bias"])
    return jnp.transpose(gated, (1, 0, 2)), intent_hidden


def _init_params(key, hidden_dim):
    E = hidden_dim
    ks = jax.random.split(key, 6)
    scale = 1.0 / math.sqrt(E)
    return {
        "in_proj_weight": jax.random.uniform(ks[0], (3 * E, E), jnp.float32, -scale, scale),
        "in_proj_bias":   jax.random.uniform(ks[1], (3 * E,), jnp.float32, -scale, scale),
        "out_proj_weight": jax.random.uniform(ks[2], (E, E), jnp.float32, -scale, scale),
        "out_proj_bias":  jnp.zeros((E,), jnp.float32),
        "gate_weight":    jax.random.uniform(ks[3], (E, 2 * E), jnp.float32, -scale, scale),
        "gate_bias":      jax.random.uniform(ks[4], (E,), jnp.float32, -scale, scale),
    }


if __name__ == "__main__":
    key = jax.random.PRNGKey(0)
    k_p, k_s, k_i, k_s2, k_i2 = jax.random.split(key, 5)

    # Small shapes consistent with the module: 8 heads -> E = 64 here.
    L, S, N, E = 8, 8, 2, 64
    params = _init_params(k_p, E)
    slot_hidden = jax.random.normal(k_s, (L, N, E), jnp.float32)
    intent_hidden = jax.random.normal(k_i, (S, N, E), jnp.float32)

    new_slot, new_intent = base_interaction1(slot_hidden, intent_hidden, params)
    jax.block_until_ready(new_slot)
    jax.block_until_ready(new_intent)

    ref_slot, ref_intent = _reference(slot_hidden, intent_hidden, params)
    # bf16 matmul operands with f32 accumulation -> compare at bf16-appropriate tol.
    np.testing.assert_allclose(np.asarray(new_slot), np.asarray(ref_slot),
                               rtol=2e-2, atol=2e-2)
    np.testing.assert_allclose(np.asarray(new_intent), np.asarray(ref_intent),
                               rtol=1e-6, atol=1e-6)

    # Second check: larger batch with an explicit small tile so the multi-step
    # (grid > 1) pipelined path is exercised on every chip generation.
    N2 = 64
    slot2 = jax.random.normal(k_s2, (L, N2, E), jnp.float32)
    intent2 = jax.random.normal(k_i2, (S, N2, E), jnp.float32)
    out2, _ = base_interaction1(slot2, intent2, params, batch_tile=16)
    jax.block_until_ready(out2)
    ref2, _ = _reference(slot2, intent2, params)
    np.testing.assert_allclose(np.asarray(out2), np.asarray(ref2),
                               rtol=2e-2, atol=2e-2)

    print("KERNEL_OK")
</pallas_src>

<mosaic_0001>
module attributes {stable_mosaic.version = 11 : i64} {
  func.func @_interaction_kernel(%arg0: i32, %arg1: memref<64x64xbf16, #tpu.memory_space<vmem>>, %arg2: memref<64x64xbf16, #tpu.memory_space<vmem>>, %arg3: memref<64x64xbf16, #tpu.memory_space<vmem>>, %arg4: memref<1x64xf32, #tpu.memory_space<vmem>>, %arg5: memref<64x64xbf16, #tpu.memory_space<vmem>>, %arg6: memref<1x64xf32, #tpu.memory_space<vmem>>, %arg7: memref<64x64xbf16, #tpu.memory_space<vmem>>, %arg8: memref<1x64xf32, #tpu.memory_space<vmem>>, %arg9: memref<64x64xbf16, #tpu.memory_space<vmem>>, %arg10: memref<64x64xbf16, #tpu.memory_space<vmem>>, %arg11: memref<1x64xf32, #tpu.memory_space<vmem>>, %arg12: memref<64x64xf32, #tpu.memory_space<vmem>>, %arg13: memref<64x64xf32, #tpu.memory_space<vmem>>) attributes {dimension_semantics = [#tpu.dimension_semantics<parallel>], iteration_bounds = array<i64: 1>, scalar_prefetch = 0 : i64, scratch_operands = 1 : i64, tpu.core_type = #tpu.core_type<tc>, window_params = [{transform_indices = @transform_0, window_bounds = array<i64: 64, 64>}, {transform_indices = @transform_1, window_bounds = array<i64: 64, 64>}, {pipeline_mode = #tpu.pipeline_mode<synchronous>, transform_indices = @transform_2, window_bounds = array<i64: 64, 64>}, {pipeline_mode = #tpu.pipeline_mode<synchronous>, transform_indices = @transform_3, window_bounds = array<i64: 1, 64>}, {pipeline_mode = #tpu.pipeline_mode<synchronous>, transform_indices = @transform_4, window_bounds = array<i64: 64, 64>}, {pipeline_mode = #tpu.pipeline_mode<synchronous>, transform_indices = @transform_5, window_bounds = array<i64: 1, 64>}, {pipeline_mode = #tpu.pipeline_mode<synchronous>, transform_indices = @transform_6, window_bounds = array<i64: 64, 64>}, {pipeline_mode = #tpu.pipeline_mode<synchronous>, transform_indices = @transform_7, window_bounds = array<i64: 1, 64>}, {pipeline_mode = #tpu.pipeline_mode<synchronous>, transform_indices = @transform_8, window_bounds = array<i64: 64, 64>}, {pipeline_mode = #tpu.pipeline_mode<synchronous>, transform_indices = @transform_9, window_bounds = array<i64: 64, 64>}, {pipeline_mode = #tpu.pipeline_mode<synchronous>, transform_indices = @transform_10, window_bounds = array<i64: 1, 64>}, {transform_indices = @transform_11, window_bounds = array<i64: 64, 64>}]} {
    %c0 = arith.constant 0 : index
    %c0_0 = arith.constant 0 : index
    %0 = vector.load %arg1[%c0, %c0_0] : memref<64x64xbf16, #tpu.memory_space<vmem>>, vector<64x64xbf16>
    %c0_1 = arith.constant 0 : index
    %c0_2 = arith.constant 0 : index
    %1 = vector.load %arg2[%c0_1, %c0_2] : memref<64x64xbf16, #tpu.memory_space<vmem>>, vector<64x64xbf16>
    %c0_3 = arith.constant 0 : index
    %c0_4 = arith.constant 0 : index
    %2 = vector.load %arg3[%c0_3, %c0_4] : memref<64x64xbf16, #tpu.memory_space<vmem>>, vector<64x64xbf16>
    %cst = arith.constant dense<0.000000e+00> : vector<64x64xf32>
    %3 = tpu.matmul %0, %2, %cst {dimension_numbers = #tpu.dot_dimension_numbers<[1], [0], [0], [1], [0, 0, 1, 1], [], []>} : vector<64x64xbf16>, vector<64x64xbf16>, vector<64x64xf32> -> vector<64x64xf32>
    %c0_5 = arith.constant 0 : index
    %c0_6 = arith.constant 0 : index
    %4 = vector.load %arg4[%c0_5, %c0_6] : memref<1x64xf32, #tpu.memory_space<vmem>>, vector<1x64xf32>
    %5 = vector.broadcast %4 : vector<1x64xf32> to vector<64x64xf32>
    %6 = arith.addf %3, %5 : vector<64x64xf32>
    %c0_7 = arith.constant 0 : index
    %c0_8 = arith.constant 0 : index
    %7 = vector.load %arg5[%c0_7, %c0_8] : memref<64x64xbf16, #tpu.memory_space<vmem>>, vector<64x64xbf16>
    %cst_9 = arith.constant dense<0.000000e+00> : vector<64x64xf32>
    %8 = tpu.matmul %1, %7, %cst_9 {dimension_numbers = #tpu.dot_dimension_numbers<[1], [0], [0], [1], [0, 0, 1, 1], [], []>} : vector<64x64xbf16>, vector<64x64xbf16>, vector<64x64xf32> -> vector<64x64xf32>
    %c0_10 = arith.constant 0 : index
    %c0_11 = arith.constant 0 : index
    %9 = vector.load %arg6[%c0_10, %c0_11] : memref<1x64xf32, #tpu.memory_space<vmem>>, vector<1x64xf32>
    %10 = vector.broadcast %9 : vector<1x64xf32> to vector<64x64xf32>
    %11 = arith.addf %8, %10 : vector<64x64xf32>
    %c0_12 = arith.constant 0 : index
    %c0_13 = arith.constant 0 : index
    %12 = vector.load %arg7[%c0_12, %c0_13] : memref<64x64xbf16, #tpu.memory_space<vmem>>, vector<64x64xbf16>
    %cst_14 = arith.constant dense<0.000000e+00> : vector<64x64xf32>
    %13 = tpu.matmul %1, %12, %cst_14 {dimension_numbers = #tpu.dot_dimension_numbers<[1], [0], [0], [1], [0, 0, 1, 1], [], []>} : vector<64x64xbf16>, vector<64x64xbf16>, vector<64x64xf32> -> vector<64x64xf32>
    %c0_15 = arith.constant 0 : index
    %c0_16 = arith.constant 0 : index
    %14 = vector.load %arg8[%c0_15, %c0_16] : memref<1x64xf32, #tpu.memory_space<vmem>>, vector<1x64xf32>
    %15 = vector.broadcast %14 : vector<1x64xf32> to vector<64x64xf32>
    %16 = arith.addf %13, %15 : vector<64x64xf32>
    %17 = arith.truncf %6 : vector<64x64xf32> to vector<64x64xbf16>
    %18 = vector.shape_cast %17 : vector<64x64xbf16> to vector<8x8x64xbf16>
    %19 = arith.truncf %11 : vector<64x64xf32> to vector<64x64xbf16>
    %20 = vector.shape_cast %19 : vector<64x64xbf16> to vector<8x8x64xbf16>
    %21 = arith.truncf %16 : vector<64x64xf32> to vector<64x64xbf16>
    %22 = vector.shape_cast %21 : vector<64x64xbf16> to vector<8x8x64xbf16>
    %23 = vector.extract_strided_slice %18 {offsets = [0, 0, 0], sizes = [8, 8, 8], strides = [1, 1, 1]} : vector<8x8x64xbf16> to vector<8x8x8xbf16>
    %24 = vector.extract_strided_slice %20 {offsets = [0, 0, 0], sizes = [8, 8, 8], strides = [1, 1, 1]} : vector<8x8x64xbf16> to vector<8x8x8xbf16>
    %25 = vector.extract_strided_slice %22 {offsets = [0, 0, 0], sizes = [8, 8, 8], strides = [1, 1, 1]} : vector<8x8x64xbf16> to vector<8x8x8xbf16>
    "tpu.trace_start"() <{level = 10 : i32, message = "bld,bsd->bls"}> : () -> ()
    %cst_17 = arith.constant dense<0.000000e+00> : vector<8x8x8xf32>
    %26 = tpu.matmul %23, %24, %cst_17 {dimension_numbers = #tpu.dot_dimension_numbers<[2], [2], [1], [1], [0, 0, 0, 1, 1, 1], [0], [0]>} : vector<8x8x8xbf16>, vector<8x8x8xbf16>, vector<8x8x8xf32> -> vector<8x8x8xf32>
    "tpu.trace_stop"() : () -> ()
    %cst_18 = arith.constant dense<0xFF800000> : vector<8x8xf32>
    %27 = vector.multi_reduction <maximumf>, %26, %cst_18 [2] : vector<8x8x8xf32> to vector<8x8xf32>
    %28 = vector.shape_cast %27 : vector<8x8xf32> to vector<8x8x1xf32>
    %29 = vector.broadcast %28 : vector<8x8x1xf32> to vector<8x8x8xf32>
    %30 = arith.subf %26, %29 : vector<8x8x8xf32>
    %31 = math.exp %30 : vector<8x8x8xf32>
    %cst_19 = arith.constant dense<0.000000e+00> : vector<8x8xf32>
    %32 = vector.multi_reduction <add>, %31, %cst_19 [2] : vector<8x8x8xf32> to vector<8x8xf32>
    %33 = vector.shape_cast %32 : vector<8x8xf32> to vector<8x8x1xf32>
    %34 = tpu.reciprocal %33 {approx = true} : vector<8x8x1xf32> -> vector<8x8x1xf32>
    %35 = vector.broadcast %34 : vector<8x8x1xf32> to vector<8x8x8xf32>
    %36 = arith.mulf %31, %35 : vector<8x8x8xf32>
    %37 = arith.truncf %36 : vector<8x8x8xf32> to vector<8x8x8xbf16>
    "tpu.trace_start"() <{level = 10 : i32, message = "bls,bsd->bld"}> : () -> ()
    %cst_20 = arith.constant dense<0.000000e+00> : vector<8x8x8xf32>
    %38 = tpu.matmul %37, %25, %cst_20 {dimension_numbers = #tpu.dot_dimension_numbers<[2], [1], [1], [2], [0, 0, 0, 1, 1, 2], [0], [0]>} : vector<8x8x8xbf16>, vector<8x8x8xbf16>, vector<8x8x8xf32> -> vector<8x8x8xf32>
    "tpu.trace_stop"() : () -> ()
    %39 = vector.shape_cast %38 : vector<8x8x8xf32> to vector<64x8xf32>
    %c0_21 = arith.constant 0 : index
    %c0_22 = arith.constant 0 : index
    %40 = vector.load %arg13[%c0_21, %c0_22] : memref<64x64xf32, #tpu.memory_space<vmem>>, vector<64x8xf32>
    tpu.vector_store %arg13[%c0_21, %c0_22], %39 {strides = array<i32>} : memref<64x64xf32, #tpu.memory_space<vmem>>, vector<64x8xf32>,
    %41 = vector.extract_strided_slice %18 {offsets = [0, 0, 8], sizes = [8, 8, 8], strides = [1, 1, 1]} : vector<8x8x64xbf16> to vector<8x8x8xbf16>
    %42 = vector.extract_strided_slice %20 {offsets = [0, 0, 8], sizes = [8, 8, 8], strides = [1, 1, 1]} : vector<8x8x64xbf16> to vector<8x8x8xbf16>
    %43 = vector.extract_strided_slice %22 {offsets = [0, 0, 8], sizes = [8, 8, 8], strides = [1, 1, 1]} : vector<8x8x64xbf16> to vector<8x8x8xbf16>
    "tpu.trace_start"() <{level = 10 : i32, message = "bld,bsd->bls"}> : () -> ()
    %cst_23 = arith.constant dense<0.000000e+00> : vector<8x8x8xf32>
    %44 = tpu.matmul %41, %42, %cst_23 {dimension_numbers = #tpu.dot_dimension_numbers<[2], [2], [1], [1], [0, 0, 0, 1, 1, 1], [0], [0]>} : vector<8x8x8xbf16>, vector<8x8x8xbf16>, vector<8x8x8xf32> -> vector<8x8x8xf32>
    "tpu.trace_stop"() : () -> ()
    %cst_24 = arith.constant dense<0xFF800000> : vector<8x8xf32>
    %45 = vector.multi_reduction <maximumf>, %44, %cst_24 [2] : vector<8x8x8xf32> to vector<8x8xf32>
    %46 = vector.shape_cast %45 : vector<8x8xf32> to vector<8x8x1xf32>
    %47 = vector.broadcast %46 : vector<8x8x1xf32> to vector<8x8x8xf32>
    %48 = arith.subf %44, %47 : vector<8x8x8xf32>
    %49 = math.exp %48 : vector<8x8x8xf32>
    %cst_25 = arith.constant dense<0.000000e+00> : vector<8x8xf32>
    %50 = vector.multi_reduction <add>, %49, %cst_25 [2] : vector<8x8x8xf32> to vector<8x8xf32>
    %51 = vector.shape_cast %50 : vector<8x8xf32> to vector<8x8x1xf32>
    %52 = tpu.reciprocal %51 {approx = true} : vector<8x8x1xf32> -> vector<8x8x1xf32>
    %53 = vector.broadcast %52 : vector<8x8x1xf32> to vector<8x8x8xf32>
    %54 = arith.mulf %49, %53 : vector<8x8x8xf32>
    %55 = arith.truncf %54 : vector<8x8x8xf32> to vector<8x8x8xbf16>
    "tpu.trace_start"() <{level = 10 : i32, message = "bls,bsd->bld"}> : () -> ()
    %cst_26 = arith.constant dense<0.000000e+00> : vector<8x8x8xf32>
    %56 = tpu.matmul %55, %43, %cst_26 {dimension_numbers = #tpu.dot_dimension_numbers<[2], [1], [1], [2], [0, 0, 0, 1, 1, 2], [0], [0]>} : vector<8x8x8xbf16>, vector<8x8x8xbf16>, vector<8x8x8xf32> -> vector<8x8x8xf32>
    "tpu.trace_stop"() : () -> ()
    %57 = vector.shape_cast %56 : vector<8x8x8xf32> to vector<64x8xf32>
    %c0_27 = arith.constant 0 : index
    %c8 = arith.constant 8 : index
    %58 = vector.load %arg13[%c0_27, %c8] : memref<64x64xf32, #tpu.memory_space<vmem>>, vector<64x8xf32>
    tpu.vector_store %arg13[%c0_27, %c8], %57 {strides = array<i32>} : memref<64x64xf32, #tpu.memory_space<vmem>>, vector<64x8xf32>,
    %59 = vector.extract_strided_slice %18 {offsets = [0, 0, 16], sizes = [8, 8, 8], strides = [1, 1, 1]} : vector<8x8x64xbf16> to vector<8x8x8xbf16>
    %60 = vector.extract_strided_slice %20 {offsets = [0, 0, 16], sizes = [8, 8, 8], strides = [1, 1, 1]} : vector<8x8x64xbf16> to vector<8x8x8xbf16>
    %61 = vector.extract_strided_slice %22 {offsets = [0, 0, 16], sizes = [8, 8, 8], strides = [1, 1, 1]} : vector<8x8x64xbf16> to vector<8x8x8xbf16>
    "tpu.trace_start"() <{level = 10 : i32, message = "bld,bsd->bls"}> : () -> ()
    %cst_28 = arith.constant dense<0.000000e+00> : vector<8x8x8xf32>
    %62 = tpu.matmul %59, %60, %cst_28 {dimension_numbers = #tpu.dot_dimension_numbers<[2], [2], [1], [1], [0, 0, 0, 1, 1, 1], [0], [0]>} : vector<8x8x8xbf16>, vector<8x8x8xbf16>, vector<8x8x8xf32> -> vector<8x8x8xf32>
    "tpu.trace_stop"() : () -> ()
    %cst_29 = arith.constant dense<0xFF800000> : vector<8x8xf32>
    %63 = vector.multi_reduction <maximumf>, %62, %cst_29 [2] : vector<8x8x8xf32> to vector<8x8xf32>
    %64 = vector.shape_cast %63 : vector<8x8xf32> to vector<8x8x1xf32>
    %65 = vector.broadcast %64 : vector<8x8x1xf32> to vector<8x8x8xf32>
    %66 = arith.subf %62, %65 : vector<8x8x8xf32>
    %67 = math.exp %66 : vector<8x8x8xf32>
    %cst_30 = arith.constant dense<0.000000e+00> : vector<8x8xf32>
    %68 = vector.multi_reduction <add>, %67, %cst_30 [2] : vector<8x8x8xf32> to vector<8x8xf32>
    %69 = vector.shape_cast %68 : vector<8x8xf32> to vector<8x8x1xf32>
    %70 = tpu.reciprocal %69 {approx = true} : vector<8x8x1xf32> -> vector<8x8x1xf32>
    %71 = vector.broadcast %70 : vector<8x8x1xf32> to vector<8x8x8xf32>
    %72 = arith.mulf %67, %71 : vector<8x8x8xf32>
    %73 = arith.truncf %72 : vector<8x8x8xf32> to vector<8x8x8xbf16>
    "tpu.trace_start"() <{level = 10 : i32, message = "bls,bsd->bld"}> : () -> ()
    %cst_31 = arith.constant dense<0.000000e+00> : vector<8x8x8xf32>
    %74 = tpu.matmul %73, %61, %cst_31 {dimension_numbers = #tpu.dot_dimension_numbers<[2], [1], [1], [2], [0, 0, 0, 1, 1, 2], [0], [0]>} : vector<8x8x8xbf16>, vector<8x8x8xbf16>, vector<8x8x8xf32> -> vector<8x8x8xf32>
    "tpu.trace_stop"() : () -> ()
    %75 = vector.shape_cast %74 : vector<8x8x8xf32> to vector<64x8xf32>
    %c0_32 = arith.constant 0 : index
    %c16 = arith.constant 16 : index
    %76 = vector.load %arg13[%c0_32, %c16] : memref<64x64xf32, #tpu.memory_space<vmem>>, vector<64x8xf32>
    tpu.vector_store %arg13[%c0_32, %c16], %75 {strides = array<i32>} : memref<64x64xf32, #tpu.memory_space<vmem>>, vector<64x8xf32>,
    %77 = vector.extract_strided_slice %18 {offsets = [0, 0, 24], sizes = [8, 8, 8], strides = [1, 1, 1]} : vector<8x8x64xbf16> to vector<8x8x8xbf16>
    %78 = vector.extract_strided_slice %20 {offsets = [0, 0, 24], sizes = [8, 8, 8], strides = [1, 1, 1]} : vector<8x8x64xbf16> to vector<8x8x8xbf16>
    %79 = vector.extract_strided_slice %22 {offsets = [0, 0, 24], sizes = [8, 8, 8], strides = [1, 1, 1]} : vector<8x8x64xbf16> to vector<8x8x8xbf16>
    "tpu.trace_start"() <{level = 10 : i32, message = "bld,bsd->bls"}> : () -> ()
    %cst_33 = arith.constant dense<0.000000e+00> : vector<8x8x8xf32>
    %80 = tpu.matmul %77, %78, %cst_33 {dimension_numbers = #tpu.dot_dimension_numbers<[2], [2], [1], [1], [0, 0, 0, 1, 1, 1], [0], [0]>} : vector<8x8x8xbf16>, vector<8x8x8xbf16>, vector<8x8x8xf32> -> vector<8x8x8xf32>
    "tpu.trace_stop"() : () -> ()
    %cst_34 = arith.constant dense<0xFF800000> : vector<8x8xf32>
    %81 = vector.multi_reduction <maximumf>, %80, %cst_34 [2] : vector<8x8x8xf32> to vector<8x8xf32>
    %82 = vector.shape_cast %81 : vector<8x8xf32> to vector<8x8x1xf32>
    %83 = vector.broadcast %82 : vector<8x8x1xf32> to vector<8x8x8xf32>
    %84 = arith.subf %80, %83 : vector<8x8x8xf32>
    %85 = math.exp %84 : vector<8x8x8xf32>
    %cst_35 = arith.constant dense<0.000000e+00> : vector<8x8xf32>
    %86 = vector.multi_reduction <add>, %85, %cst_35 [2] : vector<8x8x8xf32> to vector<8x8xf32>
    %87 = vector.shape_cast %86 : vector<8x8xf32> to vector<8x8x1xf32>
    %88 = tpu.reciprocal %87 {approx = true} : vector<8x8x1xf32> -> vector<8x8x1xf32>
    %89 = vector.broadcast %88 : vector<8x8x1xf32> to vector<8x8x8xf32>
    %90 = arith.mulf %85, %89 : vector<8x8x8xf32>
    %91 = arith.truncf %90 : vector<8x8x8xf32> to vector<8x8x8xbf16>
    "tpu.trace_start"() <{level = 10 : i32, message = "bls,bsd->bld"}> : () -> ()
    %cst_36 = arith.constant dense<0.000000e+00> : vector<8x8x8xf32>
    %92 = tpu.matmul %91, %79, %cst_36 {dimension_numbers = #tpu.dot_dimension_numbers<[2], [1], [1], [2], [0, 0, 0, 1, 1, 2], [0], [0]>} : vector<8x8x8xbf16>, vector<8x8x8xbf16>, vector<8x8x8xf32> -> vector<8x8x8xf32>
    "tpu.trace_stop"() : () -> ()
    %93 = vector.shape_cast %92 : vector<8x8x8xf32> to vector<64x8xf32>
    %c0_37 = arith.constant 0 : index
    %c24 = arith.constant 24 : index
    %94 = vector.load %arg13[%c0_37, %c24] : memref<64x64xf32, #tpu.memory_space<vmem>>, vector<64x8xf32>
    tpu.vector_store %arg13[%c0_37, %c24], %93 {strides = array<i32>} : memref<64x64xf32, #tpu.memory_space<vmem>>, vector<64x8xf32>,
    %95 = vector.extract_strided_slice %18 {offsets = [0, 0, 32], sizes = [8, 8, 8], strides = [1, 1, 1]} : vector<8x8x64xbf16> to vector<8x8x8xbf16>
    %96 = vector.extract_strided_slice %20 {offsets = [0, 0, 32], sizes = [8, 8, 8], strides = [1, 1, 1]} : vector<8x8x64xbf16> to vector<8x8x8xbf16>
    %97 = vector.extract_strided_slice %22 {offsets = [0, 0, 32], sizes = [8, 8, 8], strides = [1, 1, 1]} : vector<8x8x64xbf16> to vector<8x8x8xbf16>
    "tpu.trace_start"() <{level = 10 : i32, message = "bld,bsd->bls"}> : () -> ()
    %cst_38 = arith.constant dense<0.000000e+00> : vector<8x8x8xf32>
    %98 = tpu.matmul %95, %96, %cst_38 {dimension_numbers = #tpu.dot_dimension_numbers<[2], [2], [1], [1], [0, 0, 0, 1, 1, 1], [0], [0]>} : vector<8x8x8xbf16>, vector<8x8x8xbf16>, vector<8x8x8xf32> -> vector<8x8x8xf32>
    "tpu.trace_stop"() : () -> ()
    %cst_39 = arith.constant dense<0xFF800000> : vector<8x8xf32>
    %99 = vector.multi_reduction <maximumf>, %98, %cst_39 [2] : vector<8x8x8xf32> to vector<8x8xf32>
    %100 = vector.shape_cast %99 : vector<8x8xf32> to vector<8x8x1xf32>
    %101 = vector.broadcast %100 : vector<8x8x1xf32> to vector<8x8x8xf32>
    %102 = arith.subf %98, %101 : vector<8x8x8xf32>
    %103 = math.exp %102 : vector<8x8x8xf32>
    %cst_40 = arith.constant dense<0.000000e+00> : vector<8x8xf32>
    %104 = vector.multi_reduction <add>, %103, %cst_40 [2] : vector<8x8x8xf32> to vector<8x8xf32>
    %105 = vector.shape_cast %104 : vector<8x8xf32> to vector<8x8x1xf32>
    %106 = tpu.reciprocal %105 {approx = true} : vector<8x8x1xf32> -> vector<8x8x1xf32>
    %107 = vector.broadcast %106 : vector<8x8x1xf32> to vector<8x8x8xf32>
    %108 = arith.mulf %103, %107 : vector<8x8x8xf32>
    %109 = arith.truncf %108 : vector<8x8x8xf32> to vector<8x8x8xbf16>
    "tpu.trace_start"() <{level = 10 : i32, message = "bls,bsd->bld"}> : () -> ()
    %cst_41 = arith.constant dense<0.000000e+00> : vector<8x8x8xf32>
    %110 = tpu.matmul %109, %97, %cst_41 {dimension_numbers = #tpu.dot_dimension_numbers<[2], [1], [1], [2], [0, 0, 0, 1, 1, 2], [0], [0]>} : vector<8x8x8xbf16>, vector<8x8x8xbf16>, vector<8x8x8xf32> -> vector<8x8x8xf32>
    "tpu.trace_stop"() : () -> ()
    %111 = vector.shape_cast %110 : vector<8x8x8xf32> to vector<64x8xf32>
    %c0_42 = arith.constant 0 : index
    %c32 = arith.constant 32 : index
    %112 = vector.load %arg13[%c0_42, %c32] : memref<64x64xf32, #tpu.memory_space<vmem>>, vector<64x8xf32>
    tpu.vector_store %arg13[%c0_42, %c32], %111 {strides = array<i32>} : memref<64x64xf32, #tpu.memory_space<vmem>>, vector<64x8xf32>,
    %113 = vector.extract_strided_slice %18 {offsets = [0, 0, 40], sizes = [8, 8, 8], strides = [1, 1, 1]} : vector<8x8x64xbf16> to vector<8x8x8xbf16>
    %114 = vector.extract_strided_slice %20 {offsets = [0, 0, 40], sizes = [8, 8, 8], strides = [1, 1, 1]} : vector<8x8x64xbf16> to vector<8x8x8xbf16>
    %115 = vector.extract_strided_slice %22 {offsets = [0, 0, 40], sizes = [8, 8, 8], strides = [1, 1, 1]} : vector<8x8x64xbf16> to vector<8x8x8xbf16>
    "tpu.trace_start"() <{level = 10 : i32, message = "bld,bsd->bls"}> : () -> ()
    %cst_43 = arith.constant dense<0.000000e+00> : vector<8x8x8xf32>
    %116 = tpu.matmul %113, %114, %cst_43 {dimension_numbers = #tpu.dot_dimension_numbers<[2], [2], [1], [1], [0, 0, 0, 1, 1, 1], [0], [0]>} : vector<8x8x8xbf16>, vector<8x8x8xbf16>, vector<8x8x8xf32> -> vector<8x8x8xf32>
    "tpu.trace_stop"() : () -> ()
    %cst_44 = arith.constant dense<0xFF800000> : vector<8x8xf32>
    %117 = vector.multi_reduction <maximumf>, %116, %cst_44 [2] : vector<8x8x8xf32> to vector<8x8xf32>
    %118 = vector.shape_cast %117 : vector<8x8xf32> to vector<8x8x1xf32>
    %119 = vector.broadcast %118 : vector<8x8x1xf32> to vector<8x8x8xf32>
    %120 = arith.subf %116, %119 : vector<8x8x8xf32>
    %121 = math.exp %120 : vector<8x8x8xf32>
    %cst_45 = arith.constant dense<0.000000e+00> : vector<8x8xf32>
    %122 = vector.multi_reduction <add>, %121, %cst_45 [2] : vector<8x8x8xf32> to vector<8x8xf32>
    %123 = vector.shape_cast %122 : vector<8x8xf32> to vector<8x8x1xf32>
    %124 = tpu.reciprocal %123 {approx = true} : vector<8x8x1xf32> -> vector<8x8x1xf32>
    %125 = vector.broadcast %124 : vector<8x8x1xf32> to vector<8x8x8xf32>
    %126 = arith.mulf %121, %125 : vector<8x8x8xf32>
    %127 = arith.truncf %126 : vector<8x8x8xf32> to vector<8x8x8xbf16>
    "tpu.trace_start"() <{level = 10 : i32, message = "bls,bsd->bld"}> : () -> ()
    %cst_46 = arith.constant dense<0.000000e+00> : vector<8x8x8xf32>
    %128 = tpu.matmul %127, %115, %cst_46 {dimension_numbers = #tpu.dot_dimension_numbers<[2], [1], [1], [2], [0, 0, 0, 1, 1, 2], [0], [0]>} : vector<8x8x8xbf16>, vector<8x8x8xbf16>, vector<8x8x8xf32> -> vector<8x8x8xf32>
    "tpu.trace_stop"() : () -> ()
    %129 = vector.shape_cast %128 : vector<8x8x8xf32> to vector<64x8xf32>
    %c0_47 = arith.constant 0 : index
    %c40 = arith.constant 40 : index
    %130 = vector.load %arg13[%c0_47, %c40] : memref<64x64xf32, #tpu.memory_space<vmem>>, vector<64x8xf32>
    tpu.vector_store %arg13[%c0_47, %c40], %129 {strides = array<i32>} : memref<64x64xf32, #tpu.memory_space<vmem>>, vector<64x8xf32>,
    %131 = vector.extract_strided_slice %18 {offsets = [0, 0, 48], sizes = [8, 8, 8], strides = [1, 1, 1]} : vector<8x8x64xbf16> to vector<8x8x8xbf16>
    %132 = vector.extract_strided_slice %20 {offsets = [0, 0, 48], sizes = [8, 8, 8], strides = [1, 1, 1]} : vector<8x8x64xbf16> to vector<8x8x8xbf16>
    %133 = vector.extract_strided_slice %22 {offsets = [0, 0, 48], sizes = [8, 8, 8], strides = [1, 1, 1]} : vector<8x8x64xbf16> to vector<8x8x8xbf16>
    "tpu.trace_start"() <{level = 10 : i32, message = "bld,bsd->bls"}> : () -> ()
    %cst_48 = arith.constant dense<0.000000e+00> : vector<8x8x8xf32>
    %134 = tpu.matmul %131, %132, %cst_48 {dimension_numbers = #tpu.dot_dimension_numbers<[2], [2], [1], [1], [0, 0, 0, 1, 1, 1], [0], [0]>} : vector<8x8x8xbf16>, vector<8x8x8xbf16>, vector<8x8x8xf32> -> vector<8x8x8xf32>
    "tpu.trace_stop"() : () -> ()
    %cst_49 = arith.constant dense<0xFF800000> : vector<8x8xf32>
    %135 = vector.multi_reduction <maximumf>, %134, %cst_49 [2] : vector<8x8x8xf32> to vector<8x8xf32>
    %136 = vector.shape_cast %135 : vector<8x8xf32> to vector<8x8x1xf32>
    %137 = vector.broadcast %136 : vector<8x8x1xf32> to vector<8x8x8xf32>
    %138 = arith.subf %134, %137 : vector<8x8x8xf32>
    %139 = math.exp %138 : vector<8x8x8xf32>
    %cst_50 = arith.constant dense<0.000000e+00> : vector<8x8xf32>
    %140 = vector.multi_reduction <add>, %139, %cst_50 [2] : vector<8x8x8xf32> to vector<8x8xf32>
    %141 = vector.shape_cast %140 : vector<8x8xf32> to vector<8x8x1xf32>
    %142 = tpu.reciprocal %141 {approx = true} : vector<8x8x1xf32> -> vector<8x8x1xf32>
    %143 = vector.broadcast %142 : vector<8x8x1xf32> to vector<8x8x8xf32>
    %144 = arith.mulf %139, %143 : vector<8x8x8xf32>
    %145 = arith.truncf %144 : vector<8x8x8xf32> to vector<8x8x8xbf16>
    "tpu.trace_start"() <{level = 10 : i32, message = "bls,bsd->bld"}> : () -> ()
    %cst_51 = arith.constant dense<0.000000e+00> : vector<8x8x8xf32>
    %146 = tpu.matmul %145, %133, %cst_51 {dimension_numbers = #tpu.dot_dimension_numbers<[2], [1], [1], [2], [0, 0, 0, 1, 1, 2], [0], [0]>} : vector<8x8x8xbf16>, vector<8x8x8xbf16>, vector<8x8x8xf32> -> vector<8x8x8xf32>
    "tpu.trace_stop"() : () -> ()
    %147 = vector.shape_cast %146 : vector<8x8x8xf32> to vector<64x8xf32>
    %c0_52 = arith.constant 0 : index
    %c48 = arith.constant 48 : index
    %148 = vector.load %arg13[%c0_52, %c48] : memref<64x64xf32, #tpu.memory_space<vmem>>, vector<64x8xf32>
    tpu.vector_store %arg13[%c0_52, %c48], %147 {strides = array<i32>} : memref<64x64xf32, #tpu.memory_space<vmem>>, vector<64x8xf32>,
    %149 = vector.extract_strided_slice %18 {offsets = [0, 0, 56], sizes = [8, 8, 8], strides = [1, 1, 1]} : vector<8x8x64xbf16> to vector<8x8x8xbf16>
    %150 = vector.extract_strided_slice %20 {offsets = [0, 0, 56], sizes = [8, 8, 8], strides = [1, 1, 1]} : vector<8x8x64xbf16> to vector<8x8x8xbf16>
    %151 = vector.extract_strided_slice %22 {offsets = [0, 0, 56], sizes = [8, 8, 8], strides = [1, 1, 1]} : vector<8x8x64xbf16> to vector<8x8x8xbf16>
    "tpu.trace_start"() <{level = 10 : i32, message = "bld,bsd->bls"}> : () -> ()
    %cst_53 = arith.constant dense<0.000000e+00> : vector<8x8x8xf32>
    %152 = tpu.matmul %149, %150, %cst_53 {dimension_numbers = #tpu.dot_dimension_numbers<[2], [2], [1], [1], [0, 0, 0, 1, 1, 1], [0], [0]>} : vector<8x8x8xbf16>, vector<8x8x8xbf16>, vector<8x8x8xf32> -> vector<8x8x8xf32>
    "tpu.trace_stop"() : () -> ()
    %cst_54 = arith.constant dense<0xFF800000> : vector<8x8xf32>
    %153 = vector.multi_reduction <maximumf>, %152, %cst_54 [2] : vector<8x8x8xf32> to vector<8x8xf32>
    %154 = vector.shape_cast %153 : vector<8x8xf32> to vector<8x8x1xf32>
    %155 = vector.broadcast %154 : vector<8x8x1xf32> to vector<8x8x8xf32>
    %156 = arith.subf %152, %155 : vector<8x8x8xf32>
    %157 = math.exp %156 : vector<8x8x8xf32>
    %cst_55 = arith.constant dense<0.000000e+00> : vector<8x8xf32>
    %158 = vector.multi_reduction <add>, %157, %cst_55 [2] : vector<8x8x8xf32> to vector<8x8xf32>
    %159 = vector.shape_cast %158 : vector<8x8xf32> to vector<8x8x1xf32>
    %160 = tpu.reciprocal %159 {approx = true} : vector<8x8x1xf32> -> vector<8x8x1xf32>
    %161 = vector.broadcast %160 : vector<8x8x1xf32> to vector<8x8x8xf32>
    %162 = arith.mulf %157, %161 : vector<8x8x8xf32>
    %163 = arith.truncf %162 : vector<8x8x8xf32> to vector<8x8x8xbf16>
    "tpu.trace_start"() <{level = 10 : i32, message = "bls,bsd->bld"}> : () -> ()
    %cst_56 = arith.constant dense<0.000000e+00> : vector<8x8x8xf32>
    %164 = tpu.matmul %163, %151, %cst_56 {dimension_numbers = #tpu.dot_dimension_numbers<[2], [1], [1], [2], [0, 0, 0, 1, 1, 2], [0], [0]>} : vector<8x8x8xbf16>, vector<8x8x8xbf16>, vector<8x8x8xf32> -> vector<8x8x8xf32>
    "tpu.trace_stop"() : () -> ()
    %165 = vector.shape_cast %164 : vector<8x8x8xf32> to vector<64x8xf32>
    %c0_57 = arith.constant 0 : index
    %c56 = arith.constant 56 : index
    %166 = vector.load %arg13[%c0_57, %c56] : memref<64x64xf32, #tpu.memory_space<vmem>>, vector<64x8xf32>
    tpu.vector_store %arg13[%c0_57, %c56], %165 {strides = array<i32>} : memref<64x64xf32, #tpu.memory_space<vmem>>, vector<64x8xf32>,
    %c0_58 = arith.constant 0 : index
    %c0_59 = arith.constant 0 : index
    %167 = vector.load %arg13[%c0_58, %c0_59] : memref<64x64xf32, #tpu.memory_space<vmem>>, vector<64x64xf32>
    %168 = arith.truncf %167 : vector<64x64xf32> to vector<64x64xbf16>
    %c0_60 = arith.constant 0 : index
    %c0_61 = arith.constant 0 : index
    %169 = vector.load %arg9[%c0_60, %c0_61] : memref<64x64xbf16, #tpu.memory_space<vmem>>, vector<64x64xbf16>
    %cst_62 = arith.constant dense<0.000000e+00> : vector<64x64xf32>
    %170 = tpu.matmul %0, %169, %cst_62 {dimension_numbers = #tpu.dot_dimension_numbers<[1], [0], [0], [1], [0, 0, 1, 1], [], []>} : vector<64x64xbf16>, vector<64x64xbf16>, vector<64x64xf32> -> vector<64x64xf32>
    %c0_63 = arith.constant 0 : index
    %c0_64 = arith.constant 0 : index
    %171 = vector.load %arg10[%c0_63, %c0_64] : memref<64x64xbf16, #tpu.memory_space<vmem>>, vector<64x64xbf16>
    %cst_65 = arith.constant dense<0.000000e+00> : vector<64x64xf32>
    %172 = tpu.matmul %168, %171, %cst_65 {dimension_numbers = #tpu.dot_dimension_numbers<[1], [0], [0], [1], [0, 0, 1, 1], [], []>} : vector<64x64xbf16>, vector<64x64xbf16>, vector<64x64xf32> -> vector<64x64xf32>
    %173 = arith.addf %170, %172 : vector<64x64xf32>
    %c0_66 = arith.constant 0 : index
    %c0_67 = arith.constant 0 : index
    %174 = vector.load %arg11[%c0_66, %c0_67] : memref<1x64xf32, #tpu.memory_space<vmem>>, vector<1x64xf32>
    %175 = vector.broadcast %174 : vector<1x64xf32> to vector<64x64xf32>
    %176 = arith.addf %173, %175 : vector<64x64xf32>
    %177 = math.tanh %176 : vector<64x64xf32>
    %c0_68 = arith.constant 0 : index
    %c0_69 = arith.constant 0 : index
    %178 = vector.load %arg12[%c0_68, %c0_69] : memref<64x64xf32, #tpu.memory_space<vmem>>, vector<64x64xf32>
    tpu.vector_store %arg12[%c0_68, %c0_69], %177 {strides = array<i32>} : memref<64x64xf32, #tpu.memory_space<vmem>>, vector<64x64xf32>,
    return
  }
  func.func @transform_0(%arg0: i32) -> (i32, i32) {
    %c0_i32 = arith.constant 0 : i32
    %c0_i32_0 = arith.constant 0 : i32
    return %arg0, %c0_i32 : i32, i32
  }
  func.func @transform_1(%arg0: i32) -> (i32, i32) {
    %c0_i32 = arith.constant 0 : i32
    %c0_i32_0 = arith.constant 0 : i32
    return %arg0, %c0_i32 : i32, i32
  }
  func.func @transform_2(%arg0: i32) -> (i32, i32) {
    %c0_i32 = arith.constant 0 : i32
    %c0_i32_0 = arith.constant 0 : i32
    %c0_i32_1 = arith.constant 0 : i32
    return %c0_i32, %c0_i32_0 : i32, i32
  }
  func.func @transform_3(%arg0: i32) -> (i32, i32) {
    %c0_i32 = arith.constant 0 : i32
    %c0_i32_0 = arith.constant 0 : i32
    %c0_i32_1 = arith.constant 0 : i32
    return %c0_i32, %c0_i32_0 : i32, i32
  }
  func.func @transform_4(%arg0: i32) -> (i32, i32) {
    %c0_i32 = arith.constant 0 : i32
    %c0_i32_0 = arith.constant 0 : i32
    %c0_i32_1 = arith.constant 0 : i32
    return %c0_i32, %c0_i32_0 : i32, i32
  }
  func.func @transform_5(%arg0: i32) -> (i32, i32) {
    %c0_i32 = arith.constant 0 : i32
    %c0_i32_0 = arith.constant 0 : i32
    %c0_i32_1 = arith.constant 0 : i32
    return %c0_i32, %c0_i32_0 : i32, i32
  }
  func.func @transform_6(%arg0: i32) -> (i32, i32) {
    %c0_i32 = arith.constant 0 : i32
    %c0_i32_0 = arith.constant 0 : i32
    %c0_i32_1 = arith.constant 0 : i32
    return %c0_i32, %c0_i32_0 : i32, i32
  }
  func.func @transform_7(%arg0: i32) -> (i32, i32) {
    %c0_i32 = arith.constant 0 : i32
    %c0_i32_0 = arith.constant 0 : i32
    %c0_i32_1 = arith.constant 0 : i32
    return %c0_i32, %c0_i32_0 : i32, i32
  }
  func.func @transform_8(%arg0: i32) -> (i32, i32) {
    %c0_i32 = arith.constant 0 : i32
    %c0_i32_0 = arith.constant 0 : i32
    %c0_i32_1 = arith.constant 0 : i32
    return %c0_i32, %c0_i32_0 : i32, i32
  }
  func.func @transform_9(%arg0: i32) -> (i32, i32) {
    %c0_i32 = arith.constant 0 : i32
    %c0_i32_0 = arith.constant 0 : i32
    %c0_i32_1 = arith.constant 0 : i32
    return %c0_i32, %c0_i32_0 : i32, i32
  }
  func.func @transform_10(%arg0: i32) -> (i32, i32) {
    %c0_i32 = arith.constant 0 : i32
    %c0_i32_0 = arith.constant 0 : i32
    %c0_i32_1 = arith.constant 0 : i32
    return %c0_i32, %c0_i32_0 : i32, i32
  }
  func.func @transform_11(%arg0: i32) -> (i32, i32) {
    %c0_i32 = arith.constant 0 : i32
    %c0_i32_0 = arith.constant 0 : i32
    return %arg0, %c0_i32 : i32, i32
  }
}

</mosaic_0001>

<bundles_post_ra>
// kernel: tpu_custom_call.1
= control target key start
LH: loop header
LB: loop body
LE: loop exit
PB: predicated region body
PF: predicated region fallthrough
CT: control target
= control target key end

     0   :  { %16 = vsyncpa [#allocation4], 0  ;;  %s12189_s0 = inlined_call_operand.hbm [shape: bf16[64,64], index: 0, kind: input, shape index: {}]   ;;  %s12190_s1 = inlined_call_operand.hbm [shape: bf16[64,64], index: 1, kind: input, shape index: {}]   ;;  %s12191_s2 = inlined_call_operand.hbm [shape: bf16[64,64], index: 2, kind: input, shape index: {}]   ;;  %s12192_s3 = inlined_call_operand.vmem [shape: f32[1,64], index: 3, kind: input, shape index: {}]   ;;  %s12193_s4 = inlined_call_operand.hbm [shape: bf16[64,64], index: 4, kind: input, shape index: {}]   ;;  %s12194_s5 = inlined_call_operand.vmem [shape: f32[1,64], index: 5, kind: input, shape index: {}]   ;;  %s12195_s6 = inlined_call_operand.hbm [shape: bf16[64,64], index: 6, kind: input, shape index: {}]   ;;  %s12196_s7 = inlined_call_operand.hbm [shape: f32[1,64], index: 7, kind: input, shape index: {}]   ;;  %s12197_s8 = inlined_call_operand.hbm [shape: bf16[64,64], index: 8, kind: input, shape index: {}]   ;;  %s12198_s9 = inlined_call_operand.vmem [shape: bf16[64,64], index: 9, kind: input, shape index: {}]   ;;  %s12199_s10 = inlined_call_operand.vmem [shape: f32[1,64], index: 10, kind: input, shape index: {}]   ;;  %s12200_s11 = inlined_call_operand.hbm [shape: f32[64,64], index: 11, kind: output, shape index: {}]  }
   0x1   :  { %17 = vsyncpa [#allocation7], 0 }
   0x2   :  { %18 = vsyncpa [#allocation10], 0 }
   0x3   :  { %19 = vsyncpa [#allocation13], 0 }
   0x4   :  { %20 = vsyncpa [#allocation5], 0  ;;  %s10053_s17 = smov [#allocation6]   ;;  %s10054_s19 = smov [#allocation9]  }
   0x5   :  { %s38_s18 = sshll.u32 %s10053_s17, 4  ;;  %s64_s20 = sshll.u32 %s10054_s19, 4  ;;  %s39_s18 = int_to_ptr.vmem [resolvable:$true] %s38_s18  ;;  %s10140_s20 = int_to_ptr.vmem [resolvable:$true] %s64_s20 }
   0x6   :  { %s9867_s23 = scalar_lea.hbm %s12190_s1, 512 }
   0x7   :  { %p9868_p0 = scmp.ne.s32.totalorder %s12190_s1, %s9867_s23  ;;  %p9871_p1 = scmp.lt.u32.totalorder %s9867_s23, %s12190_s1 }
   0x9   :  { %p9873_p2 = pnand %p9871_p1, %p9868_p0 }
   0xb   :  { %9876 = shalt.err (!%p9873_p2)
}
   0xc   :  { %s9877_s28 = scalar_lea.vmem %s39_s18, 512  ;;  %p9882_p4 = scmp.lt.s32.totalorder %s39_s18, %s39_s18 }
   0xd   :  { %p9878_p3 = scmp.ne.s32.totalorder %s39_s18, %s9877_s28  ;;  %p9883_p5 = scmp.lt.s32.totalorder %s9877_s28, %s9877_s28 }
   0xf   :  { %p9884_p6 = por %p9883_p5, %p9882_p4 }
  0x11   :  { %p9885_p7 = pnand %p9884_p6, %p9878_p3 }
  0x13   :  { %9888 = shalt.err (!%p9885_p7)
}
  0x14   :  { %s10055_s29 = smov 64   ;;  %s10056_s30 = smov 4  }
  0x15   :  { %44 = dma.hbm_to_vmem [thread:$0]  %s12190_s1, 512, %s39_s18, [#allocation7], %s10055_s29, %s10055_s29, %s10056_s30  }
  0x16   :  { %s9889_s16 = scalar_lea.hbm %s12193_s4, 512 }
  0x17   :  { %p9890_p8 = scmp.ne.s32.totalorder %s12193_s4, %s9889_s16  ;;  %p9893_p9 = scmp.lt.u32.totalorder %s9889_s16, %s12193_s4 }
  0x19   :  { %p9895_p10 = pnand %p9893_p9, %p9890_p8 }
  0x1b   :  { %9898 = shalt.err (!%p9895_p10)
}
  0x1c   :  { %s9899_s23 = scalar_lea.vmem %s10140_s20, 512  ;;  %p9904_p12 = scmp.lt.s32.totalorder %s10140_s20, %s10140_s20 }
  0x1d   :  { %p9900_p11 = scmp.ne.s32.totalorder %s10140_s20, %s9899_s23  ;;  %p9905_p13 = scmp.lt.s32.totalorder %s9899_s23, %s9899_s23 }
  0x1f   :  { %p9906_p0 = por %p9905_p13, %p9904_p12 }
  0x21   :  { %p9907_p1 = pnand %p9906_p0, %p9900_p11 }
  0x23   :  { %9910 = shalt.err (!%p9907_p1)
}
  0x24   :  { %70 = dma.hbm_to_vmem [thread:$0]  %s12193_s4, 512, %s10140_s20, [#allocation10], %s10055_s29, %s10055_s29, %s10056_s30  }
  0x25   :  { %s10057_s24 = smov [#allocation12]   ;;  %s10058_s26 = smov [#allocation3]  }
  0x26   :  { %s91_s25 = sshll.u32 %s10057_s24, 4  ;;  %s26_s27 = sshll.u32 %s10058_s26, 4  ;;  %s92_s25 = int_to_ptr.vmem [resolvable:$true] %s91_s25  ;;  %s10177_s27 = int_to_ptr.vmem [resolvable:$true] %s26_s27 }
  0x27   :  { %s9911_s13 = scalar_lea.hbm %s12196_s7, 16 }
  0x28   :  { %p9912_p2 = scmp.ne.s32.totalorder %s12196_s7, %s9911_s13  ;;  %p9915_p3 = scmp.lt.u32.totalorder %s9911_s13, %s12196_s7 }
  0x2a   :  { %p9917_p4 = pnand %p9915_p3, %p9912_p2 }
  0x2c   :  { %9920 = shalt.err (!%p9917_p4)
}
  0x2d   :  { %s9921_s4 = scalar_lea.vmem %s92_s25, 16  ;;  %s9925_s20 = scalar_lea.vmem %s92_s25, 32 }
  0x2e   :  { %p9922_p5 = scmp.ne.s32.totalorder %s92_s25, %s9921_s4  ;;  %p9926_p6 = scmp.lt.s32.totalorder %s92_s25, %s92_s25 }
  0x2f   :  { %p9927_p7 = scmp.lt.s32.totalorder %s9925_s20, %s9921_s4 }
  0x31   :  { %p9928_p8 = por %p9927_p7, %p9926_p6 }
  0x33   :  { %p9929_p9 = pnand %p9928_p8, %p9922_p5 }
  0x35   :  { %9932 = shalt.err (!%p9929_p9)
}
  0x36   :  { %94 = dma.hbm_to_vmem [thread:$0]  %s12196_s7, 16, %s92_s25, [#allocation13]  }
  0x37   :  { %s9933_s1 = scalar_lea.hbm %s12189_s0, 512 }
  0x38   :  { %p9934_p10 = scmp.ne.s32.totalorder %s12189_s0, %s9933_s1  ;;  %p9937_p11 = scmp.lt.u32.totalorder %s9933_s1, %s12189_s0 }
  0x3a   :  { %p9939_p12 = pnand %p9937_p11, %p9934_p10 }
  0x3c   :  { %9942 = shalt.err (!%p9939_p12)
}
  0x3d   :  { %s9943_s12 = scalar_lea.vmem %s10177_s27, 512  ;;  %p9948_p0 = scmp.lt.s32.totalorder %s10177_s27, %s10177_s27 }
  0x3e   :  { %p9944_p13 = scmp.ne.s32.totalorder %s10177_s27, %s9943_s12  ;;  %p9949_p1 = scmp.lt.s32.totalorder %s9943_s12, %s9943_s12 }
  0x40   :  { %p9950_p2 = por %p9949_p1, %p9948_p0 }
  0x42   :  { %p9951_p3 = pnand %p9950_p2, %p9944_p13 }
  0x44   :  { %9954 = shalt.err (!%p9951_p3)
}
  0x45   :  { %32 = dma.hbm_to_vmem [thread:$0]  %s12189_s0, 512, %s10177_s27, [#allocation4], %s10055_s29, %s10055_s29, %s10056_s30  }
  0x46   :  { %s10059_s13 = smov [#allocation8]   ;;  %s10060_s15 = smov [#allocation11]  }
  0x47   :  { %s50_s14 = sshll.u32 %s10059_s13, 4  ;;  %s78_s16 = sshll.u32 %s10060_s15, 4  ;;  %s51_s14 = int_to_ptr.vmem [resolvable:$true] %s50_s14  ;;  %s10211_s16 = int_to_ptr.vmem [resolvable:$true] %s78_s16 }
  0x48   :  { %s9955_s20 = scalar_lea.hbm %s12191_s2, 512 }
  0x49   :  { %p9956_p4 = scmp.ne.s32.totalorder %s12191_s2, %s9955_s20  ;;  %p9959_p5 = scmp.lt.u32.totalorder %s9955_s20, %s12191_s2 }
  0x4b   :  { %p9961_p6 = pnand %p9959_p5, %p9956_p4 }
  0x4d   :  { %9964 = shalt.err (!%p9961_p6)
}
  0x4e   :  { %s9965_s0 = scalar_lea.vmem %s51_s14, 512  ;;  %p9970_p8 = scmp.lt.s32.totalorder %s51_s14, %s51_s14 }
  0x4f   :  { %p9966_p7 = scmp.ne.s32.totalorder %s51_s14, %s9965_s0  ;;  %p9971_p9 = scmp.lt.s32.totalorder %s9965_s0, %s9965_s0 }
  0x51   :  { %p9972_p10 = por %p9971_p9, %p9970_p8 }
  0x53   :  { %p9973_p11 = pnand %p9972_p10, %p9966_p7 }
  0x55   :  { %9976 = shalt.err (!%p9973_p11)
}
  0x56   :  { %56 = dma.hbm_to_vmem [thread:$0]  %s12191_s2, 512, %s51_s14, [#allocation7], %s10055_s29, %s10055_s29, %s10056_s30  }
  0x57   :  { %s9977_s26 = scalar_lea.hbm %s12195_s6, 512 }
  0x58   :  { %p9978_p12 = scmp.ne.s32.totalorder %s12195_s6, %s9977_s26  ;;  %p9981_p13 = scmp.lt.u32.totalorder %s9977_s26, %s12195_s6 }
  0x5a   :  { %p9983_p0 = pnand %p9981_p13, %p9978_p12 }
  0x5c   :  { %9986 = shalt.err (!%p9983_p0)
}
  0x5d   :  { %s9987_s13 = scalar_lea.vmem %s10211_s16, 512  ;;  %p9992_p2 = scmp.lt.s32.totalorder %s10211_s16, %s10211_s16 }
  0x5e   :  { %p9988_p1 = scmp.ne.s32.totalorder %s10211_s16, %s9987_s13  ;;  %p9993_p3 = scmp.lt.s32.totalorder %s9987_s13, %s9987_s13 }
  0x60   :  { %p9994_p4 = por %p9993_p3, %p9992_p2 }
  0x62   :  { %p9995_p5 = pnand %p9994_p4, %p9988_p1 }
  0x64   :  { %9998 = shalt.err (!%p9995_p5)
}
  0x65   :  { %84 = dma.hbm_to_vmem [thread:$0]  %s12195_s6, 512, %s10211_s16, [#allocation10], %s10055_s29, %s10055_s29, %s10056_s30  }
  0x66   :  { %s10061_s15 = smov [#allocation14]   ;;  %s9999_s19 = scalar_lea.hbm %s12197_s8, 512 }
  0x67   :  { %s100_s17 = sshll.u32 %s10061_s15, 4  ;;  %p10000_p6 = scmp.ne.s32.totalorder %s12197_s8, %s9999_s19  ;;  %s101_s17 = int_to_ptr.vmem [resolvable:$true] %s100_s17 }
  0x68   :  { %p10003_p7 = scmp.lt.u32.totalorder %s9999_s19, %s12197_s8 }
  0x6a   :  { %p10005_p8 = pnand %p10003_p7, %p10000_p6 }
  0x6c   :  { %10008 = shalt.err (!%p10005_p8)
}
  0x6d   :  { %s10009_s27 = scalar_lea.vmem %s101_s17, 512  ;;  %p10014_p10 = scmp.lt.s32.totalorder %s101_s17, %s101_s17 }
  0x6e   :  { %p10010_p9 = scmp.ne.s32.totalorder %s101_s17, %s10009_s27  ;;  %p10015_p11 = scmp.lt.s32.totalorder %s10009_s27, %s10009_s27 }
  0x70   :  { %p10016_p12 = por %p10015_p11, %p10014_p10 }
  0x72   :  { %p10017_p13 = pnand %p10016_p12, %p10010_p9 }
  0x74   :  { %10020 = shalt.err (!%p10017_p13)
}
  0x75   :  { %106 = dma.hbm_to_vmem [thread:$0]  %s12197_s8, 512, %s101_s17, [#allocation13], %s10055_s29, %s10055_s29, %s10056_s30  }
  0x76   :  { %10043 = dma.done.wait [#allocation4], 512  }
  0x77   :  { %10044 = vsyncadd [#allocation4], 4294966784 }
  0x78   :  { %10045 = dma.done.wait [#allocation7], 1024  }
  0x79   :  { %10046 = vsyncadd [#allocation7], 4294966272 }
  0x7a   :  { %10047 = dma.done.wait [#allocation10], 1024  }
  0x7b   :  { %10048 = vsyncadd [#allocation10], 4294966272 }
  0x7c   :  { %10049 = dma.done.wait [#allocation13], 528  }
  0x7d   :  { %10050 = vsyncadd [#allocation13], 4294966768  ;;  %v9563_v0 = vld [vmem:[#allocation8] sm:$0xff]   ;;  %v9564_v1 = vld [vmem:[#allocation8 + $0x8] sm:$0xff]   ;;  %vm208_vm0 = vcmask 523264   ;;  %v12201_v20 = vmov 0.0  }
  0x7e   :  { %8680 = vmatprep.subr.bf16.mxu1 %v9563_v0  ;;  %v9565_v2 = vld [vmem:[#allocation8 + $0x10] sm:$0xff]   ;;  %v9567_v3 = vld [vmem:[#allocation3] sm:$0xff]   ;;  %v9566_v4 = vld [vmem:[#allocation8 + $0x18] sm:$0xff]   ;;  %vm10063_vm1 = vmmov 0   ;;  %vm598_vm2 = vcmask 64512   ;;  %vm1066_vm3 = vcmask 1043456  }
  0x7f   :  { %8681 = vmatpush3.bf16.msra.mxu1 %v9563_v0  ;;  %8688 = vmatprep.mubr.msk.bf16.mxu1 %vm208_vm0, %v9567_v3  ;;  %v9569_v5 = vld [vmem:[#allocation9] sm:$0xff]   ;;  %v9568_v7 = vld [vmem:[#allocation3 + $0x8] sm:$0xff]   ;;  %v9571_v9 = vld [vmem:[#allocation3 + $0x10] sm:$0xff]   ;;  %s10066_s18 = smov 104   ;;  %s10067_s24 = smov 96   ;;  %vm2352_vm4 = vcmask 130112  }
  0x80   :  { %8682 = vmatprep.subr.bf16.mxu1 %v9564_v1  ;;  %v9575_v6 = vld [vmem:[#allocation6] sm:$0xff]   ;;  %v9570_v8 = vld [vmem:[#allocation9 + $0x8] sm:$0xff]   ;;  %v9573_v11 = vld [vmem:[#allocation9 + $0x10] sm:$0xff]   ;;  %s10068_s26 = smov 88   ;;  %s10069_s28 = smov 80   ;;  %vm3273_vm5 = vcmask 195712  }
  0x81   :  { %8720 = vmatprep.mubr.msk.bf16.mxu0 %vm208_vm0, %v9575_v6  ;;  %v9579_v10 = vld [vmem:[#allocation11] sm:$0xff]   ;;  %v9572_v12 = vld [vmem:[#allocation3 + $0x18] sm:$0xff]   ;;  %v9576_v14 = vld [vmem:[#allocation6 + $0x8] sm:$0xff]   ;;  %s10070_s12 = smov 72   ;;  %s10071_s7 = smov 8   ;;  %vm4194_vm6 = vcmask 261312  }
  0x82   :  { %8712 = vmatprep.subr.bf16.mxu0 %v9579_v10  ;;  %v9574_v13 = vld [vmem:[#allocation9 + $0x18] sm:$0xff]   ;;  %v9577_v15 = vld [vmem:[#allocation6 + $0x10] sm:$0xff]   ;;  %v9580_v17 = vld [vmem:[#allocation11 + $0x8] sm:$0xff]   ;;  %s10072_s25 = smov 16   ;;  %s10073_s13 = smov 24   ;;  %vm5115_vm7 = vcmask 326912  }
  0x83   :  { %8683 = vmatpush3.bf16.msra.mxu1 %v9564_v1  ;;  %8713 = vmatpush3.bf16.msra.mxu0 %v9579_v10  ;;  %v9578_v16 = vld [vmem:[#allocation6 + $0x18] sm:$0xff]   ;;  %v9581_v18 = vld [vmem:[#allocation11 + $0x10] sm:$0xff]   ;;  %v10288_v29 = vld [vmem:[%s12194_s5] ss:$0 sm:$0xff]  ;;  %s10065_s5 = smov 112   ;;  %s10074_s2 = smov 32  }
  0x84   :  { %8684 = vmatprep.subr.bf16.mxu1 %v9565_v2  ;;  %8714 = vmatprep.subr.bf16.mxu0 %v9580_v17  ;;  %v9582_v19 = vld [vmem:[#allocation11 + $0x18] sm:$0xff]   ;;  %v10297_v37 = vld [vmem:[%s12192_s3] ss:$0 sm:$0xff]  ;;  %s10064_s3 = smov 120   ;;  %s10075_s14 = smov 40   ;;  %vm6036_vm8 = vcmask 392512  }
  0x85   :  { %s10076_s15 = smov 48   ;;  %vm6957_vm9 = vcmask 458112   ;;  %s10077_s17 = smov 56   ;;  %vm7878_vm10 = vcmask 523712  }
  0x87   :  { %8685 = vmatpush3.bf16.msra.mxu1 %v9565_v2  ;;  %8715 = vmatpush3.bf16.msra.mxu0 %v9580_v17 }
  0x88   :  { %8686 = vmatprep.subr.bf16.mxu1 %v9566_v4  ;;  %8716 = vmatprep.subr.bf16.mxu0 %v9581_v18 }
  0x8b   :  { %8687 = vmatpush3.bf16.msra.mxu1 %v9566_v4  ;;  %8717 = vmatpush3.bf16.msra.mxu0 %v9581_v18 }
  0x8c   :  { %8696 = vmatprep.subr.bf16.mxu1 %v9569_v5  ;;  %8718 = vmatprep.subr.bf16.mxu0 %v9582_v19 }
  0x8e   :  { %8689 = vmatmul.mubr.msk.bf16.vlgmr.msra.gmra.mrb[0].mxu1 %vm208_vm0, %v9568_v7 }
  0x8f   :  { %8697 = vmatpush3.bf16.msra.mxu1 %v9569_v5  ;;  %8692 = vmatprep.mubr.msk.bf16.mxu1 %vm208_vm0, %v9571_v9 }
  0x90   :  { %8698 = vmatprep.subr.bf16.mxu1 %v9570_v8  ;;  %8719 = vmatpush3.bf16.msra.mxu0 %v9582_v19 }
  0x91   :  { %8740 = vmatprep.subr.bf16.mxu0 %v12201_v20 }
  0x93   :  { %8699 = vmatpush3.bf16.msra.mxu1 %v9570_v8  ;;  %8721 = vmatmul.mubr.msk.bf16.vlgmr.msra.gmra.mrb[0].mxu0 %vm208_vm0, %v9576_v14 }
  0x94   :  { %8700 = vmatprep.subr.bf16.mxu1 %v9573_v11  ;;  %8724 = vmatprep.mubr.msk.bf16.mxu0 %vm208_vm0, %v9577_v15 }
  0x96   :  { %8693 = vmatmul.mubr.msk.bf16.gmra.mrb[4].mxu1 %vm208_vm0, %v9572_v12 }
  0x97   :  { %8701 = vmatpush3.bf16.msra.mxu1 %v9573_v11  ;;  %8704 = vmatprep.mubr.msk.bf16.mxu1 %vm208_vm0, %v9575_v6 }
  0x98   :  { %8702 = vmatprep.subr.bf16.mxu1 %v9574_v13 }
  0x9b   :  { %8703 = vmatpush3.bf16.msra.mxu1 %v9574_v13  ;;  %8725 = vmatmul.mubr.msk.bf16.gmra.mrb[4].mxu0 %vm208_vm0, %v9578_v16 }
  0x9c   :  { %8728 = vmatprep.subr.bf16.mxu1 %v12201_v20  ;;  %8742 = vmatprep.mubr.msk.bf16.mxu0 %vm10063_vm1, %v12201_v20 }
  0x9e   :  { %8705 = vmatmul.mubr.msk.bf16.vlgmr.msra.gmra.mrb[8].mxu1 %vm208_vm0, %v9576_v14 }
  0x9f   :  { %8708 = vmatprep.mubr.msk.bf16.mxu1 %vm208_vm0, %v9577_v15  ;;  %v8182_v15 = vld [vmem:[#allocation12] ss:$0 sm:$0xff] }
  0xa6   :  { %8709 = vmatmul.mubr.msk.bf16.gmra.mrb[12].mxu1 %vm208_vm0, %v9578_v16 }
  0xa7   :  { %8730 = vmatprep.mubr.msk.bf16.mxu1 %vm10063_vm1, %v12201_v20 }
 0x161   :  { %v8690_v21 = vpop.f32.mrb[0].mxu1 }
 0x162   :  { %v255_v22 = vpop.f32.mrb[1].mxu1  ;;  %v264_v42 = vadd.f32 %v8690_v21, %v10297_v37 }
 0x163   :  { %v8691_v23 = vpop.f32.mrb[2].mxu1  ;;  %v256_v43 = vadd.f32 %v10297_v37, %v255_v22 }
 0x164   :  { %v258_v24 = vpop.f32.mrb[3].mxu1  ;;  %v10313_v49 = vpack.c.bf16 %v264_v42, %v264_v42  ;;  %v267_v2 = vadd.f32 %v8691_v23, %v10297_v37 }
 0x165   :  { %v10315_v51 = vpack.c.bf16 %v256_v43, %v256_v43  ;;  %v259_v57 = vadd.f32 %v10297_v37, %v258_v24 }
 0x166   :  { %v10364_v5 = vpack.c.bf16 %v267_v2, %v267_v2  ;;  %v8722_v16 = vpop.f32.mrb[0].mxu0 }
 0x167   :  { %v10341_v61 = vpack.c.bf16 %v259_v57, %v259_v57  ;;  %v10401_v17 = vadd.f32 %v8722_v16, %v8182_v15  ;;  %v495_v18 = vpop.f32.mrb[1].mxu0 }
 0x168   :  { %v8723_v19 = vpop.f32.mrb[2].mxu0 }
 0x169   :  { %v8694_v25 = vpop.f32.mrb[4].mxu1  ;;  %v10403_v21 = vadd.f32 %v8723_v19, %v8182_v15  ;;  %v498_v22 = vpop.f32.mrb[3].mxu0 }
 0x16a   :  { %v271_v26 = vpop.f32.mrb[5].mxu1  ;;  %v280_v3 = vadd.f32 %v8694_v25, %v10297_v37 }
 0x16b   :  { %v10281_v27 = vpop.f32.mrb[6].mxu1  ;;  %v272_v58 = vadd.f32 %v10297_v37, %v271_v26  ;;  %v496_v26 = vadd.f32 %v8182_v15, %v495_v18 }
 0x16c   :  { %v10283_v28 = vpop.f32.mrb[7].mxu1  ;;  %v10366_v6 = vpack.c.bf16 %v280_v3, %v280_v3  ;;  %v283_v13 = vadd.f32 %v10281_v27, %v10297_v37  ;;  %v499_v27 = vadd.f32 %v8182_v15, %v498_v22 }
 0x16d   :  { %v10343_v62 = vpack.c.bf16 %v272_v58, %v272_v58  ;;  %v275_v9 = vadd.f32 %v10297_v37, %v10283_v28 }
 0x16e   :  { %v10395_v14 = vpack.c.bf16 %v283_v13, %v283_v13  ;;  %v8726_v23 = vpop.f32.mrb[4].mxu0 }
 0x16f   :  { %v10384_v11 = vpack.c.bf16 %v275_v9, %v275_v9  ;;  %v10405_v24 = vadd.f32 %v8726_v23, %v8182_v15  ;;  %v511_v25 = vpop.f32.mrb[5].mxu0 }
 0x170   :  { %v10407_v28 = vadd.f32 %v8182_v15, %v511_v25 }
 0x171   :  { %v8706_v30 = vpop.f32.mrb[8].mxu1 }
 0x172   :  { %v400_v31 = vadd.f32 %v8706_v30, %v10288_v29  ;;  %v391_v32 = vpop.f32.mrb[9].mxu1 }
 0x173   :  { %v392_v33 = vadd.f32 %v10288_v29, %v391_v32  ;;  %v8707_v34 = vpop.f32.mrb[10].mxu1 }
 0x174   :  { %v10292_v35 = vpack.c.bf16 %v400_v31, %v400_v31  ;;  %v394_v36 = vpop.f32.mrb[11].mxu1  ;;  %v403_v54 = vadd.f32 %v8707_v34, %v10288_v29  ;;  %v10415_v34 = vpack.c.bf16 %v499_v27, %v499_v27 }
 0x175   :  { %v10299_v38 = vpack.c.bf16 %v392_v33, %v392_v33  ;;  %v395_v40 = vadd.f32 %v10288_v29, %v394_v36  ;;  %v10413_v33 = vpack.c.bf16 %v496_v26, %v496_v26 }
 0x176   :  { %v695_v39 = vsel %vm598_vm2, %v10292_v35, 0  ;;  %v10339_v60 = vpack.c.bf16 %v403_v54, %v403_v54  ;;  %v1114_v37 = vsel %vm1066_vm3, %v10415_v34, 0 }
 0x177   :  { %8741 = vmatpush3.bf16.xpose.msra.mxu0 %v695_v39  ;;  %v603_v41 = vsel %vm598_vm2, %v10299_v38, 0  ;;  %v10310_v46 = vpack.c.bf16 %v395_v40, %v395_v40  ;;  %v1068_v36 = vsel %vm1066_vm3, %v10413_v33, 0 }
 0x178   :  { %8729 = vmatpush3.bf16.xpose.msra.mxu1 %v603_v41  ;;  %8752 = vmatprep.subr.bf16.mxu0 %v12201_v20  ;;  %v741_v1 = vsel %vm598_vm2, %v10339_v60, 0 }
 0x179   :  { %v8710_v44 = vpop.f32.mrb[12].mxu1  ;;  %8734 = vmatprep.subr.bf16.mxu1 %v12201_v20  ;;  %v649_v55 = vsel %vm598_vm2, %v10310_v46, 0 }
 0x17a   :  { %v407_v45 = vpop.f32.mrb[13].mxu1  ;;  %v416_v52 = vadd.f32 %v8710_v44, %v10288_v29 }
 0x17b   :  { %v408_v47 = vadd.f32 %v10288_v29, %v407_v45  ;;  %v8711_v48 = vpop.f32.mrb[14].mxu1 }
 0x17c   :  { %v410_v50 = vpop.f32.mrb[15].mxu1  ;;  %v10333_v59 = vpack.c.bf16 %v416_v52, %v416_v52  ;;  %v419_v7 = vadd.f32 %v8711_v48, %v10288_v29 }
 0x17d   :  { %v10318_v53 = vpack.c.bf16 %v408_v47, %v408_v47  ;;  %v411_v0 = vadd.f32 %v10288_v29, %v410_v50  ;;  %v8727_v29 = vpop.f32.mrb[6].mxu0 }
 0x17e   :  { %8743 = vmatmul.mubr.msk.bf16.vlgmr.msra.gmra.mrb[8].mxu0 %vm598_vm2, %v10313_v49  ;;  %v879_v63 = vsel %vm598_vm2, %v10333_v59, 0  ;;  %v10379_v10 = vpack.c.bf16 %v419_v7, %v419_v7  ;;  %v10409_v30 = vadd.f32 %v8727_v29, %v8182_v15  ;;  %v514_v31 = vpop.f32.mrb[7].mxu0 }
 0x17f   :  { %8731 = vmatmul.mubr.msk.bf16.vlgmr.msra.gmra.mrb[16].mxu1 %vm598_vm2, %v10315_v51  ;;  %v787_v56 = vsel %vm598_vm2, %v10318_v53, 0  ;;  %8754 = vmatprep.mubr.msk.bf16.mxu0 %vm10063_vm1, %v12201_v20  ;;  %v10356_v4 = vpack.c.bf16 %v411_v0, %v411_v0  ;;  %v10411_v32 = vadd.f32 %v8182_v15, %v514_v31 }
 0x180   :  { %8735 = vmatpush3.bf16.xpose.msra.mxu1 %v649_v55  ;;  %8753 = vmatpush3.bf16.xpose.msra.mxu0 %v787_v56  ;;  %v925_v12 = vsel %vm598_vm2, %v10379_v10, 0 }
 0x181   :  { %8736 = vmatprep.mubr.msk.bf16.mxu1 %vm10063_vm1, %v12201_v20  ;;  %8746 = vmatprep.subr.bf16.mxu1 %v12201_v20  ;;  %v833_v8 = vsel %vm598_vm2, %v10356_v4, 0 }
 0x182   :  { %8764 = vmatprep.subr.bf16.mxu0 %v12201_v20 }
 0x187   :  { %8737 = vmatmul.mubr.msk.bf16.vlgmr.msra.gmra.mrb[20].mxu1 %vm598_vm2, %v10341_v61  ;;  %8755 = vmatmul.mubr.msk.bf16.vlgmr.msra.gmra.mrb[12].mxu0 %vm598_vm2, %v10343_v62 }
 0x188   :  { %8747 = vmatpush3.bf16.xpose.msra.mxu1 %v741_v1  ;;  %8765 = vmatpush3.bf16.xpose.msra.mxu0 %v879_v63 }
 0x189   :  { %8748 = vmatprep.mubr.msk.bf16.mxu1 %vm10063_vm1, %v12201_v20  ;;  %8766 = vmatprep.mubr.msk.bf16.mxu0 %vm10063_vm1, %v12201_v20 }
 0x18a   :  { %8758 = vmatprep.subr.bf16.mxu1 %v12201_v20  ;;  %8776 = vmatprep.subr.bf16.mxu0 %v12201_v20 }
 0x18f   :  { %8749 = vmatmul.mubr.msk.bf16.vlgmr.msra.gmra.mrb[24].mxu1 %vm598_vm2, %v10364_v5  ;;  %8767 = vmatmul.mubr.msk.bf16.vlgmr.msra.gmra.mrb[16].mxu0 %vm598_vm2, %v10366_v6 }
 0x190   :  { %8759 = vmatpush3.bf16.xpose.msra.mxu1 %v833_v8  ;;  %8760 = vmatprep.mubr.msk.bf16.mxu1 %vm10063_vm1, %v12201_v20 }
 0x191   :  { %8770 = vmatprep.subr.bf16.mxu1 %v12201_v20  ;;  %8778 = vmatprep.mubr.msk.bf16.mxu0 %vm10063_vm1, %v12201_v20 }
 0x192   :  { %8777 = vmatpush3.bf16.msra.mxu0 %v1068_v36 }
 0x193   :  { %8788 = vmatprep.subr.bf16.mxu0 %v12201_v20 }
 0x197   :  { %8761 = vmatmul.mubr.msk.bf16.vlgmr.msra.gmra.mrb[28].mxu1 %vm598_vm2, %v10384_v11 }
 0x198   :  { %8771 = vmatpush3.bf16.xpose.msra.mxu1 %v925_v12  ;;  %8772 = vmatprep.mubr.msk.bf16.mxu1 %vm10063_vm1, %v12201_v20 }
 0x199   :  { %8782 = vmatprep.subr.bf16.mxu1 %v12201_v20 }
 0x19f   :  { %8773 = vmatmul.mubr.msk.bf16.vlgmr.msra.gmra.mrb[32].mxu1 %vm598_vm2, %v10395_v14 }
 0x1a0   :  { %8784 = vmatprep.mubr.msk.bf16.mxu1 %vm10063_vm1, %v12201_v20  ;;  %8783 = vmatpush3.bf16.msra.mxu1 %v1114_v37 }
 0x1a1   :  { %8794 = vmatprep.subr.bf16.mxu1 %v12201_v20 }
 0x251   :  { %v731_v39 = vpop.f32.mrb[8].mxu0 }
 0x252   :  { %v639_v40 = vpop.f32.mrb[16].mxu1  ;;  %v8744_v41 = vpop.f32.mrb[9].mxu0  ;;  %v973_v42 = vsel %vm598_vm2, %v731_v39, -inf }
 0x253   :  { %974 = vmax.xlane.f32.xlu1 %v973_v42  ;;  %v8732_v43 = vpop.f32.mrb[17].mxu1  ;;  %v734_v44 = vpop.f32.mrb[10].mxu0  ;;  %v967_v45 = vsel %vm598_vm2, %v639_v40, -inf }
 0x254   :  { %v8745_v47 = vpop.f32.mrb[11].mxu0  ;;  %968 = vmax.xlane.f32.xlu0 %v967_v45  ;;  %v642_v48 = vpop.f32.mrb[18].mxu1 }
 0x255   :  { %v8733_v50 = vpop.f32.mrb[19].mxu1 }
 0x25a   :  { %v685_v52 = vpop.f32.mrb[20].mxu1  ;;  %v823_v54 = vpop.f32.mrb[12].mxu0 }
 0x25b   :  { %v8738_v55 = vpop.f32.mrb[21].mxu1  ;;  %v8756_v56 = vpop.f32.mrb[13].mxu0  ;;  %v970_v57 = vsel %vm598_vm2, %v685_v52, -inf  ;;  %v979_v2 = vsel %vm598_vm2, %v823_v54, -inf }
 0x25c   :  { %v826_v58 = vpop.f32.mrb[14].mxu0  ;;  %971 = vmax.xlane.f32.xlu0 %v970_v57  ;;  %v688_v63 = vpop.f32.mrb[22].mxu1 }
 0x25d   :  { %v8739_v0 = vpop.f32.mrb[23].mxu1  ;;  %v8757_v1 = vpop.f32.mrb[15].mxu0 }
 0x260   :  { %980 = vmax.xlane.f32.xlu0 %v979_v2 }
 0x262   :  { %v777_v3 = vpop.f32.mrb[24].mxu1  ;;  %v915_v7 = vpop.f32.mrb[16].mxu0 }
 0x263   :  { %v8750_v8 = vpop.f32.mrb[25].mxu1  ;;  %v8768_v9 = vpop.f32.mrb[17].mxu0  ;;  %v985_v12 = vsel %vm598_vm2, %v915_v7, -inf  ;;  %v976_v13 = vsel %vm598_vm2, %v777_v3, -inf }
 0x264   :  { %v918_v15 = vpop.f32.mrb[18].mxu0  ;;  %986 = vmax.xlane.f32.xlu0 %v985_v12  ;;  %977 = vmax.xlane.f32.xlu1 %v976_v13  ;;  %v780_v16 = vpop.f32.mrb[26].mxu1 }
 0x265   :  { %v8751_v18 = vpop.f32.mrb[27].mxu1  ;;  %v8769_v19 = vpop.f32.mrb[19].mxu0 }
 0x26a   :  { %v869_v22 = vpop.f32.mrb[28].mxu1 }
 0x26b   :  { %v8762_v23 = vpop.f32.mrb[29].mxu1  ;;  %v982_v25 = vsel %vm598_vm2, %v869_v22, -inf }
 0x26c   :  { %983 = vmax.xlane.f32.xlu1 %v982_v25  ;;  %v872_v26 = vpop.f32.mrb[30].mxu1 }
 0x26d   :  { %v8763_v27 = vpop.f32.mrb[31].mxu1 }
 0x272   :  { %v10430_v29 = vpop.f32.mrb[32].mxu1 }
 0x273   :  { %v8774_v31 = vpop.f32.mrb[33].mxu1  ;;  %v988_v36 = vsel %vm598_vm2, %v10430_v29, -inf }
 0x274   :  { %989 = vmax.xlane.f32.xlu1 %v988_v36  ;;  %v964_v37 = vpop.f32.mrb[34].mxu1 }
 0x275   :  { %v8775_v41 = vpop.f32.mrb[35].mxu1 }
 0x2e0   :  { %v975_v42 = vpop.xlane.xlu1 %974 }
 0x2e1   :  { %v993_v43 = vsub.f32 %v731_v39, %v975_v42  ;;  %v969_v44 = vpop.xlane.xlu0 %968 }
 0x2e2   :  { %v991_v45 = vsub.f32 %v639_v40, %v969_v44 }
 0x2e3   :  { %v1003_v47 = vmul.f32 1.442695, %v993_v43 }
 0x2e4   :  { %v999_v48 = vmul.f32 1.442695, %v991_v45 }
 0x2e6   :  { %9591 = vpow2.f32 %v999_v48  ;;  %v10497_v48 = vpack.c.bf16 %v10401_v17, %v10401_v17 }
 0x2e7   :  { %9593 = vpow2.f32 %v1003_v47 }
 0x2e9   :  { %v972_v50 = vpop.xlane.xlu0 %971 }
 0x2ea   :  { %v992_v55 = vsub.f32 %v685_v52, %v972_v50 }
 0x2ec   :  { %v1001_v56 = vmul.f32 1.442695, %v992_v55 }
 0x2ed   :  { %v981_v57 = vpop.xlane.xlu0 %980 }
 0x2ee   :  { %9595 = vpow2.f32 %v1001_v56  ;;  %v995_v58 = vsub.f32 %v823_v54, %v981_v57 }
 0x2f0   :  { %v10434_v63 = vpop.eup %9591  ;;  %v1007_v0 = vmul.f32 1.442695, %v995_v58  ;;  %v1160_v58 = vsel %vm1066_vm3, %v10497_v48, 0 }
 0x2f1   :  { %v987_v1 = vpop.xlane.xlu0 %986  ;;  %v978_v2 = vpop.xlane.xlu1 %977  ;;  %v1015_v39 = vsel %vm598_vm2, %v10434_v63, 0.0 }
 0x2f2   :  { %v10438_v8 = vpop.eup %9593  ;;  %9597 = vpow2.f32 %v1007_v0  ;;  %v997_v40 = vsub.f32 %v915_v7, %v987_v1  ;;  %v994_v9 = vsub.f32 %v777_v3, %v978_v2  ;;  %1016 = vadd.xlane.f32.xlu0 %v1015_v39  ;;  %v10513_v2 = vpack.c.bf16 %v10403_v21, %v10403_v21 }
 0x2f3   :  { %v1021_v13 = vsel %vm598_vm2, %v10438_v8, 0.0  ;;  %v10517_v39 = vpack.c.bf16 %v10407_v28, %v10407_v28 }
 0x2f4   :  { %v1011_v12 = vmul.f32 1.442695, %v997_v40  ;;  %v1005_v52 = vmul.f32 1.442695, %v994_v9  ;;  %v1206_v21 = vsel %vm1066_vm3, %v10513_v2, 0 }
 0x2f6   :  { %9599 = vpow2.f32 %v1011_v12  ;;  %1022 = vadd.xlane.f32.xlu0 %v1021_v13 }
 0x2f7   :  { %9601 = vpow2.f32 %v1005_v52 }
 0x2f8   :  { %v10442_v54 = vpop.eup %9595 }
 0x2f9   :  { %v1018_v15 = vsel %vm598_vm2, %v10442_v54, 0.0  ;;  %v984_v25 = vpop.xlane.xlu1 %983 }
 0x2fa   :  { %1019 = vadd.xlane.f32.xlu1 %v1018_v15  ;;  %v996_v26 = vsub.f32 %v869_v22, %v984_v25  ;;  %v10543_v15 = vpack.c.bf16 %v10411_v32, %v10411_v32 }
 0x2fc   :  { %v10446_v16 = vpop.eup %9597  ;;  %v1009_v27 = vmul.f32 1.442695, %v996_v26  ;;  %v1298_v32 = vsel %vm1066_vm3, %v10543_v15, 0 }
 0x2fd   :  { %v1027_v3 = vsel %vm598_vm2, %v10446_v16, 0.0 }
 0x2fe   :  { %1028 = vadd.xlane.f32.xlu0 %v1027_v3  ;;  %9603 = vpow2.f32 %v1009_v27 }
 0x300   :  { %v10450_v7 = vpop.eup %9599 }
 0x301   :  { %v10452_v18 = vpop.eup %9601  ;;  %v1033_v19 = vsel %vm598_vm2, %v10450_v7, 0.0  ;;  %v990_v36 = vpop.xlane.xlu1 %989 }
 0x302   :  { %1034 = vadd.xlane.f32.xlu0 %v1033_v19  ;;  %v1024_v23 = vsel %vm598_vm2, %v10452_v18, 0.0  ;;  %v998_v37 = vsub.f32 %v10430_v29, %v990_v36 }
 0x303   :  { %1025 = vadd.xlane.f32.xlu1 %v1024_v23 }
 0x304   :  { %v1013_v41 = vmul.f32 1.442695, %v998_v37 }
 0x306   :  { %9605 = vpow2.f32 %v1013_v41 }
 0x308   :  { %v10474_v31 = vpop.eup %9603 }
 0x309   :  { %v1030_v22 = vsel %vm598_vm2, %v10474_v31, 0.0 }
 0x310   :  { %v10483_v42 = vpop.eup %9605 }
 0x311   :  { %v1036_v43 = vsel %vm598_vm2, %v10483_v42, 0.0 }
 0x314   :  { %1492 = vrot.lane.b32.xlu1 %v10310_v46, %s10064_s3 }
 0x318   :  { %1442 = vrot.lane.b32.xlu0 %v10299_v38, %s10064_s3 }
 0x31c   :  { %1542 = vrot.lane.b32.xlu0 %v10292_v35, %s10064_s3 }
 0x320   :  { %1540 = vrot.lane.b32.xlu0 %v10313_v49, %s10064_s3 }
 0x324   :  { %1642 = vrot.lane.b32.xlu0 %v10318_v53, %s10064_s3 }
 0x328   :  { %1640 = vrot.lane.b32.xlu0 %v10343_v62, %s10064_s3 }
 0x32c   :  { %1742 = vrot.lane.b32.xlu0 %v10333_v59, %s10064_s3 }
 0x330   :  { %1740 = vrot.lane.b32.xlu0 %v10366_v6, %s10064_s3 }
 0x334   :  { %1936 = vrot.lane.b32.xlu0 %v10413_v33, %s10064_s3 }
 0x338   :  { %1031 = vadd.xlane.f32.xlu1 %v1030_v22 }
 0x349   :  { %1440 = vrot.lane.b32.xlu1 %v10315_v51, %s10064_s3 }
 0x36d   :  { %1037 = vadd.xlane.f32.xlu1 %v1036_v43 }
 0x37e   :  { %1490 = vrot.lane.b32.xlu1 %v10341_v61, %s10064_s3 }
 0x37f   :  { %v1017_v44 = vpop.xlane.xlu0 %1016 }
 0x380   :  { %9607 = vrcp.f32 %v1017_v44 }
 0x382   :  { %1592 = vrot.lane.b32.xlu1 %v10339_v60, %s10064_s3 }
 0x383   :  { %v1023_v45 = vpop.xlane.xlu0 %1022 }
 0x384   :  { %9609 = vrcp.f32 %v1023_v45 }
 0x386   :  { %1590 = vrot.lane.b32.xlu1 %v10364_v5, %s10064_s3 }
 0x387   :  { %v1020_v29 = vpop.xlane.xlu1 %1019 }
 0x388   :  { %9611 = vrcp.f32 %v1020_v29 }
 0x38a   :  { %v9608_v47 = vpop.eup %9607  ;;  %1692 = vrot.lane.b32.xlu1 %v10356_v4, %s10064_s3 }
 0x38b   :  { %v1029_v50 = vpop.xlane.xlu0 %1028  ;;  %v1047_v55 = vmul.f32 %v9608_v47, %v10434_v63  ;;  %v10575_v47 = vpack.c.bf16 %v10409_v30, %v10409_v30 }
 0x38c   :  { %9613 = vrcp.f32 %v1029_v50 }
 0x38d   :  { %v1055_v56 = vpack.c.bf16 %v1047_v55, %v1047_v55  ;;  %v1390_v30 = vsel %vm1066_vm3, %v10575_v47, 0 }
 0x38e   :  { %v9610_v57 = vpop.eup %9609  ;;  %1690 = vrot.lane.b32.xlu1 %v10384_v11, %s10064_s3 }
 0x38f   :  { %8779 = vmatmul.mubr.msk.bf16.vlgmr.msra.gmra.mrb[20].mxu0 %vm598_vm2, %v1055_v56  ;;  %v1035_v17 = vpop.xlane.xlu0 %1034  ;;  %v1049_v63 = vmul.f32 %v9610_v57, %v10438_v8  ;;  %v1252_v8 = vsel %vm1066_vm3, %v10517_v39, 0 }
 0x390   :  { %8789 = vmatpush3.bf16.msra.mxu0 %v1160_v58  ;;  %v1026_v0 = vpop.xlane.xlu1 %1025  ;;  %8790 = vmatprep.mubr.msk.bf16.mxu0 %vm10063_vm1, %v12201_v20 }
 0x391   :  { %9615 = vrcp.f32 %v1026_v0  ;;  %8800 = vmatprep.subr.bf16.mxu0 %v12201_v20  ;;  %v1057_v9 = vpack.c.bf16 %v1049_v63, %v1049_v63 }
 0x392   :  { %v9612_v1 = vpop.eup %9611  ;;  %1792 = vrot.lane.b32.xlu1 %v10379_v10, %s10064_s3  ;;  %9617 = vrcp.f32 %v1035_v17 }
 0x393   :  { %v1048_v40 = vmul.f32 %v9612_v1, %v10442_v54  ;;  %v10538_v54 = vpack.c.bf16 %v10405_v24, %v10405_v24  ;;  %v1443_v25 = vpop.permute.xlu0 %1442 }
 0x394   :  { %v1448_v27 = vsel %vm598_vm2, %v1443_v25, 0  ;;  %v1493_v22 = vpop.permute.xlu1 %1492 }
 0x395   :  { %v1056_v12 = vpack.c.bf16 %v1048_v40, %v1048_v40  ;;  %v1344_v24 = vsel %vm1066_vm3, %v10538_v54, 0 }
 0x396   :  { %v9614_v52 = vpop.eup %9613  ;;  %1790 = vrot.lane.b32.xlu1 %v10395_v14, %s10064_s3 }
 0x397   :  { %8791 = vmatmul.mubr.msk.bf16.vlgmr.msra.gmra.mrb[24].mxu0 %vm598_vm2, %v1057_v9  ;;  %8785 = vmatmul.mubr.msk.bf16.vlgmr.msra.gmra.mrb[36].mxu1 %vm598_vm2, %v1056_v12  ;;  %v1051_v28 = vmul.f32 %v9614_v52, %v10446_v16 }
 0x398   :  { %8801 = vmatpush3.bf16.msra.mxu0 %v1252_v8  ;;  %8795 = vmatpush3.bf16.msra.mxu1 %v1206_v21  ;;  %v1498_v21 = vsel %vm598_vm2, %v1493_v22, 0 }
 0x399   :  { %8796 = vmatprep.mubr.msk.bf16.mxu1 %vm10063_vm1, %v12201_v20  ;;  %8802 = vmatprep.mubr.msk.bf16.mxu0 %vm10063_vm1, %v12201_v20  ;;  %v1059_v19 = vpack.c.bf16 %v1051_v28, %v1051_v28 }
 0x39a   :  { %1984 = vrot.lane.b32.xlu1 %v10415_v34, %s10064_s3  ;;  %8806 = vmatprep.subr.bf16.mxu1 %v12201_v20 }
 0x39b   :  { %v9616_v13 = vpop.eup %9615  ;;  %8812 = vmatprep.subr.bf16.mxu0 %v12201_v20 }
 0x39c   :  { %v1050_v3 = vmul.f32 %v9616_v13, %v10452_v18  ;;  %v9618_v16 = vpop.eup %9617 }
 0x39d   :  { %v1053_v18 = vmul.f32 %v9618_v16, %v10450_v7  ;;  %v1543_v7 = vpop.permute.xlu0 %1542 }
 0x39e   :  { %2032 = vrot.lane.b32.xlu1 %v10497_v48, %s10064_s3  ;;  %v1058_v23 = vpack.c.bf16 %v1050_v3, %v1050_v3  ;;  %v1548_v44 = vsel %vm598_vm2, %v1543_v7, 0 }
 0x39f   :  { %8803 = vmatmul.mubr.msk.bf16.vlgmr.msra.gmra.mrb[28].mxu0 %vm598_vm2, %v1059_v19  ;;  %v1061_v26 = vpack.c.bf16 %v1053_v18, %v1053_v18 }
 0x3a0   :  { %8813 = vmatpush3.bf16.msra.mxu0 %v1344_v24  ;;  %8797 = vmatmul.mubr.msk.bf16.vlgmr.msra.gmra.mrb[40].mxu1 %vm598_vm2, %v1058_v23 }
 0x3a1   :  { %8807 = vmatpush3.bf16.msra.mxu1 %v1298_v32  ;;  %8814 = vmatprep.mubr.msk.bf16.mxu0 %vm10063_vm1, %v12201_v20  ;;  %v1541_v36 = vpop.permute.xlu0 %1540 }
 0x3a2   :  { %2080 = vrot.lane.b32.xlu1 %v10513_v2, %s10064_s3  ;;  %8824 = vmatprep.subr.bf16.mxu0 %v12201_v20 }
 0x3a3   :  { %8808 = vmatprep.mubr.msk.bf16.mxu1 %vm10063_vm1, %v12201_v20  ;;  %8818 = vmatprep.subr.bf16.mxu1 %v12201_v20 }
 0x3a5   :  { %v1643_v41 = vpop.permute.xlu0 %1642 }
 0x3a6   :  { %v1648_v55 = vsel %vm598_vm2, %v1643_v41, 0 }
 0x3a7   :  { %8815 = vmatmul.mubr.msk.bf16.vlgmr.msra.gmra.mrb[32].mxu0 %vm598_vm2, %v1061_v26 }
 0x3a8   :  { %8826 = vmatprep.mubr.msk.bf16.mxu0 %vm10063_vm1, %v12201_v20 }
 0x3a9   :  { %8825 = vmatpush3.bf16.xpose.msra.mxu0 %v1448_v27  ;;  %v1641_v45 = vpop.permute.xlu0 %1640 }
 0x3aa   :  { %8836 = vmatprep.subr.bf16.mxu0 %v12201_v20 }
 0x3ad   :  { %v1743_v56 = vpop.permute.xlu0 %1742 }
 0x3ae   :  { %v1748_v58 = vsel %vm598_vm2, %v1743_v56, 0 }
 0x3c5   :  { %v1032_v37 = vpop.xlane.xlu1 %1031 }
 0x3c6   :  { %9619 = vrcp.f32 %v1032_v37 }
 0x3c9   :  { %v1441_v43 = vpop.permute.xlu1 %1440 }
 0x3ca   :  { %8827 = vmatmul.mubr.msk.bf16.vlgmr.msra.gmra.mrb[36].mxu0 %vm598_vm2, %v1441_v43 }
 0x3cb   :  { %8837 = vmatpush3.bf16.xpose.msra.mxu0 %v1548_v44  ;;  %8838 = vmatprep.mubr.msk.bf16.mxu0 %vm10063_vm1, %v12201_v20 }
 0x3cc   :  { %8848 = vmatprep.subr.bf16.mxu0 %v12201_v20 }
 0x3d0   :  { %v9620_v29 = vpop.eup %9619 }
 0x3d1   :  { %v1052_v50 = vmul.f32 %v9620_v29, %v10474_v31  ;;  %v1741_v31 = vpop.permute.xlu0 %1740 }
 0x3d2   :  { %8839 = vmatmul.mubr.msk.bf16.vlgmr.msra.gmra.mrb[40].mxu0 %vm598_vm2, %v1541_v36 }
 0x3d3   :  { %8849 = vmatpush3.bf16.xpose.msra.mxu0 %v1648_v55  ;;  %v1060_v57 = vpack.c.bf16 %v1052_v50, %v1052_v50  ;;  %8850 = vmatprep.mubr.msk.bf16.mxu0 %vm10063_vm1, %v12201_v20 }
 0x3d4   :  { %8860 = vmatprep.subr.bf16.mxu0 %v12201_v20 }
 0x3d5   :  { %8809 = vmatmul.mubr.msk.bf16.vlgmr.msra.gmra.mrb[44].mxu1 %vm598_vm2, %v1060_v57  ;;  %v1937_v0 = vpop.permute.xlu0 %1936 }
 0x3d6   :  { %8819 = vmatpush3.bf16.msra.mxu1 %v1390_v30  ;;  %8820 = vmatprep.mubr.msk.bf16.mxu1 %vm10063_vm1, %v12201_v20  ;;  %v1942_v17 = vsel %vm1066_vm3, %v1937_v0, 0 }
 0x3d7   :  { %8830 = vmatprep.subr.bf16.mxu1 %v12201_v20 }
 0x3da   :  { %8851 = vmatmul.mubr.msk.bf16.vlgmr.msra.gmra.mrb[44].mxu0 %vm598_vm2, %v1641_v45 }
 0x3db   :  { %8861 = vmatpush3.bf16.xpose.msra.mxu0 %v1748_v58  ;;  %8862 = vmatprep.mubr.msk.bf16.mxu0 %vm10063_vm1, %v12201_v20 }
 0x3dc   :  { %8872 = vmatprep.subr.bf16.mxu0 %v12201_v20 }
 0x3e2   :  { %8863 = vmatmul.mubr.msk.bf16.vlgmr.msra.gmra.mrb[48].mxu0 %vm598_vm2, %v1741_v31 }
 0x3e3   :  { %8873 = vmatpush3.bf16.msra.mxu0 %v1942_v17  ;;  %8874 = vmatprep.mubr.msk.bf16.mxu0 %vm10063_vm1, %v12201_v20 }
 0x3e4   :  { %8884 = vmatprep.subr.bf16.mxu0 %v12201_v20 }
 0x3fa   :  { %v1038_v63 = vpop.xlane.xlu1 %1037 }
 0x3fb   :  { %9621 = vrcp.f32 %v1038_v63 }
 0x3fe   :  { %v1491_v1 = vpop.permute.xlu1 %1490 }
 0x402   :  { %v1593_v40 = vpop.permute.xlu1 %1592 }
 0x403   :  { %v1598_v13 = vsel %vm598_vm2, %v1593_v40, 0 }
 0x405   :  { %v9622_v9 = vpop.eup %9621 }
 0x406   :  { %v1054_v12 = vmul.f32 %v9622_v9, %v10483_v42  ;;  %v1591_v8 = vpop.permute.xlu1 %1590 }
 0x408   :  { %v1062_v52 = vpack.c.bf16 %v1054_v12, %v1054_v12 }
 0x40a   :  { %8821 = vmatmul.mubr.msk.bf16.vlgmr.msra.gmra.mrb[48].mxu1 %vm598_vm2, %v1062_v52  ;;  %v1693_v28 = vpop.permute.xlu1 %1692 }
 0x40b   :  { %8831 = vmatpush3.bf16.xpose.msra.mxu1 %v1498_v21  ;;  %8832 = vmatprep.mubr.msk.bf16.mxu1 %vm10063_vm1, %v12201_v20  ;;  %v1698_v3 = vsel %vm598_vm2, %v1693_v28, 0 }
 0x40c   :  { %8842 = vmatprep.subr.bf16.mxu1 %v12201_v20 }
 0x40e   :  { %v1691_v42 = vpop.permute.xlu1 %1690 }
 0x412   :  { %8833 = vmatmul.mubr.msk.bf16.vlgmr.msra.gmra.mrb[52].mxu1 %vm598_vm2, %v1491_v1  ;;  %v1793_v19 = vpop.permute.xlu1 %1792 }
 0x413   :  { %8843 = vmatpush3.bf16.xpose.msra.mxu1 %v1598_v13  ;;  %8844 = vmatprep.mubr.msk.bf16.mxu1 %vm10063_vm1, %v12201_v20  ;;  %v1798_v23 = vsel %vm598_vm2, %v1793_v19, 0 }
 0x414   :  { %8854 = vmatprep.subr.bf16.mxu1 %v12201_v20 }
 0x416   :  { %v1791_v16 = vpop.permute.xlu1 %1790 }
 0x41a   :  { %8845 = vmatmul.mubr.msk.bf16.vlgmr.msra.gmra.mrb[56].mxu1 %vm598_vm2, %v1591_v8  ;;  %v1985_v24 = vpop.permute.xlu1 %1984 }
 0x41b   :  { %8855 = vmatpush3.bf16.xpose.msra.mxu1 %v1698_v3  ;;  %8856 = vmatprep.mubr.msk.bf16.mxu1 %vm10063_vm1, %v12201_v20  ;;  %v1990_v32 = vsel %vm1066_vm3, %v1985_v24, 0 }
 0x41c   :  { %8866 = vmatprep.subr.bf16.mxu1 %v12201_v20 }
 0x422   :  { %8857 = vmatmul.mubr.msk.bf16.vlgmr.msra.gmra.mrb[60].mxu1 %vm598_vm2, %v1691_v42 }
 0x423   :  { %8867 = vmatpush3.bf16.xpose.msra.mxu1 %v1798_v23  ;;  %8868 = vmatprep.mubr.msk.bf16.mxu1 %vm10063_vm1, %v12201_v20 }
 0x424   :  { %8878 = vmatprep.subr.bf16.mxu1 %v12201_v20 }
 0x42a   :  { %8869 = vmatmul.mubr.msk.bf16.vlgmr.msra.gmra.mrb[64].mxu1 %vm598_vm2, %v1791_v16 }
 0x42b   :  { %8879 = vmatpush3.bf16.msra.mxu1 %v1990_v32  ;;  %8880 = vmatprep.mubr.msk.bf16.mxu1 %vm10063_vm1, %v12201_v20 }
 0x42c   :  { %8890 = vmatprep.subr.bf16.mxu1 %v12201_v20 }
 0x462   :  { %v1104_v18 = vpop.f32.mrb[20].mxu0 }
 0x463   :  { %1432 = vst.msk [vmem:[#allocation2] sm:$0xff] %vm598_vm2, %v1104_v18  ;;  %v8780_v25 = vpop.f32.mrb[21].mxu0 }
 0x464   :  { %v1107_v26 = vpop.f32.mrb[22].mxu0 }
 0x465   :  { %v8781_v27 = vpop.f32.mrb[23].mxu0 }
 0x46a   :  { %v1150_v7 = vpop.f32.mrb[36].mxu1  ;;  %v1196_v22 = vpop.f32.mrb[24].mxu0 }
 0x46b   :  { %1433 = vst.msk [vmem:[#allocation2 + $0x8] sm:$0xff] %vm598_vm2, %v1150_v7  ;;  %1434 = vst.msk [vmem:[#allocation2 + $0x10] sm:$0xff] %vm598_vm2, %v1196_v22  ;;  %v8786_v36 = vpop.f32.mrb[37].mxu1  ;;  %v8792_v37 = vpop.f32.mrb[25].mxu0 }
 0x46c   :  { %v1153_v41 = vpop.f32.mrb[38].mxu1  ;;  %v1199_v43 = vpop.f32.mrb[26].mxu0 }
 0x46d   :  { %v8787_v44 = vpop.f32.mrb[39].mxu1  ;;  %v8793_v45 = vpop.f32.mrb[27].mxu0 }
 0x472   :  { %v1288_v29 = vpop.f32.mrb[28].mxu0 }
 0x473   :  { %v1242_v50 = vpop.f32.mrb[40].mxu1  ;;  %1436 = vst.msk [vmem:[#allocation2 + $0x20] sm:$0xff] %vm598_vm2, %v1288_v29  ;;  %v8804_v55 = vpop.f32.mrb[29].mxu0 }
 0x474   :  { %1435 = vst.msk [vmem:[#allocation2 + $0x18] sm:$0xff] %vm598_vm2, %v1242_v50  ;;  %v8798_v56 = vpop.f32.mrb[41].mxu1  ;;  %v1291_v57 = vpop.f32.mrb[30].mxu0 }
 0x475   :  { %v1245_v30 = vpop.f32.mrb[42].mxu1  ;;  %v8805_v31 = vpop.f32.mrb[31].mxu0 }
 0x476   :  { %v8799_v58 = vpop.f32.mrb[43].mxu1 }
 0x47a   :  { %v1380_v0 = vpop.f32.mrb[32].mxu0 }
 0x47b   :  { %1438 = vst.msk [vmem:[#allocation2 + $0x30] sm:$0xff] %vm598_vm2, %v1380_v0  ;;  %v8816_v17 = vpop.f32.mrb[33].mxu0 }
 0x47c   :  { %v1383_v63 = vpop.f32.mrb[34].mxu0 }
 0x47d   :  { %v8817_v1 = vpop.f32.mrb[35].mxu0 }
 0x49d   :  { %v1484_v40 = vpop.f32.mrb[36].mxu0 }
 0x49e   :  { %v8828_v9 = vpop.f32.mrb[37].mxu0  ;;  %v1840_v12 = vsel %vm598_vm2, %v1484_v40, -inf }
 0x49f   :  { %1841 = vmax.xlane.f32.xlu0 %v1840_v12  ;;  %v1487_v52 = vpop.f32.mrb[38].mxu0 }
 0x4a0   :  { %v8829_v8 = vpop.f32.mrb[39].mxu0 }
 0x4a5   :  { %v1584_v21 = vpop.f32.mrb[40].mxu0 }
 0x4a6   :  { %v8840_v28 = vpop.f32.mrb[41].mxu0  ;;  %v1846_v13 = vsel %vm598_vm2, %v1584_v21, -inf }
 0x4a7   :  { %1847 = vmax.xlane.f32.xlu0 %v1846_v13  ;;  %v1587_v42 = vpop.f32.mrb[42].mxu0 }
 0x4a8   :  { %v1334_v3 = vpop.f32.mrb[44].mxu1  ;;  %v8841_v19 = vpop.f32.mrb[43].mxu0 }
 0x4a9   :  { %1437 = vst.msk [vmem:[#allocation2 + $0x28] sm:$0xff] %vm598_vm2, %v1334_v3  ;;  %v8810_v16 = vpop.f32.mrb[45].mxu1 }
 0x4aa   :  { %v1337_v23 = vpop.f32.mrb[46].mxu1 }
 0x4ab   :  { %v8811_v24 = vpop.f32.mrb[47].mxu1 }
 0x4ad   :  { %v10634_v32 = vpop.f32.mrb[44].mxu0 }
 0x4ae   :  { %v8852_v18 = vpop.f32.mrb[45].mxu0  ;;  %v1852_v17 = vsel %vm598_vm2, %v10634_v32, -inf }
 0x4af   :  { %v1687_v25 = vpop.f32.mrb[46].mxu0 }
 0x4b0   :  { %v8853_v26 = vpop.f32.mrb[47].mxu0 }
 0x4b5   :  { %v10636_v27 = vpop.f32.mrb[48].mxu0 }
 0x4b6   :  { %v8864_v7 = vpop.f32.mrb[49].mxu0  ;;  %v1858_v9 = vsel %vm598_vm2, %v10636_v27, -inf }
 0x4b7   :  { %v1787_v22 = vpop.f32.mrb[50].mxu0 }
 0x4b8   :  { %v8865_v36 = vpop.f32.mrb[51].mxu0 }
 0x4dd   :  { %v1426_v37 = vpop.f32.mrb[48].mxu1 }
 0x4de   :  { %1439 = vst.msk [vmem:[#allocation2 + $0x38] sm:$0xff] %vm598_vm2, %v1426_v37  ;;  %v8822_v41 = vpop.f32.mrb[49].mxu1 }
 0x4df   :  { %v1429_v43 = vpop.f32.mrb[50].mxu1  ;;  %v2033_v41 = vpop.permute.xlu1 %2032 }
 0x4e0   :  { %v8823_v44 = vpop.f32.mrb[51].mxu1 }
 0x4e3   :  { %v10656_v43 = vpop.permute.xlu1 %2080 }
 0x4e5   :  { %v1534_v45 = vpop.f32.mrb[52].mxu1 }
 0x4e6   :  { %v8834_v29 = vpop.f32.mrb[53].mxu1  ;;  %v1843_v50 = vsel %vm598_vm2, %v1534_v45, -inf }
 0x4e7   :  { %1844 = vmax.xlane.f32.xlu1 %v1843_v50  ;;  %v1537_v55 = vpop.f32.mrb[54].mxu1 }
 0x4e8   :  { %v8835_v56 = vpop.f32.mrb[55].mxu1 }
 0x4ed   :  { %v1634_v57 = vpop.f32.mrb[56].mxu1 }
 0x4ee   :  { %v8846_v30 = vpop.f32.mrb[57].mxu1  ;;  %v1849_v31 = vsel %vm598_vm2, %v1634_v57, -inf }
 0x4ef   :  { %1850 = vmax.xlane.f32.xlu0 %v1849_v31  ;;  %v1637_v58 = vpop.f32.mrb[58].mxu1 }
 0x4f0   :  { %v8847_v0 = vpop.f32.mrb[59].mxu1 }
 0x4f3   :  { %1853 = vmax.xlane.f32.xlu0 %v1852_v17 }
 0x4f5   :  { %v1734_v63 = vpop.f32.mrb[60].mxu1 }
 0x4f6   :  { %v8858_v1 = vpop.f32.mrb[61].mxu1  ;;  %v1855_v12 = vsel %vm598_vm2, %v1734_v63, -inf }
 0x4f7   :  { %1859 = vmax.xlane.f32.xlu0 %v1858_v9  ;;  %1856 = vmax.xlane.f32.xlu1 %v1855_v12  ;;  %v1737_v52 = vpop.f32.mrb[62].mxu1 }
 0x4f8   :  { %v8859_v8 = vpop.f32.mrb[63].mxu1 }
 0x4fd   :  { %v10646_v28 = vpop.f32.mrb[64].mxu1 }
 0x4fe   :  { %v8870_v13 = vpop.f32.mrb[65].mxu1  ;;  %v1861_v19 = vsel %vm598_vm2, %v10646_v28, -inf }
 0x4ff   :  { %v1837_v42 = vpop.f32.mrb[66].mxu1 }
 0x500   :  { %v8871_v3 = vpop.f32.mrb[67].mxu1 }
 0x508   :  { %2176 = vrot.lane.b32.xlu1 %v10543_v15, %s10064_s3 }
 0x50d   :  { %2128 = vrot.lane.b32.xlu0 %v10517_v39, %s10064_s3 }
 0x52c   :  { %v1842_v16 = vpop.xlane.xlu0 %1841  ;;  %1862 = vmax.xlane.f32.xlu1 %v1861_v19 }
 0x52d   :  { %v1864_v23 = vsub.f32 %v1484_v40, %v1842_v16 }
 0x52f   :  { %v1872_v24 = vmul.f32 1.442695, %v1864_v23 }
 0x531   :  { %9623 = vpow2.f32 %v1872_v24 }
 0x534   :  { %v1848_v18 = vpop.xlane.xlu0 %1847 }
 0x535   :  { %v1866_v25 = vsub.f32 %v1584_v21, %v1848_v18 }
 0x537   :  { %v1876_v26 = vmul.f32 1.442695, %v1866_v25 }
 0x539   :  { %9625 = vpow2.f32 %v1876_v26  ;;  %v2038_v26 = vsel %vm1066_vm3, %v2033_v41, 0 }
 0x53b   :  { %v9624_v7 = vpop.eup %9623 }
 0x53c   :  { %v1888_v22 = vsel %vm598_vm2, %v9624_v7, 0.0 }
 0x53d   :  { %1889 = vadd.xlane.f32.xlu0 %v1888_v22 }
 0x543   :  { %v9626_v36 = vpop.eup %9625 }
 0x544   :  { %v1894_v37 = vsel %vm598_vm2, %v9626_v36, 0.0 }
 0x545   :  { %1895 = vadd.xlane.f32.xlu0 %v1894_v37 }
 0x574   :  { %v1845_v44 = vpop.xlane.xlu1 %1844 }
 0x575   :  { %v1865_v29 = vsub.f32 %v1534_v45, %v1845_v44 }
 0x577   :  { %v1874_v40 = vmul.f32 1.442695, %v1865_v29 }
 0x579   :  { %9627 = vpow2.f32 %v1874_v40 }
 0x57c   :  { %v1851_v50 = vpop.xlane.xlu0 %1850 }
 0x57d   :  { %v1867_v55 = vsub.f32 %v1634_v57, %v1851_v50 }
 0x57f   :  { %v1878_v21 = vmul.f32 1.442695, %v1867_v55 }
 0x580   :  { %v1854_v56 = vpop.xlane.xlu0 %1853 }
 0x581   :  { %9629 = vpow2.f32 %v1878_v21  ;;  %v1868_v30 = vsub.f32 %v10634_v32, %v1854_v56 }
 0x583   :  { %v10659_v31 = vpop.eup %9627  ;;  %v1880_v58 = vmul.f32 1.442695, %v1868_v30 }
 0x584   :  { %v1891_v0 = vsel %vm598_vm2, %v10659_v31, 0.0  ;;  %v1857_v32 = vpop.xlane.xlu1 %1856  ;;  %v1860_v12 = vpop.xlane.xlu0 %1859 }
 0x585   :  { %9631 = vpow2.f32 %v1880_v58  ;;  %1892 = vadd.xlane.f32.xlu1 %v1891_v0  ;;  %v1869_v9 = vsub.f32 %v1734_v63, %v1857_v32  ;;  %v1870_v52 = vsub.f32 %v10636_v27, %v1860_v12 }
 0x587   :  { %v1882_v8 = vmul.f32 1.442695, %v1869_v9  ;;  %v1884_v13 = vmul.f32 1.442695, %v1870_v52 }
 0x588   :  { %v2129_v23 = vpop.permute.xlu0 %2128  ;;  %v2177_v22 = vpop.permute.xlu1 %2176 }
 0x589   :  { %9633 = vpow2.f32 %v1882_v8  ;;  %v2134_v40 = vsel %vm1066_vm3, %v2129_v23, 0 }
 0x58a   :  { %9635 = vpow2.f32 %v1884_v13 }
 0x58b   :  { %v10663_v17 = vpop.eup %9629 }
 0x58c   :  { %v1897_v45 = vsel %vm598_vm2, %v10663_v17, 0.0 }
 0x58d   :  { %1898 = vadd.xlane.f32.xlu1 %v1897_v45  ;;  %v2086_v45 = vsel %vm1066_vm3, %v10656_v43, 0  ;;  %v2182_v43 = vsel %vm1066_vm3, %v2177_v22, 0 }
 0x58f   :  { %v10667_v57 = vpop.eup %9631 }
 0x590   :  { %v1900_v1 = vsel %vm598_vm2, %v10667_v57, 0.0 }
 0x591   :  { %1901 = vadd.xlane.f32.xlu0 %v1900_v1 }
 0x593   :  { %v10676_v42 = vpop.eup %9633 }
 0x594   :  { %v1903_v3 = vsel %vm598_vm2, %v10676_v42, 0.0  ;;  %v10680_v19 = vpop.eup %9635 }
 0x595   :  { %v1906_v16 = vsel %vm598_vm2, %v10680_v19, 0.0 }
 0x59e   :  { %2272 = vrot.lane.b32.xlu1 %v10575_v47, %s10064_s3 }
 0x5a7   :  { %2224 = vrot.lane.b32.xlu0 %v10538_v54, %s10064_s3 }
 0x5b9   :  { %v1863_v44 = vpop.xlane.xlu1 %1862 }
 0x5ba   :  { %v1871_v41 = vsub.f32 %v10646_v28, %v1863_v44 }
 0x5c2   :  { %1904 = vadd.xlane.f32.xlu1 %v1903_v3 }
 0x5c6   :  { %1907 = vadd.xlane.f32.xlu0 %v1906_v16 }
 0x5ca   :  { %v1890_v63 = vpop.xlane.xlu0 %1889 }
 0x5cb   :  { %9637 = vrcp.f32 %v1890_v63 }
 0x5d2   :  { %v1896_v27 = vpop.xlane.xlu0 %1895 }
 0x5d3   :  { %9639 = vrcp.f32 %v1896_v27  ;;  %2413 = vrot.lane.b32.xlu1 %v10310_v46, %s10065_s5 }
 0x5d5   :  { %v9638_v24 = vpop.eup %9637 }
 0x5d6   :  { %v1920_v18 = vmul.f32 %v9638_v24, %v9624_v7 }
 0x5d8   :  { %v1928_v25 = vpack.c.bf16 %v1920_v18, %v1920_v18 }
 0x5da   :  { %8875 = vmatmul.mubr.msk.bf16.vlgmr.msra.gmra.mrb[52].mxu0 %vm598_vm2, %v1928_v25 }
 0x5db   :  { %8885 = vmatpush3.bf16.msra.mxu0 %v2038_v26  ;;  %8886 = vmatprep.mubr.msk.bf16.mxu0 %vm10063_vm1, %v12201_v20 }
 0x5dc   :  { %2363 = vrot.lane.b32.xlu0 %v10299_v38, %s10065_s5  ;;  %8896 = vmatprep.subr.bf16.mxu0 %v12201_v20 }
 0x5dd   :  { %v9640_v37 = vpop.eup %9639 }
 0x5de   :  { %v1922_v29 = vmul.f32 %v9640_v37, %v9626_v36  ;;  %v1886_v36 = vmul.f32 1.442695, %v1871_v41 }
 0x5e0   :  { %2361 = vrot.lane.b32.xlu0 %v10315_v51, %s10065_s5  ;;  %v1930_v7 = vpack.c.bf16 %v1922_v29, %v1922_v29  ;;  %9641 = vpow2.f32 %v1886_v36 }
 0x5e2   :  { %8887 = vmatmul.mubr.msk.bf16.vlgmr.msra.gmra.mrb[56].mxu0 %vm598_vm2, %v1930_v7 }
 0x5e3   :  { %8897 = vmatpush3.bf16.msra.mxu0 %v2134_v40  ;;  %8898 = vmatprep.mubr.msk.bf16.mxu0 %vm10063_vm1, %v12201_v20 }
 0x5e4   :  { %2463 = vrot.lane.b32.xlu0 %v10292_v35, %s10065_s5  ;;  %8908 = vmatprep.subr.bf16.mxu0 %v12201_v20 }
 0x5e8   :  { %2461 = vrot.lane.b32.xlu0 %v10313_v49, %s10065_s5 }
 0x5ea   :  { %v10709_v28 = vpop.eup %9641 }
 0x5eb   :  { %v1909_v50 = vsel %vm598_vm2, %v10709_v28, 0.0 }
 0x5ec   :  { %2563 = vrot.lane.b32.xlu0 %v10318_v53, %s10065_s5 }
 0x5f0   :  { %2561 = vrot.lane.b32.xlu0 %v10343_v62, %s10065_s5 }
 0x5f4   :  { %2663 = vrot.lane.b32.xlu0 %v10333_v59, %s10065_s5 }
 0x5f7   :  { %1910 = vadd.xlane.f32.xlu1 %v1909_v50 }
 0x5f8   :  { %2661 = vrot.lane.b32.xlu0 %v10366_v6, %s10065_s5 }
 0x5fc   :  { %2857 = vrot.lane.b32.xlu0 %v10413_v33, %s10065_s5 }
 0x608   :  { %2411 = vrot.lane.b32.xlu1 %v10341_v61, %s10065_s5 }
 0x60c   :  { %2513 = vrot.lane.b32.xlu1 %v10339_v60, %s10065_s5 }
 0x610   :  { %2511 = vrot.lane.b32.xlu1 %v10364_v5, %s10065_s5 }
 0x612   :  { %v1893_v55 = vpop.xlane.xlu1 %1892 }
 0x613   :  { %9643 = vrcp.f32 %v1893_v55 }
 0x614   :  { %2613 = vrot.lane.b32.xlu1 %v10356_v4, %s10065_s5 }
 0x618   :  { %2611 = vrot.lane.b32.xlu1 %v10384_v11, %s10065_s5 }
 0x61a   :  { %v1899_v21 = vpop.xlane.xlu1 %1898 }
 0x61b   :  { %9645 = vrcp.f32 %v1899_v21 }
 0x61c   :  { %2713 = vrot.lane.b32.xlu1 %v10379_v10, %s10065_s5 }
 0x61d   :  { %v9644_v56 = vpop.eup %9643 }
 0x61e   :  { %v1902_v30 = vpop.xlane.xlu0 %1901  ;;  %v1921_v58 = vmul.f32 %v9644_v56, %v10659_v31 }
 0x61f   :  { %9647 = vrcp.f32 %v1902_v30 }
 0x620   :  { %2711 = vrot.lane.b32.xlu1 %v10395_v14, %s10065_s5  ;;  %v1929_v0 = vpack.c.bf16 %v1921_v58, %v1921_v58 }
 0x622   :  { %8881 = vmatmul.mubr.msk.bf16.vlgmr.msra.gmra.mrb[68].mxu1 %vm598_vm2, %v1929_v0  ;;  %v2225_v52 = vpop.permute.xlu0 %2224 }
 0x623   :  { %8891 = vmatpush3.bf16.msra.mxu1 %v2086_v45  ;;  %8892 = vmatprep.mubr.msk.bf16.mxu1 %vm10063_vm1, %v12201_v20  ;;  %v2230_v8 = vsel %vm1066_vm3, %v2225_v52, 0 }
 0x624   :  { %2905 = vrot.lane.b32.xlu1 %v10415_v34, %s10065_s5  ;;  %8902 = vmatprep.subr.bf16.mxu1 %v12201_v20 }
 0x625   :  { %v9646_v31 = vpop.eup %9645 }
 0x626   :  { %v1923_v1 = vmul.f32 %v9646_v31, %v10663_v17 }
 0x628   :  { %2953 = vrot.lane.b32.xlu1 %v10497_v48, %s10065_s5  ;;  %v1931_v32 = vpack.c.bf16 %v1923_v1, %v1923_v1 }
 0x629   :  { %v9648_v9 = vpop.eup %9647 }
 0x62a   :  { %8893 = vmatmul.mubr.msk.bf16.vlgmr.msra.gmra.mrb[72].mxu1 %vm598_vm2, %v1931_v32  ;;  %v1924_v12 = vmul.f32 %v9648_v9, %v10667_v57  ;;  %v2273_v57 = vpop.permute.xlu1 %2272 }
 0x62b   :  { %8903 = vmatpush3.bf16.msra.mxu1 %v2182_v43  ;;  %8904 = vmatprep.mubr.msk.bf16.mxu1 %vm10063_vm1, %v12201_v20  ;;  %v2278_v25 = vsel %vm1066_vm3, %v2273_v57, 0 }
 0x62c   :  { %3001 = vrot.lane.b32.xlu1 %v10513_v2, %s10065_s5  ;;  %v1932_v17 = vpack.c.bf16 %v1924_v12, %v1924_v12  ;;  %8914 = vmatprep.subr.bf16.mxu1 %v12201_v20 }
 0x62e   :  { %8899 = vmatmul.mubr.msk.bf16.vlgmr.msra.gmra.mrb[60].mxu0 %vm598_vm2, %v1932_v17 }
 0x62f   :  { %8909 = vmatpush3.bf16.msra.mxu0 %v2230_v8  ;;  %8910 = vmatprep.mubr.msk.bf16.mxu0 %vm10063_vm1, %v12201_v20 }
 0x630   :  { %8920 = vmatprep.subr.bf16.mxu0 %v12201_v20 }
 0x64f   :  { %v1905_v13 = vpop.xlane.xlu1 %1904 }
 0x650   :  { %9649 = vrcp.f32 %v1905_v13 }
 0x653   :  { %v1908_v3 = vpop.xlane.xlu0 %1907  ;;  %v2414_v55 = vpop.permute.xlu1 %2413 }
 0x654   :  { %9651 = vrcp.f32 %v1908_v3  ;;  %v2419_v9 = vsel %vm598_vm2, %v2414_v55, 0 }
 0x657   :  { %v2364_v16 = vpop.permute.xlu0 %2363 }
 0x658   :  { %v2369_v44 = vsel %vm598_vm2, %v2364_v16, 0 }
 0x65a   :  { %v9650_v23 = vpop.eup %9649 }
 0x65b   :  { %v2362_v63 = vpop.permute.xlu0 %2361  ;;  %v1925_v27 = vmul.f32 %v9650_v23, %v10676_v42 }
 0x65d   :  { %v1933_v24 = vpack.c.bf16 %v1925_v27, %v1925_v27 }
 0x65e   :  { %v9652_v18 = vpop.eup %9651 }
 0x65f   :  { %v2464_v26 = vpop.permute.xlu0 %2463  ;;  %8905 = vmatmul.mubr.msk.bf16.vlgmr.msra.gmra.mrb[76].mxu1 %vm598_vm2, %v1933_v24  ;;  %v1926_v22 = vmul.f32 %v9652_v18, %v10680_v19 }
 0x660   :  { %8915 = vmatpush3.bf16.msra.mxu1 %v2278_v25  ;;  %8916 = vmatprep.mubr.msk.bf16.mxu1 %vm10063_vm1, %v12201_v20  ;;  %v2469_v19 = vsel %vm598_vm2, %v2464_v26, 0 }
 0x661   :  { %v1934_v37 = vpack.c.bf16 %v1926_v22, %v1926_v22  ;;  %8926 = vmatprep.subr.bf16.mxu1 %v12201_v20 }
 0x663   :  { %8911 = vmatmul.mubr.msk.bf16.vlgmr.msra.gmra.mrb[64].mxu0 %vm598_vm2, %v1934_v37  ;;  %v2462_v42 = vpop.permute.xlu0 %2461 }
 0x664   :  { %8921 = vmatpush3.bf16.xpose.msra.mxu0 %v2369_v44  ;;  %8922 = vmatprep.mubr.msk.bf16.mxu0 %vm10063_vm1, %v12201_v20 }
 0x665   :  { %8932 = vmatprep.subr.bf16.mxu0 %v12201_v20 }
 0x667   :  { %v2564_v29 = vpop.permute.xlu0 %2563 }
 0x668   :  { %v2569_v41 = vsel %vm598_vm2, %v2564_v29, 0 }
 0x66b   :  { %8923 = vmatmul.mubr.msk.bf16.vlgmr.msra.gmra.mrb[68].mxu0 %vm598_vm2, %v2362_v63  ;;  %v2562_v7 = vpop.permute.xlu0 %2561 }
 0x66c   :  { %8933 = vmatpush3.bf16.xpose.msra.mxu0 %v2469_v19  ;;  %8934 = vmatprep.mubr.msk.bf16.mxu0 %vm10063_vm1, %v12201_v20 }
 0x66d   :  { %8944 = vmatprep.subr.bf16.mxu0 %v12201_v20 }
 0x66f   :  { %v2664_v40 = vpop.permute.xlu0 %2663 }
 0x670   :  { %v2669_v50 = vsel %vm598_vm2, %v2664_v40, 0 }
 0x673   :  { %8935 = vmatmul.mubr.msk.bf16.vlgmr.msra.gmra.mrb[72].mxu0 %vm598_vm2, %v2462_v42  ;;  %v2662_v36 = vpop.permute.xlu0 %2661 }
 0x674   :  { %8945 = vmatpush3.bf16.xpose.msra.mxu0 %v2569_v41  ;;  %8946 = vmatprep.mubr.msk.bf16.mxu0 %vm10063_vm1, %v12201_v20 }
 0x675   :  { %8956 = vmatprep.subr.bf16.mxu0 %v12201_v20 }
 0x677   :  { %v2858_v21 = vpop.permute.xlu0 %2857 }
 0x678   :  { %v2863_v56 = vsel %vm1066_vm3, %v2858_v21, 0 }
 0x67b   :  { %8947 = vmatmul.mubr.msk.bf16.vlgmr.msra.gmra.mrb[76].mxu0 %vm598_vm2, %v2562_v7 }
 0x67c   :  { %8957 = vmatpush3.bf16.xpose.msra.mxu0 %v2669_v50  ;;  %8958 = vmatprep.mubr.msk.bf16.mxu0 %vm10063_vm1, %v12201_v20 }
 0x67d   :  { %8968 = vmatprep.subr.bf16.mxu0 %v12201_v20 }
 0x683   :  { %8959 = vmatmul.mubr.msk.bf16.vlgmr.msra.gmra.mrb[80].mxu0 %vm598_vm2, %v2662_v36 }
 0x684   :  { %8969 = vmatpush3.bf16.msra.mxu0 %v2863_v56  ;;  %v1911_v30 = vpop.xlane.xlu1 %1910  ;;  %8970 = vmatprep.mubr.msk.bf16.mxu0 %vm10063_vm1, %v12201_v20 }
 0x685   :  { %9653 = vrcp.f32 %v1911_v30  ;;  %8980 = vmatprep.subr.bf16.mxu0 %v12201_v20 }
 0x688   :  { %v2412_v58 = vpop.permute.xlu1 %2411 }
 0x68c   :  { %v2514_v0 = vpop.permute.xlu1 %2513 }
 0x68d   :  { %v2519_v12 = vsel %vm598_vm2, %v2514_v0, 0 }
 0x68f   :  { %v9654_v45 = vpop.eup %9653 }
 0x690   :  { %v1927_v31 = vmul.f32 %v9654_v45, %v10709_v28  ;;  %v2512_v32 = vpop.permute.xlu1 %2511 }
 0x692   :  { %v1935_v1 = vpack.c.bf16 %v1927_v31, %v1927_v31 }
 0x694   :  { %8917 = vmatmul.mubr.msk.bf16.vlgmr.msra.gmra.mrb[80].mxu1 %vm598_vm2, %v1935_v1  ;;  %v2614_v43 = vpop.permute.xlu1 %2613 }
 0x695   :  { %8927 = vmatpush3.bf16.xpose.msra.mxu1 %v2419_v9  ;;  %8928 = vmatprep.mubr.msk.bf16.mxu1 %vm10063_vm1, %v12201_v20  ;;  %v2619_v52 = vsel %vm598_vm2, %v2614_v43, 0 }
 0x696   :  { %8938 = vmatprep.subr.bf16.mxu1 %v12201_v20 }
 0x698   :  { %v2612_v28 = vpop.permute.xlu1 %2611 }
 0x69c   :  { %8929 = vmatmul.mubr.msk.bf16.vlgmr.msra.gmra.mrb[84].mxu1 %vm598_vm2, %v2412_v58  ;;  %v2714_v17 = vpop.permute.xlu1 %2713 }
 0x69d   :  { %8939 = vmatpush3.bf16.xpose.msra.mxu1 %v2519_v12  ;;  %8940 = vmatprep.mubr.msk.bf16.mxu1 %vm10063_vm1, %v12201_v20  ;;  %v2719_v57 = vsel %vm598_vm2, %v2714_v17, 0 }
 0x69e   :  { %8950 = vmatprep.subr.bf16.mxu1 %v12201_v20 }
 0x6a0   :  { %v2712_v8 = vpop.permute.xlu1 %2711 }
 0x6a4   :  { %8941 = vmatmul.mubr.msk.bf16.vlgmr.msra.gmra.mrb[88].mxu1 %vm598_vm2, %v2512_v32  ;;  %v2906_v63 = vpop.permute.xlu1 %2905 }
 0x6a5   :  { %8951 = vmatpush3.bf16.xpose.msra.mxu1 %v2619_v52  ;;  %8952 = vmatprep.mubr.msk.bf16.mxu1 %vm10063_vm1, %v12201_v20  ;;  %v2911_v27 = vsel %vm1066_vm3, %v2906_v63, 0 }
 0x6a6   :  { %8962 = vmatprep.subr.bf16.mxu1 %v12201_v20 }
 0x6ac   :  { %8953 = vmatmul.mubr.msk.bf16.vlgmr.msra.gmra.mrb[92].mxu1 %vm598_vm2, %v2612_v28 }
 0x6ad   :  { %8963 = vmatpush3.bf16.xpose.msra.mxu1 %v2719_v57  ;;  %v10808_v13 = vpop.f32.mrb[52].mxu0  ;;  %8964 = vmatprep.mubr.msk.bf16.mxu1 %vm10063_vm1, %v12201_v20 }
 0x6ae   :  { %v8876_v3 = vpop.f32.mrb[53].mxu0  ;;  %8974 = vmatprep.subr.bf16.mxu1 %v12201_v20 }
 0x6af   :  { %v1981_v16 = vpop.f32.mrb[54].mxu0 }
 0x6b0   :  { %v8877_v23 = vpop.f32.mrb[55].mxu0 }
 0x6b4   :  { %8965 = vmatmul.mubr.msk.bf16.vlgmr.msra.gmra.mrb[96].mxu1 %vm598_vm2, %v2712_v8 }
 0x6b5   :  { %8975 = vmatpush3.bf16.msra.mxu1 %v2911_v27  ;;  %v10815_v24 = vpop.f32.mrb[56].mxu0  ;;  %8976 = vmatprep.mubr.msk.bf16.mxu1 %vm10063_vm1, %v12201_v20 }
 0x6b6   :  { %v8888_v18 = vpop.f32.mrb[57].mxu0  ;;  %8986 = vmatprep.subr.bf16.mxu1 %v12201_v20 }
 0x6b7   :  { %v2077_v25 = vpop.f32.mrb[58].mxu0 }
 0x6b8   :  { %v8889_v26 = vpop.f32.mrb[59].mxu0 }
 0x6f5   :  { %v10820_v22 = vpop.f32.mrb[68].mxu1 }
 0x6f6   :  { %v8882_v37 = vpop.f32.mrb[69].mxu1 }
 0x6f7   :  { %v2029_v44 = vpop.f32.mrb[70].mxu1 }
 0x6f8   :  { %v8883_v42 = vpop.f32.mrb[71].mxu1 }
 0x6fd   :  { %v10822_v29 = vpop.f32.mrb[72].mxu1 }
 0x6fe   :  { %v8894_v19 = vpop.f32.mrb[73].mxu1 }
 0x6ff   :  { %v2125_v7 = vpop.f32.mrb[74].mxu1 }
 0x700   :  { %v8895_v41 = vpop.f32.mrb[75].mxu1 }
 0x701   :  { %v10824_v40 = vpop.f32.mrb[60].mxu0 }
 0x702   :  { %v8900_v36 = vpop.f32.mrb[61].mxu0 }
 0x703   :  { %v2173_v50 = vpop.f32.mrb[62].mxu0 }
 0x704   :  { %v8901_v55 = vpop.f32.mrb[63].mxu0 }
 0x732   :  { %v10826_v21 = vpop.f32.mrb[76].mxu1 }
 0x733   :  { %12203 = vst [vmem:[#allocation21_spill] sm:$0xff] %v10826_v21  ;;  %v8906_v56 = vpop.f32.mrb[77].mxu1 }
 0x734   :  { %v2221_v30 = vpop.f32.mrb[78].mxu1 }
 0x735   :  { %v8907_v58 = vpop.f32.mrb[79].mxu1 }
 0x736   :  { %v10828_v0 = vpop.f32.mrb[64].mxu0 }
 0x737   :  { %v8912_v45 = vpop.f32.mrb[65].mxu0 }
 0x738   :  { %v2269_v31 = vpop.f32.mrb[66].mxu0 }
 0x739   :  { %v8913_v1 = vpop.f32.mrb[67].mxu0 }
 0x73e   :  { %v2405_v32 = vpop.f32.mrb[68].mxu0 }
 0x73f   :  { %v8924_v9 = vpop.f32.mrb[69].mxu0  ;;  %v2761_v43 = vsel %vm598_vm2, %v2405_v32, -inf }
 0x740   :  { %2762 = vmax.xlane.f32.xlu0 %v2761_v43  ;;  %v2408_v12 = vpop.f32.mrb[70].mxu0 }
 0x741   :  { %v8925_v28 = vpop.f32.mrb[71].mxu0 }
 0x746   :  { %v2505_v52 = vpop.f32.mrb[72].mxu0 }
 0x747   :  { %v8936_v17 = vpop.f32.mrb[73].mxu0  ;;  %v2767_v8 = vsel %vm598_vm2, %v2505_v52, -inf }
 0x748   :  { %2768 = vmax.xlane.f32.xlu0 %v2767_v8  ;;  %v2508_v57 = vpop.f32.mrb[74].mxu0 }
 0x749   :  { %v8937_v3 = vpop.f32.mrb[75].mxu0 }
 0x74e   :  { %v10832_v16 = vpop.f32.mrb[76].mxu0 }
 0x74f   :  { %v8948_v23 = vpop.f32.mrb[77].mxu0  ;;  %v2773_v9 = vsel %vm598_vm2, %v10832_v16, -inf }
 0x750   :  { %v2608_v63 = vpop.f32.mrb[78].mxu0 }
 0x751   :  { %v8949_v27 = vpop.f32.mrb[79].mxu0 }
 0x756   :  { %v10834_v18 = vpop.f32.mrb[80].mxu0 }
 0x757   :  { %v8960_v25 = vpop.f32.mrb[81].mxu0  ;;  %v2779_v28 = vsel %vm598_vm2, %v10834_v18, -inf }
 0x758   :  { %v2708_v26 = vpop.f32.mrb[82].mxu0 }
 0x759   :  { %v8961_v37 = vpop.f32.mrb[83].mxu0 }
 0x767   :  { %v10836_v44 = vpop.f32.mrb[80].mxu1 }
 0x768   :  { %12204 = vst [vmem:[#allocation22_spill] sm:$0xff] %v10836_v44  ;;  %v8918_v42 = vpop.f32.mrb[81].mxu1 }
 0x769   :  { %v2317_v19 = vpop.f32.mrb[82].mxu1 }
 0x76a   :  { %v8919_v7 = vpop.f32.mrb[83].mxu1 }
 0x76f   :  { %v2455_v41 = vpop.f32.mrb[84].mxu1 }
 0x770   :  { %v8930_v36 = vpop.f32.mrb[85].mxu1  ;;  %v2764_v50 = vsel %vm598_vm2, %v2455_v41, -inf }
 0x771   :  { %2765 = vmax.xlane.f32.xlu1 %v2764_v50  ;;  %v2458_v55 = vpop.f32.mrb[86].mxu1 }
 0x772   :  { %v8931_v56 = vpop.f32.mrb[87].mxu1 }
 0x777   :  { %v2555_v30 = vpop.f32.mrb[88].mxu1 }
 0x778   :  { %v8942_v58 = vpop.f32.mrb[89].mxu1  ;;  %v2770_v45 = vsel %vm598_vm2, %v2555_v30, -inf }
 0x779   :  { %2771 = vmax.xlane.f32.xlu0 %v2770_v45  ;;  %v2558_v31 = vpop.f32.mrb[90].mxu1  ;;  %v2954_v45 = vpop.permute.xlu1 %2953 }
 0x77a   :  { %v8943_v1 = vpop.f32.mrb[91].mxu1 }
 0x77d   :  { %2774 = vmax.xlane.f32.xlu0 %v2773_v9 }
 0x77f   :  { %v2655_v43 = vpop.f32.mrb[92].mxu1 }
 0x780   :  { %v8954_v12 = vpop.f32.mrb[93].mxu1  ;;  %v2776_v17 = vsel %vm598_vm2, %v2655_v43, -inf }
 0x781   :  { %2780 = vmax.xlane.f32.xlu0 %v2779_v28  ;;  %2777 = vmax.xlane.f32.xlu1 %v2776_v17  ;;  %v2658_v8 = vpop.f32.mrb[94].mxu1 }
 0x782   :  { %v8955_v57 = vpop.f32.mrb[95].mxu1 }
 0x787   :  { %v10845_v3 = vpop.f32.mrb[96].mxu1 }
 0x788   :  { %v8966_v23 = vpop.f32.mrb[97].mxu1  ;;  %v2782_v25 = vsel %vm598_vm2, %v10845_v3, -inf }
 0x789   :  { %v2758_v63 = vpop.f32.mrb[98].mxu1 }
 0x78a   :  { %v8967_v27 = vpop.f32.mrb[99].mxu1 }
 0x792   :  { %3097 = vrot.lane.b32.xlu1 %v10543_v15, %s10065_s5 }
 0x797   :  { %3049 = vrot.lane.b32.xlu0 %v10517_v39, %s10065_s5 }
 0x7b6   :  { %2783 = vmax.xlane.f32.xlu1 %v2782_v25 }
 0x7cd   :  { %v2763_v26 = vpop.xlane.xlu0 %2762 }
 0x7ce   :  { %v2785_v37 = vsub.f32 %v2405_v32, %v2763_v26  ;;  %v10861_v32 = vpop.permute.xlu1 %3001 }
 0x7d0   :  { %v2793_v42 = vmul.f32 1.442695, %v2785_v37 }
 0x7d2   :  { %9655 = vpow2.f32 %v2793_v42 }
 0x7d5   :  { %v2769_v19 = vpop.xlane.xlu0 %2768 }
 0x7d6   :  { %v2787_v7 = vsub.f32 %v2505_v52, %v2769_v19 }
 0x7d8   :  { %v2797_v36 = vmul.f32 1.442695, %v2787_v7 }
 0x7da   :  { %9657 = vpow2.f32 %v2797_v36 }
 0x7dc   :  { %v10853_v50 = vpop.eup %9655 }
 0x7dd   :  { %v2809_v55 = vsel %vm598_vm2, %v10853_v50, 0.0 }
 0x7de   :  { %2810 = vadd.xlane.f32.xlu0 %v2809_v55 }
 0x7e4   :  { %v10857_v56 = vpop.eup %9657 }
 0x7e5   :  { %v2815_v58 = vsel %vm598_vm2, %v10857_v56, 0.0 }
 0x7e6   :  { %2816 = vadd.xlane.f32.xlu0 %v2815_v58 }
 0x7fe   :  { %v2766_v31 = vpop.xlane.xlu1 %2765 }
 0x7ff   :  { %v2786_v1 = vsub.f32 %v2455_v41, %v2766_v31 }
 0x801   :  { %v2795_v52 = vmul.f32 1.442695, %v2786_v1 }
 0x803   :  { %9659 = vpow2.f32 %v2795_v52 }
 0x806   :  { %v2772_v9 = vpop.xlane.xlu0 %2771 }
 0x807   :  { %v2788_v12 = vsub.f32 %v2555_v30, %v2772_v9 }
 0x809   :  { %v2799_v28 = vmul.f32 1.442695, %v2788_v12 }
 0x80a   :  { %v2775_v17 = vpop.xlane.xlu0 %2774 }
 0x80b   :  { %9661 = vpow2.f32 %v2799_v28  ;;  %v2789_v8 = vsub.f32 %v10832_v16, %v2775_v17 }
 0x80d   :  { %v10864_v57 = vpop.eup %9659  ;;  %v2801_v23 = vmul.f32 1.442695, %v2789_v8 }
 0x80e   :  { %v2812_v63 = vsel %vm598_vm2, %v10864_v57, 0.0  ;;  %v2778_v16 = vpop.xlane.xlu1 %2777  ;;  %v2781_v37 = vpop.xlane.xlu0 %2780 }
 0x80f   :  { %9663 = vpow2.f32 %v2801_v23  ;;  %2813 = vadd.xlane.f32.xlu1 %v2812_v63  ;;  %v2790_v26 = vsub.f32 %v2655_v43, %v2778_v16  ;;  %v2791_v42 = vsub.f32 %v10834_v18, %v2781_v37 }
 0x811   :  { %v2803_v19 = vmul.f32 1.442695, %v2790_v26  ;;  %v2805_v7 = vmul.f32 1.442695, %v2791_v42 }
 0x812   :  { %v10891_v18 = vpop.permute.xlu1 %3097  ;;  %v3050_v43 = vpop.permute.xlu0 %3049 }
 0x813   :  { %9665 = vpow2.f32 %v2803_v19  ;;  %v3055_v16 = vsel %vm1066_vm3, %v3050_v43, 0 }
 0x814   :  { %9667 = vpow2.f32 %v2805_v7 }
 0x815   :  { %v10868_v27 = vpop.eup %9661 }
 0x816   :  { %v2818_v41 = vsel %vm598_vm2, %v10868_v27, 0.0 }
 0x817   :  { %2819 = vadd.xlane.f32.xlu1 %v2818_v41 }
 0x819   :  { %v10872_v30 = vpop.eup %9663 }
 0x81a   :  { %v2821_v25 = vsel %vm598_vm2, %v10872_v30, 0.0 }
 0x81b   :  { %2822 = vadd.xlane.f32.xlu0 %v2821_v25 }
 0x81d   :  { %v10881_v36 = vpop.eup %9665 }
 0x81e   :  { %v2824_v55 = vsel %vm598_vm2, %v10881_v36, 0.0  ;;  %v10885_v58 = vpop.eup %9667 }
 0x81f   :  { %v2827_v31 = vsel %vm598_vm2, %v10885_v58, 0.0 }
 0x828   :  { %3193 = vrot.lane.b32.xlu1 %v10575_v47, %s10065_s5 }
 0x831   :  { %3145 = vrot.lane.b32.xlu0 %v10538_v54, %s10065_s5 }
 0x843   :  { %v2784_v1 = vpop.xlane.xlu1 %2783 }
 0x844   :  { %v2792_v52 = vsub.f32 %v10845_v3, %v2784_v1  ;;  %v2959_v3 = vsel %vm1066_vm3, %v2954_v45, 0 }
 0x846   :  { %v2807_v12 = vmul.f32 1.442695, %v2792_v52 }
 0x84c   :  { %2825 = vadd.xlane.f32.xlu1 %v2824_v55  ;;  %v3007_v55 = vsel %vm1066_vm3, %v10861_v32, 0  ;;  %v3103_v32 = vsel %vm1066_vm3, %v10891_v18, 0 }
 0x850   :  { %2828 = vadd.xlane.f32.xlu0 %v2827_v31 }
 0x85d   :  { %3334 = vrot.lane.b32.xlu1 %v10310_v46, %s10066_s18 }
 0x866   :  { %3284 = vrot.lane.b32.xlu0 %v10299_v38, %s10066_s18 }
 0x86a   :  { %3282 = vrot.lane.b32.xlu0 %v10315_v51, %s10066_s18 }
 0x86b   :  { %v2811_v9 = vpop.xlane.xlu0 %2810 }
 0x86c   :  { %9669 = vrcp.f32 %v2811_v9 }
 0x86d   :  { %9671 = vpow2.f32 %v2807_v12 }
 0x86e   :  { %3384 = vrot.lane.b32.xlu0 %v10292_v35, %s10066_s18 }
 0x872   :  { %3382 = vrot.lane.b32.xlu0 %v10313_v49, %s10066_s18 }
 0x873   :  { %v2817_v28 = vpop.xlane.xlu0 %2816 }
 0x874   :  { %9673 = vrcp.f32 %v2817_v28 }
 0x876   :  { %v9670_v17 = vpop.eup %9669  ;;  %3484 = vrot.lane.b32.xlu0 %v10318_v53, %s10066_s18 }
 0x877   :  { %v2841_v8 = vmul.f32 %v9670_v17, %v10853_v50  ;;  %v10911_v63 = vpop.eup %9671 }
 0x878   :  { %v2830_v25 = vsel %vm598_vm2, %v10911_v63, 0.0 }
 0x879   :  { %v2849_v23 = vpack.c.bf16 %v2841_v8, %v2841_v8 }
 0x87a   :  { %3482 = vrot.lane.b32.xlu0 %v10343_v62, %s10066_s18 }
 0x87b   :  { %8971 = vmatmul.mubr.msk.bf16.vlgmr.msra.gmra.mrb[84].mxu0 %vm598_vm2, %v2849_v23 }
 0x87c   :  { %8981 = vmatpush3.bf16.msra.mxu0 %v2959_v3  ;;  %8982 = vmatprep.mubr.msk.bf16.mxu0 %vm10063_vm1, %v12201_v20 }
 0x87d   :  { %8992 = vmatprep.subr.bf16.mxu0 %v12201_v20 }
 0x87e   :  { %v9674_v41 = vpop.eup %9673  ;;  %3584 = vrot.lane.b32.xlu0 %v10333_v59, %s10066_s18 }
 0x87f   :  { %v2843_v50 = vmul.f32 %v9674_v41, %v10857_v56 }
 0x881   :  { %2831 = vadd.xlane.f32.xlu1 %v2830_v25  ;;  %v2851_v45 = vpack.c.bf16 %v2843_v50, %v2843_v50 }
 0x882   :  { %3582 = vrot.lane.b32.xlu0 %v10366_v6, %s10066_s18 }
 0x883   :  { %8983 = vmatmul.mubr.msk.bf16.vlgmr.msra.gmra.mrb[88].mxu0 %vm598_vm2, %v2851_v45 }
 0x884   :  { %8993 = vmatpush3.bf16.msra.mxu0 %v3055_v16  ;;  %8994 = vmatprep.mubr.msk.bf16.mxu0 %vm10063_vm1, %v12201_v20 }
 0x885   :  { %9004 = vmatprep.subr.bf16.mxu0 %v12201_v20 }
 0x886   :  { %3778 = vrot.lane.b32.xlu0 %v10413_v33, %s10066_s18 }
 0x892   :  { %3332 = vrot.lane.b32.xlu1 %v10341_v61, %s10066_s18 }
 0x896   :  { %3434 = vrot.lane.b32.xlu1 %v10339_v60, %s10066_s18 }
 0x89a   :  { %3432 = vrot.lane.b32.xlu1 %v10364_v5, %s10066_s18 }
 0x89c   :  { %v2814_v56 = vpop.xlane.xlu1 %2813 }
 0x89d   :  { %9675 = vrcp.f32 %v2814_v56 }
 0x89e   :  { %3534 = vrot.lane.b32.xlu1 %v10356_v4, %s10066_s18 }
 0x8a2   :  { %3532 = vrot.lane.b32.xlu1 %v10384_v11, %s10066_s18 }
 0x8a4   :  { %v2820_v26 = vpop.xlane.xlu1 %2819 }
 0x8a5   :  { %9677 = vrcp.f32 %v2820_v26 }
 0x8a6   :  { %3634 = vrot.lane.b32.xlu1 %v10379_v10, %s10066_s18 }
 0x8a7   :  { %v9676_v37 = vpop.eup %9675 }
 0x8a8   :  { %v2823_v42 = vpop.xlane.xlu0 %2822  ;;  %v2842_v19 = vmul.f32 %v9676_v37, %v10864_v57 }
 0x8a9   :  { %9679 = vrcp.f32 %v2823_v42 }
 0x8aa   :  { %3632 = vrot.lane.b32.xlu1 %v10395_v14, %s10066_s18  ;;  %v2850_v7 = vpack.c.bf16 %v2842_v19, %v2842_v19 }
 0x8ac   :  { %8977 = vmatmul.mubr.msk.bf16.vlgmr.msra.gmra.mrb[100].mxu1 %vm598_vm2, %v2850_v7  ;;  %v3146_v9 = vpop.permute.xlu0 %3145 }
 0x8ad   :  { %8987 = vmatpush3.bf16.msra.mxu1 %v3007_v55  ;;  %8988 = vmatprep.mubr.msk.bf16.mxu1 %vm10063_vm1, %v12201_v20  ;;  %v3151_v12 = vsel %vm1066_vm3, %v3146_v9, 0 }
 0x8ae   :  { %3826 = vrot.lane.b32.xlu1 %v10415_v34, %s10066_s18  ;;  %8998 = vmatprep.subr.bf16.mxu1 %v12201_v20 }
 0x8af   :  { %v9678_v57 = vpop.eup %9677 }
 0x8b0   :  { %v2844_v31 = vmul.f32 %v9678_v57, %v10868_v27 }
 0x8b2   :  { %3874 = vrot.lane.b32.xlu1 %v10497_v48, %s10066_s18  ;;  %v2852_v43 = vpack.c.bf16 %v2844_v31, %v2844_v31 }
 0x8b3   :  { %v9680_v1 = vpop.eup %9679 }
 0x8b4   :  { %8989 = vmatmul.mubr.msk.bf16.vlgmr.msra.gmra.mrb[104].mxu1 %vm598_vm2, %v2852_v43  ;;  %v2845_v52 = vmul.f32 %v9680_v1, %v10872_v30  ;;  %v3194_v30 = vpop.permute.xlu1 %3193 }
 0x8b5   :  { %8999 = vmatpush3.bf16.msra.mxu1 %v3103_v32  ;;  %9000 = vmatprep.mubr.msk.bf16.mxu1 %vm10063_vm1, %v12201_v20  ;;  %v3199_v25 = vsel %vm1066_vm3, %v3194_v30, 0 }
 0x8b6   :  { %3922 = vrot.lane.b32.xlu1 %v10513_v2, %s10066_s18  ;;  %v2853_v27 = vpack.c.bf16 %v2845_v52, %v2845_v52  ;;  %9010 = vmatprep.subr.bf16.mxu1 %v12201_v20 }
 0x8b8   :  { %8995 = vmatmul.mubr.msk.bf16.vlgmr.msra.gmra.mrb[92].mxu0 %vm598_vm2, %v2853_v27 }
 0x8b9   :  { %9005 = vmatpush3.bf16.msra.mxu0 %v3151_v12  ;;  %9006 = vmatprep.mubr.msk.bf16.mxu0 %vm10063_vm1, %v12201_v20 }
 0x8ba   :  { %9016 = vmatprep.subr.bf16.mxu0 %v12201_v20 }
 0x8d9   :  { %v2826_v18 = vpop.xlane.xlu1 %2825 }
 0x8da   :  { %9681 = vrcp.f32 %v2826_v18 }
 0x8dd   :  { %v2829_v28 = vpop.xlane.xlu0 %2828  ;;  %v3335_v31 = vpop.permute.xlu1 %3334 }
 0x8de   :  { %9683 = vrcp.f32 %v2829_v28  ;;  %v3340_v28 = vsel %vm598_vm2, %v3335_v31, 0 }
 0x8e1   :  { %v3285_v17 = vpop.permute.xlu0 %3284 }
 0x8e2   :  { %v3290_v26 = vsel %vm598_vm2, %v3285_v17, 0 }
 0x8e4   :  { %v9682_v8 = vpop.eup %9681 }
 0x8e5   :  { %v3283_v23 = vpop.permute.xlu0 %3282  ;;  %v2846_v3 = vmul.f32 %v9682_v8, %v10881_v36 }
 0x8e7   :  { %v2854_v41 = vpack.c.bf16 %v2846_v3, %v2846_v3 }
 0x8e8   :  { %v9684_v50 = vpop.eup %9683 }
 0x8e9   :  { %v3385_v45 = vpop.permute.xlu0 %3384  ;;  %9001 = vmatmul.mubr.msk.bf16.vlgmr.msra.gmra.mrb[108].mxu1 %vm598_vm2, %v2854_v41  ;;  %v2847_v16 = vmul.f32 %v9684_v50, %v10885_v58 }
 0x8ea   :  { %9011 = vmatpush3.bf16.msra.mxu1 %v3199_v25  ;;  %9012 = vmatprep.mubr.msk.bf16.mxu1 %vm10063_vm1, %v12201_v20  ;;  %v3390_v58 = vsel %vm598_vm2, %v3385_v45, 0 }
 0x8eb   :  { %v2855_v56 = vpack.c.bf16 %v2847_v16, %v2847_v16  ;;  %9022 = vmatprep.subr.bf16.mxu1 %v12201_v20 }
 0x8ed   :  { %9007 = vmatmul.mubr.msk.bf16.vlgmr.msra.gmra.mrb[96].mxu0 %vm598_vm2, %v2855_v56  ;;  %v3383_v36 = vpop.permute.xlu0 %3382 }
 0x8ee   :  { %9017 = vmatpush3.bf16.xpose.msra.mxu0 %v3290_v26  ;;  %9018 = vmatprep.mubr.msk.bf16.mxu0 %vm10063_vm1, %v12201_v20 }
 0x8ef   :  { %9028 = vmatprep.subr.bf16.mxu0 %v12201_v20 }
 0x8f1   :  { %v3485_v37 = vpop.permute.xlu0 %3484 }
 0x8f2   :  { %v3490_v19 = vsel %vm598_vm2, %v3485_v37, 0 }
 0x8f5   :  { %9019 = vmatmul.mubr.msk.bf16.vlgmr.msra.gmra.mrb[100].mxu0 %vm598_vm2, %v3283_v23  ;;  %v3483_v42 = vpop.permute.xlu0 %3482 }
 0x8f6   :  { %9029 = vmatpush3.bf16.xpose.msra.mxu0 %v3390_v58  ;;  %9030 = vmatprep.mubr.msk.bf16.mxu0 %vm10063_vm1, %v12201_v20 }
 0x8f7   :  { %9040 = vmatprep.subr.bf16.mxu0 %v12201_v20 }
 0x8f9   :  { %v3585_v7 = vpop.permute.xlu0 %3584 }
 0x8fa   :  { %v3590_v57 = vsel %vm598_vm2, %v3585_v7, 0 }
 0x8fd   :  { %9031 = vmatmul.mubr.msk.bf16.vlgmr.msra.gmra.mrb[104].mxu0 %vm598_vm2, %v3383_v36  ;;  %v3583_v55 = vpop.permute.xlu0 %3582 }
 0x8fe   :  { %9041 = vmatpush3.bf16.xpose.msra.mxu0 %v3490_v19  ;;  %9042 = vmatprep.mubr.msk.bf16.mxu0 %vm10063_vm1, %v12201_v20 }
 0x8ff   :  { %9052 = vmatprep.subr.bf16.mxu0 %v12201_v20 }
 0x901   :  { %v3779_v43 = vpop.permute.xlu0 %3778 }
 0x902   :  { %v3784_v1 = vsel %vm1066_vm3, %v3779_v43, 0 }
 0x905   :  { %9043 = vmatmul.mubr.msk.bf16.vlgmr.msra.gmra.mrb[108].mxu0 %vm598_vm2, %v3483_v42 }
 0x906   :  { %9053 = vmatpush3.bf16.xpose.msra.mxu0 %v3590_v57  ;;  %9054 = vmatprep.mubr.msk.bf16.mxu0 %vm10063_vm1, %v12201_v20 }
 0x907   :  { %9064 = vmatprep.subr.bf16.mxu0 %v12201_v20 }
 0x90d   :  { %9055 = vmatmul.mubr.msk.bf16.vlgmr.msra.gmra.mrb[112].mxu0 %vm598_vm2, %v3583_v55 }
 0x90e   :  { %9065 = vmatpush3.bf16.msra.mxu0 %v3784_v1  ;;  %v2832_v32 = vpop.xlane.xlu1 %2831  ;;  %9066 = vmatprep.mubr.msk.bf16.mxu0 %vm10063_vm1, %v12201_v20 }
 0x90f   :  { %9685 = vrcp.f32 %v2832_v32  ;;  %9076 = vmatprep.subr.bf16.mxu0 %v12201_v20 }
 0x912   :  { %v3333_v52 = vpop.permute.xlu1 %3332 }
 0x916   :  { %v3435_v9 = vpop.permute.xlu1 %3434 }
 0x917   :  { %v3440_v8 = vsel %vm598_vm2, %v3435_v9, 0 }
 0x919   :  { %v9686_v27 = vpop.eup %9685 }
 0x91a   :  { %v2848_v12 = vmul.f32 %v9686_v27, %v10911_v63  ;;  %v3433_v18 = vpop.permute.xlu1 %3432 }
 0x91c   :  { %v2856_v30 = vpack.c.bf16 %v2848_v12, %v2848_v12 }
 0x91e   :  { %9013 = vmatmul.mubr.msk.bf16.vlgmr.msra.gmra.mrb[112].mxu1 %vm598_vm2, %v2856_v30  ;;  %v3535_v17 = vpop.permute.xlu1 %3534 }
 0x91f   :  { %9023 = vmatpush3.bf16.xpose.msra.mxu1 %v3340_v28  ;;  %9024 = vmatprep.mubr.msk.bf16.mxu1 %vm10063_vm1, %v12201_v20  ;;  %v3540_v23 = vsel %vm598_vm2, %v3535_v17, 0 }
 0x920   :  { %9034 = vmatprep.subr.bf16.mxu1 %v12201_v20 }
 0x922   :  { %v3533_v63 = vpop.permute.xlu1 %3532 }
 0x926   :  { %9025 = vmatmul.mubr.msk.bf16.vlgmr.msra.gmra.mrb[116].mxu1 %vm598_vm2, %v3333_v52  ;;  %v3635_v3 = vpop.permute.xlu1 %3634 }
 0x927   :  { %9035 = vmatpush3.bf16.xpose.msra.mxu1 %v3440_v8  ;;  %9036 = vmatprep.mubr.msk.bf16.mxu1 %vm10063_vm1, %v12201_v20  ;;  %v3640_v50 = vsel %vm598_vm2, %v3635_v3, 0 }
 0x928   :  { %9046 = vmatprep.subr.bf16.mxu1 %v12201_v20 }
 0x92a   :  { %v3633_v41 = vpop.permute.xlu1 %3632 }
 0x92e   :  { %9037 = vmatmul.mubr.msk.bf16.vlgmr.msra.gmra.mrb[120].mxu1 %vm598_vm2, %v3433_v18  ;;  %v3827_v25 = vpop.permute.xlu1 %3826 }
 0x92f   :  { %9047 = vmatpush3.bf16.xpose.msra.mxu1 %v3540_v23  ;;  %9048 = vmatprep.mubr.msk.bf16.mxu1 %vm10063_vm1, %v12201_v20  ;;  %v3832_v45 = vsel %vm1066_vm3, %v3827_v25, 0 }
 0x930   :  { %9058 = vmatprep.subr.bf16.mxu1 %v12201_v20 }
 0x936   :  { %9049 = vmatmul.mubr.msk.bf16.vlgmr.msra.gmra.mrb[124].mxu1 %vm598_vm2, %v3533_v63 }
 0x937   :  { %9059 = vmatpush3.bf16.xpose.msra.mxu1 %v3640_v50  ;;  %9060 = vmatprep.mubr.msk.bf16.mxu1 %vm10063_vm1, %v12201_v20 }
 0x938   :  { %9070 = vmatprep.subr.bf16.mxu1 %v12201_v20 }
 0x93e   :  { %9061 = vmatmul.mubr.msk.bf16.vlgmr.msra.gmra.mrb[128].mxu1 %vm598_vm2, %v3633_v41 }
 0x93f   :  { %9071 = vmatpush3.bf16.msra.mxu1 %v3832_v45  ;;  %9072 = vmatprep.mubr.msk.bf16.mxu1 %vm10063_vm1, %v12201_v20 }
 0x940   :  { %9082 = vmatprep.subr.bf16.mxu1 %v12201_v20 }
 0x94e   :  { %v11026_v16 = vpop.f32.mrb[84].mxu0 }
 0x94f   :  { %v8972_v56 = vpop.f32.mrb[85].mxu0 }
 0x950   :  { %v2902_v26 = vpop.f32.mrb[86].mxu0 }
 0x951   :  { %v8973_v36 = vpop.f32.mrb[87].mxu0 }
 0x956   :  { %v11028_v37 = vpop.f32.mrb[88].mxu0 }
 0x957   :  { %v8984_v58 = vpop.f32.mrb[89].mxu0 }
 0x958   :  { %v2998_v42 = vpop.f32.mrb[90].mxu0 }
 0x959   :  { %v8985_v19 = vpop.f32.mrb[91].mxu0 }
 0x97f   :  { %v11030_v7 = vpop.f32.mrb[100].mxu1 }
 0x980   :  { %v8978_v55 = vpop.f32.mrb[101].mxu1 }
 0x981   :  { %v2950_v57 = vpop.f32.mrb[102].mxu1 }
 0x982   :  { %v8979_v31 = vpop.f32.mrb[103].mxu1 }
 0x987   :  { %v11032_v43 = vpop.f32.mrb[104].mxu1 }
 0x988   :  { %12205 = vst [vmem:[#allocation23_spill] sm:$0xff] %v11032_v43  ;;  %v8990_v1 = vpop.f32.mrb[105].mxu1 }
 0x989   :  { %v3046_v32 = vpop.f32.mrb[106].mxu1 }
 0x98a   :  { %v8991_v52 = vpop.f32.mrb[107].mxu1 }
 0x98b   :  { %v11034_v9 = vpop.f32.mrb[92].mxu0 }
 0x98c   :  { %v8996_v27 = vpop.f32.mrb[93].mxu0 }
 0x98d   :  { %v3094_v12 = vpop.f32.mrb[94].mxu0 }
 0x98e   :  { %v8997_v30 = vpop.f32.mrb[95].mxu0 }
 0x9bc   :  { %v11036_v18 = vpop.f32.mrb[108].mxu1 }
 0x9bd   :  { %12206 = vst [vmem:[#allocation24_spill] sm:$0xff] %v11036_v18  ;;  %v9002_v28 = vpop.f32.mrb[109].mxu1 }
 0x9be   :  { %v3142_v17 = vpop.f32.mrb[110].mxu1 }
 0x9bf   :  { %v9003_v8 = vpop.f32.mrb[111].mxu1 }
 0x9c0   :  { %v11038_v63 = vpop.f32.mrb[96].mxu0 }
 0x9c1   :  { %v9008_v23 = vpop.f32.mrb[97].mxu0 }
 0x9c2   :  { %v3190_v3 = vpop.f32.mrb[98].mxu0 }
 0x9c3   :  { %v9009_v41 = vpop.f32.mrb[99].mxu0 }
 0x9c8   :  { %v3326_v50 = vpop.f32.mrb[100].mxu0 }
 0x9c9   :  { %v9020_v25 = vpop.f32.mrb[101].mxu0  ;;  %v3682_v45 = vsel %vm598_vm2, %v3326_v50, -inf }
 0x9ca   :  { %3683 = vmax.xlane.f32.xlu0 %v3682_v45  ;;  %v3329_v56 = vpop.f32.mrb[102].mxu0 }
 0x9cb   :  { %v9021_v26 = vpop.f32.mrb[103].mxu0 }
 0x9d0   :  { %v3426_v36 = vpop.f32.mrb[104].mxu0 }
 0x9d1   :  { %v9032_v58 = vpop.f32.mrb[105].mxu0  ;;  %v3688_v42 = vsel %vm598_vm2, %v3426_v36, -inf }
 0x9d2   :  { %3689 = vmax.xlane.f32.xlu0 %v3688_v42  ;;  %v3429_v19 = vpop.f32.mrb[106].mxu0 }
 0x9d3   :  { %v9033_v55 = vpop.f32.mrb[107].mxu0 }
 0x9d8   :  { %v11042_v57 = vpop.f32.mrb[108].mxu0 }
 0x9d9   :  { %v9044_v31 = vpop.f32.mrb[109].mxu0 }
 0x9da   :  { %v3529_v1 = vpop.f32.mrb[110].mxu0  ;;  %v3694_v31 = vsel %vm598_vm2, %v11042_v57, -inf }
 0x9db   :  { %v9045_v32 = vpop.f32.mrb[111].mxu0 }
 0x9e0   :  { %v11044_v52 = vpop.f32.mrb[112].mxu0 }
 0x9e1   :  { %v9056_v27 = vpop.f32.mrb[113].mxu0 }
 0x9e2   :  { %v3629_v12 = vpop.f32.mrb[114].mxu0  ;;  %v3700_v27 = vsel %vm598_vm2, %v11044_v52, -inf }
 0x9e3   :  { %v9057_v30 = vpop.f32.mrb[115].mxu0 }
 0x9f1   :  { %v11046_v28 = vpop.f32.mrb[112].mxu1 }
 0x9f2   :  { %12207 = vst [vmem:[#allocation25_spill] sm:$0xff] %v11046_v28  ;;  %v9014_v17 = vpop.f32.mrb[113].mxu1 }
 0x9f3   :  { %v3238_v8 = vpop.f32.mrb[114].mxu1 }
 0x9f4   :  { %v9015_v23 = vpop.f32.mrb[115].mxu1 }
 0x9f9   :  { %v3376_v3 = vpop.f32.mrb[116].mxu1 }
 0x9fa   :  { %v9026_v41 = vpop.f32.mrb[117].mxu1  ;;  %v3685_v25 = vsel %vm598_vm2, %v3376_v3, -inf }
 0x9fb   :  { %3686 = vmax.xlane.f32.xlu1 %v3685_v25  ;;  %v3379_v45 = vpop.f32.mrb[118].mxu1 }
 0x9fc   :  { %v9027_v56 = vpop.f32.mrb[119].mxu1 }
 0xa01   :  { %v3476_v26 = vpop.f32.mrb[120].mxu1 }
 0xa02   :  { %v9038_v58 = vpop.f32.mrb[121].mxu1  ;;  %v3691_v42 = vsel %vm598_vm2, %v3476_v26, -inf }
 0xa03   :  { %3692 = vmax.xlane.f32.xlu0 %v3691_v42  ;;  %v3479_v19 = vpop.f32.mrb[122].mxu1 }
 0xa04   :  { %v9039_v55 = vpop.f32.mrb[123].mxu1 }
 0xa07   :  { %3695 = vmax.xlane.f32.xlu0 %v3694_v31 }
 0xa09   :  { %v3576_v1 = vpop.f32.mrb[124].mxu1 }
 0xa0a   :  { %v9050_v32 = vpop.f32.mrb[125].mxu1  ;;  %v3697_v12 = vsel %vm598_vm2, %v3576_v1, -inf }
 0xa0b   :  { %3701 = vmax.xlane.f32.xlu0 %v3700_v27  ;;  %3698 = vmax.xlane.f32.xlu1 %v3697_v12  ;;  %v3579_v30 = vpop.f32.mrb[126].mxu1 }
 0xa0c   :  { %v9051_v17 = vpop.f32.mrb[127].mxu1 }
 0xa0d   :  { %v3875_v17 = vpop.permute.xlu1 %3874 }
 0xa11   :  { %v11055_v8 = vpop.f32.mrb[128].mxu1 }
 0xa12   :  { %v9062_v23 = vpop.f32.mrb[129].mxu1  ;;  %v3703_v45 = vsel %vm598_vm2, %v11055_v8, -inf }
 0xa13   :  { %v3679_v41 = vpop.f32.mrb[130].mxu1 }
 0xa14   :  { %v9063_v25 = vpop.f32.mrb[131].mxu1 }
 0xa1c   :  { %4018 = vrot.lane.b32.xlu1 %v10543_v15, %s10066_s18 }
 0xa21   :  { %3970 = vrot.lane.b32.xlu0 %v10517_v39, %s10066_s18 }
 0xa40   :  { %3704 = vmax.xlane.f32.xlu1 %v3703_v45 }
 0xa57   :  { %v3684_v56 = vpop.xlane.xlu0 %3683 }
 0xa58   :  { %v3706_v58 = vsub.f32 %v3326_v50, %v3684_v56  ;;  %v11071_v50 = vpop.permute.xlu1 %3922 }
 0xa5a   :  { %v3714_v42 = vmul.f32 1.442695, %v3706_v58 }
 0xa5c   :  { %9687 = vpow2.f32 %v3714_v42 }
 0xa5f   :  { %v3690_v19 = vpop.xlane.xlu0 %3689 }
 0xa60   :  { %v3708_v55 = vsub.f32 %v3426_v36, %v3690_v19 }
 0xa62   :  { %v3718_v31 = vmul.f32 1.442695, %v3708_v55 }
 0xa64   :  { %9689 = vpow2.f32 %v3718_v31 }
 0xa66   :  { %v11063_v32 = vpop.eup %9687 }
 0xa67   :  { %v3730_v27 = vsel %vm598_vm2, %v11063_v32, 0.0 }
 0xa68   :  { %3731 = vadd.xlane.f32.xlu0 %v3730_v27 }
 0xa6e   :  { %v11067_v12 = vpop.eup %9689 }
 0xa6f   :  { %v3736_v30 = vsel %vm598_vm2, %v11067_v12, 0.0 }
 0xa70   :  { %3737 = vadd.xlane.f32.xlu0 %v3736_v30 }
 0xa88   :  { %v3687_v23 = vpop.xlane.xlu1 %3686 }
 0xa89   :  { %v3707_v41 = vsub.f32 %v3376_v3, %v3687_v23 }
 0xa8b   :  { %v3716_v36 = vmul.f32 1.442695, %v3707_v41 }
 0xa8d   :  { %9691 = vpow2.f32 %v3716_v36 }
 0xa90   :  { %v3693_v25 = vpop.xlane.xlu0 %3692 }
 0xa91   :  { %v3709_v45 = vsub.f32 %v3476_v26, %v3693_v25 }
 0xa93   :  { %v3720_v56 = vmul.f32 1.442695, %v3709_v45 }
 0xa94   :  { %v3696_v58 = vpop.xlane.xlu0 %3695 }
 0xa95   :  { %9693 = vpow2.f32 %v3720_v56  ;;  %v3710_v42 = vsub.f32 %v11042_v57, %v3696_v58 }
 0xa97   :  { %v11074_v19 = vpop.eup %9691  ;;  %v3722_v55 = vmul.f32 1.442695, %v3710_v42 }
 0xa98   :  { %v3733_v31 = vsel %vm598_vm2, %v11074_v19, 0.0  ;;  %v3699_v57 = vpop.xlane.xlu1 %3698  ;;  %v3702_v41 = vpop.xlane.xlu0 %3701 }
 0xa99   :  { %9695 = vpow2.f32 %v3722_v55  ;;  %3734 = vadd.xlane.f32.xlu1 %v3733_v31  ;;  %v3711_v23 = vsub.f32 %v3576_v1, %v3699_v57  ;;  %v3712_v36 = vsub.f32 %v11044_v52, %v3702_v41 }
 0xa9b   :  { %v3724_v25 = vmul.f32 1.442695, %v3711_v23  ;;  %v3726_v45 = vmul.f32 1.442695, %v3712_v36 }
 0xa9c   :  { %v11101_v52 = vpop.permute.xlu1 %4018  ;;  %v3971_v1 = vpop.permute.xlu0 %3970 }
 0xa9d   :  { %9697 = vpow2.f32 %v3724_v25 }
 0xa9e   :  { %9699 = vpow2.f32 %v3726_v45 }
 0xa9f   :  { %v11078_v27 = vpop.eup %9693 }
 0xaa0   :  { %v3739_v3 = vsel %vm598_vm2, %v11078_v27, 0.0 }
 0xaa1   :  { %3740 = vadd.xlane.f32.xlu1 %v3739_v3 }
 0xaa3   :  { %v11082_v26 = vpop.eup %9695 }
 0xaa4   :  { %v3742_v30 = vsel %vm598_vm2, %v11082_v26, 0.0 }
 0xaa5   :  { %3743 = vadd.xlane.f32.xlu0 %v3742_v30 }
 0xaa7   :  { %v11091_v56 = vpop.eup %9697 }
 0xaa8   :  { %v3745_v58 = vsel %vm598_vm2, %v11091_v56, 0.0  ;;  %v11095_v42 = vpop.eup %9699 }
 0xaa9   :  { %v3748_v55 = vsel %vm598_vm2, %v11095_v42, 0.0 }
 0xab2   :  { %4114 = vrot.lane.b32.xlu1 %v10575_v47, %s10066_s18 }
 0xabb   :  { %4066 = vrot.lane.b32.xlu0 %v10538_v54, %s10066_s18 }
 0xacd   :  { %v3705_v31 = vpop.xlane.xlu1 %3704 }
 0xace   :  { %v3713_v3 = vsub.f32 %v11055_v8, %v3705_v31  ;;  %v3880_v8 = vsel %vm1066_vm3, %v3875_v17, 0  ;;  %v3976_v31 = vsel %vm1066_vm3, %v3971_v1, 0 }
 0xad0   :  { %v3728_v57 = vmul.f32 1.442695, %v3713_v3 }
 0xad6   :  { %3746 = vadd.xlane.f32.xlu1 %v3745_v58 }
 0xada   :  { %3749 = vadd.xlane.f32.xlu0 %v3748_v55 }
 0xae7   :  { %4255 = vrot.lane.b32.xlu1 %v10310_v46, %s10067_s24 }
 0xaf0   :  { %4205 = vrot.lane.b32.xlu0 %v10299_v38, %s10067_s24 }
 0xaf4   :  { %4203 = vrot.lane.b32.xlu0 %v10315_v51, %s10067_s24 }
 0xaf5   :  { %v3732_v30 = vpop.xlane.xlu0 %3731 }
 0xaf6   :  { %9701 = vrcp.f32 %v3732_v30 }
 0xaf7   :  { %9703 = vpow2.f32 %v3728_v57 }
 0xaf8   :  { %4305 = vrot.lane.b32.xlu0 %v10292_v35, %s10067_s24 }
 0xafc   :  { %4303 = vrot.lane.b32.xlu0 %v10313_v49, %s10067_s24 }
 0xafd   :  { %v3738_v23 = vpop.xlane.xlu0 %3737 }
 0xafe   :  { %9705 = vrcp.f32 %v3738_v23 }
 0xb00   :  { %v9702_v41 = vpop.eup %9701  ;;  %4405 = vrot.lane.b32.xlu0 %v10318_v53, %s10067_s24 }
 0xb01   :  { %v3762_v36 = vmul.f32 %v9702_v41, %v11063_v32  ;;  %v11121_v45 = vpop.eup %9703  ;;  %v3928_v41 = vsel %vm1066_vm3, %v11071_v50, 0  ;;  %v4024_v50 = vsel %vm1066_vm3, %v11101_v52, 0 }
 0xb02   :  { %v3751_v55 = vsel %vm598_vm2, %v11121_v45, 0.0 }
 0xb03   :  { %v3770_v25 = vpack.c.bf16 %v3762_v36, %v3762_v36 }
 0xb04   :  { %4403 = vrot.lane.b32.xlu0 %v10343_v62, %s10067_s24 }
 0xb05   :  { %9067 = vmatmul.mubr.msk.bf16.vlgmr.msra.gmra.mrb[116].mxu0 %vm598_vm2, %v3770_v25 }
 0xb06   :  { %9077 = vmatpush3.bf16.msra.mxu0 %v3880_v8  ;;  %9078 = vmatprep.mubr.msk.bf16.mxu0 %vm10063_vm1, %v12201_v20 }
 0xb07   :  { %9088 = vmatprep.subr.bf16.mxu0 %v12201_v20 }
 0xb08   :  { %v9706_v58 = vpop.eup %9705  ;;  %4505 = vrot.lane.b32.xlu0 %v10333_v59, %s10067_s24 }
 0xb09   :  { %v3764_v32 = vmul.f32 %v9706_v58, %v11067_v12 }
 0xb0b   :  { %3752 = vadd.xlane.f32.xlu1 %v3751_v55  ;;  %v3772_v17 = vpack.c.bf16 %v3764_v32, %v3764_v32 }
 0xb0c   :  { %4503 = vrot.lane.b32.xlu0 %v10366_v6, %s10067_s24 }
 0xb0d   :  { %9079 = vmatmul.mubr.msk.bf16.vlgmr.msra.gmra.mrb[120].mxu0 %vm598_vm2, %v3772_v17 }
 0xb0e   :  { %9089 = vmatpush3.bf16.msra.mxu0 %v3976_v31  ;;  %9090 = vmatprep.mubr.msk.bf16.mxu0 %vm10063_vm1, %v12201_v20 }
 0xb0f   :  { %9100 = vmatprep.subr.bf16.mxu0 %v12201_v20 }
 0xb10   :  { %4699 = vrot.lane.b32.xlu0 %v10413_v33, %s10067_s24 }
 0xb1c   :  { %4253 = vrot.lane.b32.xlu1 %v10341_v61, %s10067_s24 }
 0xb20   :  { %4355 = vrot.lane.b32.xlu1 %v10339_v60, %s10067_s24 }
 0xb24   :  { %4353 = vrot.lane.b32.xlu1 %v10364_v5, %s10067_s24 }
 0xb26   :  { %v3735_v12 = vpop.xlane.xlu1 %3734 }
 0xb27   :  { %9707 = vrcp.f32 %v3735_v12 }
 0xb28   :  { %4455 = vrot.lane.b32.xlu1 %v10356_v4, %s10067_s24 }
 0xb2c   :  { %4453 = vrot.lane.b32.xlu1 %v10384_v11, %s10067_s24 }
 0xb2e   :  { %v3741_v1 = vpop.xlane.xlu1 %3740 }
 0xb2f   :  { %9709 = vrcp.f32 %v3741_v1 }
 0xb30   :  { %4555 = vrot.lane.b32.xlu1 %v10379_v10, %s10067_s24 }
 0xb31   :  { %v9708_v3 = vpop.eup %9707 }
 0xb32   :  { %v3744_v30 = vpop.xlane.xlu0 %3743  ;;  %v3763_v57 = vmul.f32 %v9708_v3, %v11074_v19 }
 0xb33   :  { %9711 = vrcp.f32 %v3744_v30 }
 0xb34   :  { %4553 = vrot.lane.b32.xlu1 %v10395_v14, %s10067_s24  ;;  %v3771_v23 = vpack.c.bf16 %v3763_v57, %v3763_v57 }
 0xb36   :  { %9073 = vmatmul.mubr.msk.bf16.vlgmr.msra.gmra.mrb[132].mxu1 %vm598_vm2, %v3771_v23  ;;  %v4067_v32 = vpop.permute.xlu0 %4066 }
 0xb37   :  { %9083 = vmatpush3.bf16.msra.mxu1 %v3928_v41  ;;  %9084 = vmatprep.mubr.msk.bf16.mxu1 %vm10063_vm1, %v12201_v20  ;;  %v4072_v55 = vsel %vm1066_vm3, %v4067_v32, 0 }
 0xb38   :  { %4747 = vrot.lane.b32.xlu1 %v10415_v34, %s10067_s24  ;;  %9094 = vmatprep.subr.bf16.mxu1 %v12201_v20 }
 0xb39   :  { %v9710_v19 = vpop.eup %9709 }
 0xb3a   :  { %v3765_v36 = vmul.f32 %v9710_v19, %v11078_v27 }
 0xb3c   :  { %4795 = vrot.lane.b32.xlu1 %v10497_v48, %s10067_s24  ;;  %v3773_v25 = vpack.c.bf16 %v3765_v36, %v3765_v36 }
 0xb3d   :  { %v9712_v8 = vpop.eup %9711 }
 0xb3e   :  { %9085 = vmatmul.mubr.msk.bf16.vlgmr.msra.gmra.mrb[136].mxu1 %vm598_vm2, %v3773_v25  ;;  %v3766_v58 = vmul.f32 %v9712_v8, %v11082_v26  ;;  %v4115_v26 = vpop.permute.xlu1 %4114 }
 0xb3f   :  { %9095 = vmatpush3.bf16.msra.mxu1 %v4024_v50  ;;  %9096 = vmatprep.mubr.msk.bf16.mxu1 %vm10063_vm1, %v12201_v20  ;;  %v4120_v23 = vsel %vm1066_vm3, %v4115_v26, 0 }
 0xb40   :  { %4843 = vrot.lane.b32.xlu1 %v10513_v2, %s10067_s24  ;;  %v3774_v27 = vpack.c.bf16 %v3766_v58, %v3766_v58  ;;  %9106 = vmatprep.subr.bf16.mxu1 %v12201_v20 }
 0xb42   :  { %9091 = vmatmul.mubr.msk.bf16.vlgmr.msra.gmra.mrb[124].mxu0 %vm598_vm2, %v3774_v27 }
 0xb43   :  { %9101 = vmatpush3.bf16.msra.mxu0 %v4072_v55  ;;  %9102 = vmatprep.mubr.msk.bf16.mxu0 %vm10063_vm1, %v12201_v20 }
 0xb44   :  { %9112 = vmatprep.subr.bf16.mxu0 %v12201_v20 }
 0xb63   :  { %v3747_v52 = vpop.xlane.xlu1 %3746 }
 0xb64   :  { %9713 = vrcp.f32 %v3747_v52 }
 0xb67   :  { %v3750_v17 = vpop.xlane.xlu0 %3749  ;;  %v4256_v26 = vpop.permute.xlu1 %4255 }
 0xb68   :  { %9715 = vrcp.f32 %v3750_v17 }
 0xb6b   :  { %v4206_v31 = vpop.permute.xlu0 %4205 }
 0xb6c   :  { %v4211_v25 = vsel %vm598_vm2, %v4206_v31, 0 }
 0xb6e   :  { %v9714_v12 = vpop.eup %9713 }
 0xb6f   :  { %v4204_v1 = vpop.permute.xlu0 %4203  ;;  %v3767_v3 = vmul.f32 %v9714_v12, %v11091_v56 }
 0xb71   :  { %v3775_v30 = vpack.c.bf16 %v3767_v3, %v3767_v3 }
 0xb72   :  { %v9716_v57 = vpop.eup %9715 }
 0xb73   :  { %v4306_v41 = vpop.permute.xlu0 %4305  ;;  %9097 = vmatmul.mubr.msk.bf16.vlgmr.msra.gmra.mrb[140].mxu1 %vm598_vm2, %v3775_v30  ;;  %v3768_v19 = vmul.f32 %v9716_v57, %v11095_v42 }
 0xb74   :  { %9107 = vmatpush3.bf16.msra.mxu1 %v4120_v23  ;;  %9108 = vmatprep.mubr.msk.bf16.mxu1 %vm10063_vm1, %v12201_v20  ;;  %v4311_v42 = vsel %vm598_vm2, %v4306_v41, 0  ;;  %v4261_v41 = vsel %vm598_vm2, %v4256_v26, 0 }
 0xb75   :  { %v3776_v36 = vpack.c.bf16 %v3768_v19, %v3768_v19  ;;  %9118 = vmatprep.subr.bf16.mxu1 %v12201_v20 }
 0xb77   :  { %9103 = vmatmul.mubr.msk.bf16.vlgmr.msra.gmra.mrb[128].mxu0 %vm598_vm2, %v3776_v36  ;;  %v4304_v56 = vpop.permute.xlu0 %4303 }
 0xb78   :  { %9113 = vmatpush3.bf16.xpose.msra.mxu0 %v4211_v25  ;;  %9114 = vmatprep.mubr.msk.bf16.mxu0 %vm10063_vm1, %v12201_v20 }
 0xb79   :  { %9124 = vmatprep.subr.bf16.mxu0 %v12201_v20 }
 0xb7b   :  { %v4406_v8 = vpop.permute.xlu0 %4405 }
 0xb7c   :  { %v4411_v58 = vsel %vm598_vm2, %v4406_v8, 0 }
 0xb7f   :  { %9115 = vmatmul.mubr.msk.bf16.vlgmr.msra.gmra.mrb[132].mxu0 %vm598_vm2, %v4204_v1  ;;  %v4404_v50 = vpop.permute.xlu0 %4403 }
 0xb80   :  { %9125 = vmatpush3.bf16.xpose.msra.mxu0 %v4311_v42  ;;  %9126 = vmatprep.mubr.msk.bf16.mxu0 %vm10063_vm1, %v12201_v20 }
 0xb81   :  { %9136 = vmatprep.subr.bf16.mxu0 %v12201_v20 }
 0xb83   :  { %v4506_v32 = vpop.permute.xlu0 %4505 }
 0xb84   :  { %v4511_v55 = vsel %vm598_vm2, %v4506_v32, 0 }
 0xb87   :  { %9127 = vmatmul.mubr.msk.bf16.vlgmr.msra.gmra.mrb[136].mxu0 %vm598_vm2, %v4304_v56  ;;  %v4504_v27 = vpop.permute.xlu0 %4503 }
 0xb88   :  { %9137 = vmatpush3.bf16.xpose.msra.mxu0 %v4411_v58  ;;  %9138 = vmatprep.mubr.msk.bf16.mxu0 %vm10063_vm1, %v12201_v20 }
 0xb89   :  { %9148 = vmatprep.subr.bf16.mxu0 %v12201_v20 }
 0xb8b   :  { %v4700_v52 = vpop.permute.xlu0 %4699 }
 0xb8c   :  { %v4705_v17 = vsel %vm1066_vm3, %v4700_v52, 0 }
 0xb8f   :  { %9139 = vmatmul.mubr.msk.bf16.vlgmr.msra.gmra.mrb[140].mxu0 %vm598_vm2, %v4404_v50 }
 0xb90   :  { %9149 = vmatpush3.bf16.xpose.msra.mxu0 %v4511_v55  ;;  %9150 = vmatprep.mubr.msk.bf16.mxu0 %vm10063_vm1, %v12201_v20 }
 0xb91   :  { %9160 = vmatprep.subr.bf16.mxu0 %v12201_v20 }
 0xb97   :  { %9151 = vmatmul.mubr.msk.bf16.vlgmr.msra.gmra.mrb[144].mxu0 %vm598_vm2, %v4504_v27 }
 0xb98   :  { %9161 = vmatpush3.bf16.msra.mxu0 %v4705_v17  ;;  %v3753_v31 = vpop.xlane.xlu1 %3752  ;;  %9162 = vmatprep.mubr.msk.bf16.mxu0 %vm10063_vm1, %v12201_v20 }
 0xb99   :  { %9717 = vrcp.f32 %v3753_v31  ;;  %9172 = vmatprep.subr.bf16.mxu0 %v12201_v20 }
 0xb9c   :  { %v4254_v12 = vpop.permute.xlu1 %4253 }
 0xba0   :  { %v4356_v1 = vpop.permute.xlu1 %4355 }
 0xba1   :  { %v4361_v36 = vsel %vm598_vm2, %v4356_v1, 0 }
 0xba3   :  { %v9718_v3 = vpop.eup %9717 }
 0xba4   :  { %v3769_v30 = vmul.f32 %v9718_v3, %v11121_v45  ;;  %v4354_v23 = vpop.permute.xlu1 %4353 }
 0xba6   :  { %v3777_v57 = vpack.c.bf16 %v3769_v30, %v3769_v30 }
 0xba8   :  { %9109 = vmatmul.mubr.msk.bf16.vlgmr.msra.gmra.mrb[144].mxu1 %vm598_vm2, %v3777_v57  ;;  %v4456_v19 = vpop.permute.xlu1 %4455 }
 0xba9   :  { %9119 = vmatpush3.bf16.xpose.msra.mxu1 %v4261_v41  ;;  %9120 = vmatprep.mubr.msk.bf16.mxu1 %vm10063_vm1, %v12201_v20  ;;  %v4461_v25 = vsel %vm598_vm2, %v4456_v19, 0 }
 0xbaa   :  { %9130 = vmatprep.subr.bf16.mxu1 %v12201_v20 }
 0xbac   :  { %v4454_v45 = vpop.permute.xlu1 %4453 }
 0xbb0   :  { %9121 = vmatmul.mubr.msk.bf16.vlgmr.msra.gmra.mrb[148].mxu1 %vm598_vm2, %v4254_v12  ;;  %v4556_v56 = vpop.permute.xlu1 %4555 }
 0xbb1   :  { %9131 = vmatpush3.bf16.xpose.msra.mxu1 %v4361_v36  ;;  %9132 = vmatprep.mubr.msk.bf16.mxu1 %vm10063_vm1, %v12201_v20  ;;  %v4561_v42 = vsel %vm598_vm2, %v4556_v56, 0 }
 0xbb2   :  { %9142 = vmatprep.subr.bf16.mxu1 %v12201_v20 }
 0xbb4   :  { %v4554_v8 = vpop.permute.xlu1 %4553 }
 0xbb8   :  { %9133 = vmatmul.mubr.msk.bf16.vlgmr.msra.gmra.mrb[152].mxu1 %vm598_vm2, %v4354_v23  ;;  %v4748_v50 = vpop.permute.xlu1 %4747 }
 0xbb9   :  { %9143 = vmatpush3.bf16.xpose.msra.mxu1 %v4461_v25  ;;  %9144 = vmatprep.mubr.msk.bf16.mxu1 %vm10063_vm1, %v12201_v20  ;;  %v4753_v58 = vsel %vm1066_vm3, %v4748_v50, 0 }
 0xbba   :  { %9154 = vmatprep.subr.bf16.mxu1 %v12201_v20 }
 0xbc0   :  { %9145 = vmatmul.mubr.msk.bf16.vlgmr.msra.gmra.mrb[156].mxu1 %vm598_vm2, %v4454_v45 }
 0xbc1   :  { %9155 = vmatpush3.bf16.xpose.msra.mxu1 %v4561_v42  ;;  %9156 = vmatprep.mubr.msk.bf16.mxu1 %vm10063_vm1, %v12201_v20 }
 0xbc2   :  { %9166 = vmatprep.subr.bf16.mxu1 %v12201_v20 }
 0xbc8   :  { %9157 = vmatmul.mubr.msk.bf16.vlgmr.msra.gmra.mrb[160].mxu1 %vm598_vm2, %v4554_v8 }
 0xbc9   :  { %9167 = vmatpush3.bf16.msra.mxu1 %v4753_v58  ;;  %9168 = vmatprep.mubr.msk.bf16.mxu1 %vm10063_vm1, %v12201_v20 }
 0xbca   :  { %9178 = vmatprep.subr.bf16.mxu1 %v12201_v20 }
 0xbd8   :  { %v11236_v32 = vpop.f32.mrb[116].mxu0 }
 0xbd9   :  { %v9068_v27 = vpop.f32.mrb[117].mxu0 }
 0xbda   :  { %v3823_v55 = vpop.f32.mrb[118].mxu0 }
 0xbdb   :  { %v9069_v26 = vpop.f32.mrb[119].mxu0 }
 0xbe0   :  { %v11238_v52 = vpop.f32.mrb[120].mxu0 }
 0xbe1   :  { %v9080_v17 = vpop.f32.mrb[121].mxu0 }
 0xbe2   :  { %v3919_v31 = vpop.f32.mrb[122].mxu0 }
 0xbe3   :  { %v9081_v12 = vpop.f32.mrb[123].mxu0 }
 0xc09   :  { %v11240_v1 = vpop.f32.mrb[132].mxu1 }
 0xc0a   :  { %12208 = vst [vmem:[#allocation26_spill] sm:$0xff] %v11240_v1  ;;  %v9074_v3 = vpop.f32.mrb[133].mxu1 }
 0xc0b   :  { %v3871_v30 = vpop.f32.mrb[134].mxu1 }
 0xc0c   :  { %v9075_v57 = vpop.f32.mrb[135].mxu1 }
 0xc11   :  { %v11242_v23 = vpop.f32.mrb[136].mxu1 }
 0xc12   :  { %12209 = vst [vmem:[#allocation27_spill] sm:$0xff] %v11242_v23  ;;  %v9086_v41 = vpop.f32.mrb[137].mxu1 }
 0xc13   :  { %v3967_v19 = vpop.f32.mrb[138].mxu1 }
 0xc14   :  { %v9087_v36 = vpop.f32.mrb[139].mxu1 }
 0xc15   :  { %v11244_v45 = vpop.f32.mrb[124].mxu0 }
 0xc16   :  { %12210 = vst [vmem:[#allocation28_spill] sm:$0xff] %v11244_v45  ;;  %v9092_v25 = vpop.f32.mrb[125].mxu0 }
 0xc17   :  { %v4015_v56 = vpop.f32.mrb[126].mxu0 }
 0xc18   :  { %v9093_v8 = vpop.f32.mrb[127].mxu0 }
 0xc46   :  { %v11246_v42 = vpop.f32.mrb[140].mxu1 }
 0xc47   :  { %12211 = vst [vmem:[#allocation29_spill] sm:$0xff] %v11246_v42  ;;  %v9098_v50 = vpop.f32.mrb[141].mxu1 }
 0xc48   :  { %v4063_v58 = vpop.f32.mrb[142].mxu1 }
 0xc49   :  { %v9099_v27 = vpop.f32.mrb[143].mxu1 }
 0xc4a   :  { %v11248_v55 = vpop.f32.mrb[128].mxu0 }
 0xc4b   :  { %12212 = vst [vmem:[#allocation30_spill] sm:$0xff] %v11248_v55  ;;  %v9104_v26 = vpop.f32.mrb[129].mxu0 }
 0xc4c   :  { %v4111_v17 = vpop.f32.mrb[130].mxu0 }
 0xc4d   :  { %v9105_v31 = vpop.f32.mrb[131].mxu0 }
 0xc52   :  { %v4247_v12 = vpop.f32.mrb[132].mxu0 }
 0xc53   :  { %v9116_v3 = vpop.f32.mrb[133].mxu0  ;;  %v4603_v30 = vsel %vm598_vm2, %v4247_v12, -inf }
 0xc54   :  { %4604 = vmax.xlane.f32.xlu0 %v4603_v30  ;;  %v4250_v57 = vpop.f32.mrb[134].mxu0 }
 0xc55   :  { %v9117_v41 = vpop.f32.mrb[135].mxu0 }
 0xc5a   :  { %v4347_v19 = vpop.f32.mrb[136].mxu0 }
 0xc5b   :  { %v9128_v36 = vpop.f32.mrb[137].mxu0  ;;  %v4609_v25 = vsel %vm598_vm2, %v4347_v19, -inf }
 0xc5c   :  { %4610 = vmax.xlane.f32.xlu0 %v4609_v25  ;;  %v4350_v56 = vpop.f32.mrb[138].mxu0 }
 0xc5d   :  { %v9129_v8 = vpop.f32.mrb[139].mxu0 }
 0xc62   :  { %v11252_v50 = vpop.f32.mrb[140].mxu0 }
 0xc63   :  { %v9140_v58 = vpop.f32.mrb[141].mxu0 }
 0xc64   :  { %v4450_v27 = vpop.f32.mrb[142].mxu0 }
 0xc65   :  { %v9141_v26 = vpop.f32.mrb[143].mxu0 }
 0xc6a   :  { %v11254_v17 = vpop.f32.mrb[144].mxu0 }
 0xc6b   :  { %v9152_v31 = vpop.f32.mrb[145].mxu0 }
 0xc6c   :  { %v4550_v3 = vpop.f32.mrb[146].mxu0 }
 0xc6d   :  { %v9153_v20 = vpop.f32.mrb[147].mxu0 }
 0xc6e   :  { %v4615_v20 = vsel %vm598_vm2, %v11252_v50, -inf }
 0xc7b   :  { %v11256_v30 = vpop.f32.mrb[144].mxu1 }
 0xc7c   :  { %12213 = vst [vmem:[#allocation31_spill] sm:$0xff] %v11256_v30  ;;  %v9110_v57 = vpop.f32.mrb[145].mxu1 }
 0xc7d   :  { %v4159_v41 = vpop.f32.mrb[146].mxu1 }
 0xc7e   :  { %v9111_v36 = vpop.f32.mrb[147].mxu1 }
 0xc83   :  { %v4297_v42 = vpop.f32.mrb[148].mxu1 }
 0xc84   :  { %v9122_v28 = vpop.f32.mrb[149].mxu1  ;;  %v4606_v25 = vsel %vm598_vm2, %v4297_v42, -inf }
 0xc85   :  { %4607 = vmax.xlane.f32.xlu1 %v4606_v25  ;;  %v4300_v56 = vpop.f32.mrb[150].mxu1  ;;  %v4621_v28 = vsel %vm598_vm2, %v11254_v17, -inf }
 0xc86   :  { %v9123_v8 = vpop.f32.mrb[151].mxu1 }
 0xc8b   :  { %v4397_v58 = vpop.f32.mrb[152].mxu1 }
 0xc8c   :  { %v9134_v27 = vpop.f32.mrb[153].mxu1  ;;  %v4612_v26 = vsel %vm598_vm2, %v4397_v58, -inf }
 0xc8d   :  { %4613 = vmax.xlane.f32.xlu0 %v4612_v26  ;;  %v4400_v31 = vpop.f32.mrb[154].mxu1 }
 0xc8e   :  { %v9135_v3 = vpop.f32.mrb[155].mxu1 }
 0xc91   :  { %4616 = vmax.xlane.f32.xlu0 %v4615_v20 }
 0xc93   :  { %v4497_v57 = vpop.f32.mrb[156].mxu1 }
 0xc94   :  { %v9146_v41 = vpop.f32.mrb[157].mxu1  ;;  %v4618_v36 = vsel %vm598_vm2, %v4497_v57, -inf }
 0xc95   :  { %4622 = vmax.xlane.f32.xlu0 %v4621_v28  ;;  %4619 = vmax.xlane.f32.xlu1 %v4618_v36  ;;  %v4500_v25 = vpop.f32.mrb[158].mxu1 }
 0xc96   :  { %v9147_v56 = vpop.f32.mrb[159].mxu1 }
 0xc9b   :  { %v11265_v8 = vpop.f32.mrb[160].mxu1 }
 0xc9c   :  { %v9158_v27 = vpop.f32.mrb[161].mxu1  ;;  %v4624_v3 = vsel %vm598_vm2, %v11265_v8, -inf }
 0xc9d   :  { %v4600_v26 = vpop.f32.mrb[162].mxu1 }
 0xc9e   :  { %v9159_v31 = vpop.f32.mrb[163].mxu1 }
 0xca6   :  { %4939 = vrot.lane.b32.xlu1 %v10543_v15, %s10067_s24 }
 0xcab   :  { %4891 = vrot.lane.b32.xlu0 %v10517_v39, %s10067_s24 }
 0xcca   :  { %4625 = vmax.xlane.f32.xlu1 %v4624_v3  ;;  %v4796_v3 = vpop.permute.xlu1 %4795 }
 0xce1   :  { %v4605_v20 = vpop.xlane.xlu0 %4604 }
 0xce2   :  { %v4627_v41 = vsub.f32 %v4247_v12, %v4605_v20  ;;  %v11281_v12 = vpop.permute.xlu1 %4843 }
 0xce4   :  { %v4635_v28 = vmul.f32 1.442695, %v4627_v41 }
 0xce6   :  { %9719 = vpow2.f32 %v4635_v28 }
 0xce9   :  { %v4611_v36 = vpop.xlane.xlu0 %4610 }
 0xcea   :  { %v4629_v25 = vsub.f32 %v4347_v19, %v4611_v36 }
 0xcec   :  { %v4639_v56 = vmul.f32 1.442695, %v4629_v25 }
 0xcee   :  { %9721 = vpow2.f32 %v4639_v56 }
 0xcf0   :  { %v11273_v27 = vpop.eup %9719 }
 0xcf1   :  { %v4651_v26 = vsel %vm598_vm2, %v11273_v27, 0.0 }
 0xcf2   :  { %4652 = vadd.xlane.f32.xlu0 %v4651_v26 }
 0xcf8   :  { %v11277_v31 = vpop.eup %9721 }
 0xcf9   :  { %v4657_v30 = vsel %vm598_vm2, %v11277_v31, 0.0 }
 0xcfa   :  { %4658 = vadd.xlane.f32.xlu0 %v4657_v30 }
 0xd12   :  { %v4608_v20 = vpop.xlane.xlu1 %4607 }
 0xd13   :  { %v4628_v41 = vsub.f32 %v4297_v42, %v4608_v20 }
 0xd15   :  { %v4637_v19 = vmul.f32 1.442695, %v4628_v41 }
 0xd17   :  { %9723 = vpow2.f32 %v4637_v19 }
 0xd1a   :  { %v4614_v28 = vpop.xlane.xlu0 %4613 }
 0xd1b   :  { %v4630_v36 = vsub.f32 %v4397_v58, %v4614_v28 }
 0xd1d   :  { %v4641_v25 = vmul.f32 1.442695, %v4630_v36 }
 0xd1e   :  { %v4617_v56 = vpop.xlane.xlu0 %4616 }
 0xd1f   :  { %9725 = vpow2.f32 %v4641_v25  ;;  %v4631_v26 = vsub.f32 %v11252_v50, %v4617_v56 }
 0xd21   :  { %v11284_v18 = vpop.eup %9723  ;;  %v4643_v44 = vmul.f32 1.442695, %v4631_v26 }
 0xd22   :  { %v4654_v30 = vsel %vm598_vm2, %v11284_v18, 0.0  ;;  %v4623_v41 = vpop.xlane.xlu0 %4622 }
 0xd23   :  { %9727 = vpow2.f32 %v4643_v44  ;;  %4655 = vadd.xlane.f32.xlu1 %v4654_v30  ;;  %v4620_v44 = vpop.xlane.xlu1 %4619  ;;  %v4633_v19 = vsub.f32 %v11254_v17, %v4623_v41 }
 0xd24   :  { %v4632_v50 = vsub.f32 %v4497_v57, %v4620_v44 }
 0xd25   :  { %v4647_v36 = vmul.f32 1.442695, %v4633_v19 }
 0xd26   :  { %v4645_v28 = vmul.f32 1.442695, %v4632_v50  ;;  %v4892_v57 = vpop.permute.xlu0 %4891 }
 0xd27   :  { %v11311_v17 = vpop.permute.xlu1 %4939 }
 0xd28   :  { %9729 = vpow2.f32 %v4645_v28 }
 0xd29   :  { %v11288_v21 = vpop.eup %9725  ;;  %9731 = vpow2.f32 %v4647_v36 }
 0xd2a   :  { %v4660_v42 = vsel %vm598_vm2, %v11288_v21, 0.0 }
 0xd2b   :  { %4661 = vadd.xlane.f32.xlu1 %v4660_v42 }
 0xd2d   :  { %v11292_v58 = vpop.eup %9727 }
 0xd2e   :  { %v4663_v20 = vsel %vm598_vm2, %v11292_v58, 0.0 }
 0xd2f   :  { %4664 = vadd.xlane.f32.xlu0 %v4663_v20 }
 0xd32   :  { %v11301_v25 = vpop.eup %9729 }
 0xd33   :  { %v4666_v56 = vsel %vm598_vm2, %v11301_v25, 0.0  ;;  %v11305_v26 = vpop.eup %9731 }
 0xd34   :  { %v4669_v30 = vsel %vm598_vm2, %v11305_v26, 0.0 }
 0xd3c   :  { %5035 = vrot.lane.b32.xlu1 %v10575_v47, %s10067_s24 }
 0xd45   :  { %4987 = vrot.lane.b32.xlu0 %v10538_v54, %s10067_s24 }
 0xd57   :  { %v4626_v42 = vpop.xlane.xlu1 %4625 }
 0xd58   :  { %v4634_v20 = vsub.f32 %v11265_v8, %v4626_v42  ;;  %v4801_v8 = vsel %vm1066_vm3, %v4796_v3, 0 }
 0xd5a   :  { %v4649_v50 = vmul.f32 1.442695, %v4634_v20 }
 0xd60   :  { %4667 = vadd.xlane.f32.xlu1 %v4666_v56  ;;  %v12214_v56 = vmov 0.0  }
 0xd64   :  { %4670 = vadd.xlane.f32.xlu0 %v4669_v30 }
 0xd71   :  { %5176 = vrot.lane.b32.xlu1 %v10310_v46, %s10068_s26 }
 0xd7a   :  { %5126 = vrot.lane.b32.xlu0 %v10299_v38, %s10068_s26 }
 0xd7e   :  { %5124 = vrot.lane.b32.xlu0 %v10315_v51, %s10068_s26 }
 0xd7f   :  { %v4653_v44 = vpop.xlane.xlu0 %4652 }
 0xd80   :  { %9733 = vrcp.f32 %v4653_v44  ;;  %v4897_v44 = vsel %vm1066_vm3, %v4892_v57, 0 }
 0xd81   :  { %9735 = vpow2.f32 %v4649_v50 }
 0xd82   :  { %5226 = vrot.lane.b32.xlu0 %v10292_v35, %s10068_s26 }
 0xd86   :  { %5224 = vrot.lane.b32.xlu0 %v10313_v49, %s10068_s26 }
 0xd87   :  { %v4659_v41 = vpop.xlane.xlu0 %4658 }
 0xd88   :  { %9737 = vrcp.f32 %v4659_v41 }
 0xd8a   :  { %v9734_v19 = vpop.eup %9733  ;;  %5326 = vrot.lane.b32.xlu0 %v10318_v53, %s10068_s26 }
 0xd8b   :  { %v4683_v28 = vmul.f32 %v9734_v19, %v11273_v27  ;;  %v11331_v30 = vpop.eup %9735 }
 0xd8c   :  { %v4672_v20 = vsel %vm598_vm2, %v11331_v30, 0.0 }
 0xd8d   :  { %v4691_v36 = vpack.c.bf16 %v4683_v28, %v4683_v28 }
 0xd8e   :  { %5324 = vrot.lane.b32.xlu0 %v10343_v62, %s10068_s26 }
 0xd8f   :  { %9163 = vmatmul.mubr.msk.bf16.vlgmr.msra.gmra.mrb[148].mxu0 %vm598_vm2, %v4691_v36  ;;  %v4849_v36 = vsel %vm1066_vm3, %v11281_v12, 0  ;;  %v4945_v12 = vsel %vm1066_vm3, %v11311_v17, 0 }
 0xd90   :  { %9173 = vmatpush3.bf16.msra.mxu0 %v4801_v8  ;;  %9174 = vmatprep.mubr.msk.bf16.mxu0 %vm10063_vm1, %v12214_v56 }
 0xd91   :  { %9184 = vmatprep.subr.bf16.mxu0 %v12214_v56 }
 0xd92   :  { %v9738_v42 = vpop.eup %9737  ;;  %5426 = vrot.lane.b32.xlu0 %v10333_v59, %s10068_s26 }
 0xd93   :  { %v4685_v27 = vmul.f32 %v9738_v42, %v11277_v31 }
 0xd95   :  { %4673 = vadd.xlane.f32.xlu1 %v4672_v20  ;;  %v4693_v3 = vpack.c.bf16 %v4685_v27, %v4685_v27 }
 0xd96   :  { %5424 = vrot.lane.b32.xlu0 %v10366_v6, %s10068_s26 }
 0xd97   :  { %9175 = vmatmul.mubr.msk.bf16.vlgmr.msra.gmra.mrb[152].mxu0 %vm598_vm2, %v4693_v3 }
 0xd98   :  { %9185 = vmatpush3.bf16.msra.mxu0 %v4897_v44  ;;  %9186 = vmatprep.mubr.msk.bf16.mxu0 %vm10063_vm1, %v12214_v56 }
 0xd99   :  { %9196 = vmatprep.subr.bf16.mxu0 %v12214_v56 }
 0xd9a   :  { %5620 = vrot.lane.b32.xlu0 %v10413_v33, %s10068_s26 }
 0xda6   :  { %5174 = vrot.lane.b32.xlu1 %v10341_v61, %s10068_s26 }
 0xdaa   :  { %5276 = vrot.lane.b32.xlu1 %v10339_v60, %s10068_s26 }
 0xdae   :  { %5274 = vrot.lane.b32.xlu1 %v10364_v5, %s10068_s26 }
 0xdb0   :  { %v4656_v31 = vpop.xlane.xlu1 %4655 }
 0xdb1   :  { %9739 = vrcp.f32 %v4656_v31 }
 0xdb2   :  { %5376 = vrot.lane.b32.xlu1 %v10356_v4, %s10068_s26 }
 0xdb6   :  { %5374 = vrot.lane.b32.xlu1 %v10384_v11, %s10068_s26 }
 0xdb8   :  { %v4662_v57 = vpop.xlane.xlu1 %4661 }
 0xdb9   :  { %9741 = vrcp.f32 %v4662_v57 }
 0xdba   :  { %5476 = vrot.lane.b32.xlu1 %v10379_v10, %s10068_s26 }
 0xdbb   :  { %v9740_v50 = vpop.eup %9739 }
 0xdbc   :  { %v4665_v41 = vpop.xlane.xlu0 %4664  ;;  %v4684_v19 = vmul.f32 %v9740_v50, %v11284_v18 }
 0xdbd   :  { %9743 = vrcp.f32 %v4665_v41 }
 0xdbe   :  { %5474 = vrot.lane.b32.xlu1 %v10395_v14, %s10068_s26  ;;  %v4692_v28 = vpack.c.bf16 %v4684_v19, %v4684_v19 }
 0xdc0   :  { %9169 = vmatmul.mubr.msk.bf16.vlgmr.msra.gmra.mrb[164].mxu1 %vm598_vm2, %v4692_v28  ;;  %v4988_v3 = vpop.permute.xlu0 %4987 }
 0xdc1   :  { %9179 = vmatpush3.bf16.msra.mxu1 %v4849_v36  ;;  %9180 = vmatprep.mubr.msk.bf16.mxu1 %vm10063_vm1, %v12214_v56  ;;  %v4993_v44 = vsel %vm1066_vm3, %v4988_v3, 0 }
 0xdc2   :  { %5668 = vrot.lane.b32.xlu1 %v10415_v34, %s10068_s26  ;;  %9190 = vmatprep.subr.bf16.mxu1 %v12214_v56 }
 0xdc3   :  { %v9742_v18 = vpop.eup %9741 }
 0xdc4   :  { %v4686_v8 = vmul.f32 %v9742_v18, %v11288_v21 }
 0xdc6   :  { %5716 = vrot.lane.b32.xlu1 %v10497_v48, %s10068_s26  ;;  %v4694_v42 = vpack.c.bf16 %v4686_v8, %v4686_v8 }
 0xdc7   :  { %v9744_v27 = vpop.eup %9743 }
 0xdc8   :  { %9181 = vmatmul.mubr.msk.bf16.vlgmr.msra.gmra.mrb[168].mxu1 %vm598_vm2, %v4694_v42  ;;  %v4687_v20 = vmul.f32 %v9744_v27, %v11292_v58  ;;  %v5036_v58 = vpop.permute.xlu1 %5035 }
 0xdc9   :  { %9191 = vmatpush3.bf16.msra.mxu1 %v4945_v12  ;;  %9192 = vmatprep.mubr.msk.bf16.mxu1 %vm10063_vm1, %v12214_v56  ;;  %v5041_v18 = vsel %vm1066_vm3, %v5036_v58, 0 }
 0xdca   :  { %5764 = vrot.lane.b32.xlu1 %v10513_v2, %s10068_s26  ;;  %v4695_v21 = vpack.c.bf16 %v4687_v20, %v4687_v20  ;;  %9202 = vmatprep.subr.bf16.mxu1 %v12214_v56 }
 0xdcc   :  { %9187 = vmatmul.mubr.msk.bf16.vlgmr.msra.gmra.mrb[156].mxu0 %vm598_vm2, %v4695_v21 }
 0xdcd   :  { %9197 = vmatpush3.bf16.msra.mxu0 %v4993_v44  ;;  %9198 = vmatprep.mubr.msk.bf16.mxu0 %vm10063_vm1, %v12214_v56 }
 0xdce   :  { %9208 = vmatprep.subr.bf16.mxu0 %v12214_v56 }
 0xded   :  { %v4668_v17 = vpop.xlane.xlu1 %4667 }
 0xdee   :  { %9745 = vrcp.f32 %v4668_v17 }
 0xdf1   :  { %v4671_v31 = vpop.xlane.xlu0 %4670 }
 0xdf2   :  { %9747 = vrcp.f32 %v4671_v31  ;;  %v5177_v31 = vpop.permute.xlu1 %5176 }
 0xdf5   :  { %v5127_v57 = vpop.permute.xlu0 %5126 }
 0xdf6   :  { %v5132_v12 = vsel %vm598_vm2, %v5127_v57, 0 }
 0xdf8   :  { %v9746_v50 = vpop.eup %9745 }
 0xdf9   :  { %v5125_v41 = vpop.permute.xlu0 %5124  ;;  %v4688_v19 = vmul.f32 %v9746_v50, %v11301_v25 }
 0xdfb   :  { %v4696_v28 = vpack.c.bf16 %v4688_v19, %v4688_v19 }
 0xdfc   :  { %v9748_v36 = vpop.eup %9747 }
 0xdfd   :  { %v5227_v8 = vpop.permute.xlu0 %5226  ;;  %9193 = vmatmul.mubr.msk.bf16.vlgmr.msra.gmra.mrb[172].mxu1 %vm598_vm2, %v4696_v28  ;;  %v4689_v42 = vmul.f32 %v9748_v36, %v11305_v26 }
 0xdfe   :  { %9203 = vmatpush3.bf16.msra.mxu1 %v5041_v18  ;;  %9204 = vmatprep.mubr.msk.bf16.mxu1 %vm10063_vm1, %v12214_v56  ;;  %v5232_v26 = vsel %vm598_vm2, %v5227_v8, 0 }
 0xdff   :  { %v4697_v27 = vpack.c.bf16 %v4689_v42, %v4689_v42  ;;  %9214 = vmatprep.subr.bf16.mxu1 %v12214_v56 }
 0xe01   :  { %9199 = vmatmul.mubr.msk.bf16.vlgmr.msra.gmra.mrb[160].mxu0 %vm598_vm2, %v4697_v27  ;;  %v5225_v25 = vpop.permute.xlu0 %5224  ;;  %v5182_v27 = vsel %vm598_vm2, %v5177_v31, 0 }
 0xe02   :  { %9209 = vmatpush3.bf16.xpose.msra.mxu0 %v5132_v12  ;;  %9210 = vmatprep.mubr.msk.bf16.mxu0 %vm10063_vm1, %v12214_v56 }
 0xe03   :  { %9220 = vmatprep.subr.bf16.mxu0 %v12214_v56 }
 0xe05   :  { %v5327_v20 = vpop.permute.xlu0 %5326 }
 0xe06   :  { %v5332_v21 = vsel %vm598_vm2, %v5327_v20, 0 }
 0xe09   :  { %9211 = vmatmul.mubr.msk.bf16.vlgmr.msra.gmra.mrb[164].mxu0 %vm598_vm2, %v5125_v41  ;;  %v5325_v3 = vpop.permute.xlu0 %5324 }
 0xe0a   :  { %9221 = vmatpush3.bf16.xpose.msra.mxu0 %v5232_v26  ;;  %9222 = vmatprep.mubr.msk.bf16.mxu0 %vm10063_vm1, %v12214_v56 }
 0xe0b   :  { %9232 = vmatprep.subr.bf16.mxu0 %v12214_v56 }
 0xe0d   :  { %v5427_v44 = vpop.permute.xlu0 %5426 }
 0xe0e   :  { %v5432_v17 = vsel %vm598_vm2, %v5427_v44, 0 }
 0xe11   :  { %9223 = vmatmul.mubr.msk.bf16.vlgmr.msra.gmra.mrb[168].mxu0 %vm598_vm2, %v5225_v25  ;;  %v5425_v58 = vpop.permute.xlu0 %5424 }
 0xe12   :  { %9233 = vmatpush3.bf16.xpose.msra.mxu0 %v5332_v21  ;;  %9234 = vmatprep.mubr.msk.bf16.mxu0 %vm10063_vm1, %v12214_v56 }
 0xe13   :  { %9244 = vmatprep.subr.bf16.mxu0 %v12214_v56 }
 0xe15   :  { %v5621_v57 = vpop.permute.xlu0 %5620 }
 0xe16   :  { %v5626_v50 = vsel %vm1066_vm3, %v5621_v57, 0 }
 0xe19   :  { %9235 = vmatmul.mubr.msk.bf16.vlgmr.msra.gmra.mrb[172].mxu0 %vm598_vm2, %v5325_v3 }
 0xe1a   :  { %9245 = vmatpush3.bf16.xpose.msra.mxu0 %v5432_v17  ;;  %9246 = vmatprep.mubr.msk.bf16.mxu0 %vm10063_vm1, %v12214_v56 }
 0xe1b   :  { %9256 = vmatprep.subr.bf16.mxu0 %v12214_v56 }
 0xe21   :  { %9247 = vmatmul.mubr.msk.bf16.vlgmr.msra.gmra.mrb[176].mxu0 %vm598_vm2, %v5425_v58 }
 0xe22   :  { %9257 = vmatpush3.bf16.msra.mxu0 %v5626_v50  ;;  %v4674_v41 = vpop.xlane.xlu1 %4673  ;;  %9258 = vmatprep.mubr.msk.bf16.mxu0 %vm10063_vm1, %v12214_v56 }
 0xe23   :  { %9749 = vrcp.f32 %v4674_v41  ;;  %9268 = vmatprep.subr.bf16.mxu0 %v12214_v56 }
 0xe26   :  { %v5175_v19 = vpop.permute.xlu1 %5174 }
 0xe2a   :  { %v5277_v28 = vpop.permute.xlu1 %5276 }
 0xe2b   :  { %v5282_v25 = vsel %vm598_vm2, %v5277_v28, 0 }
 0xe2d   :  { %v9750_v36 = vpop.eup %9749 }
 0xe2e   :  { %v4690_v18 = vmul.f32 %v9750_v36, %v11331_v30  ;;  %v5275_v42 = vpop.permute.xlu1 %5274 }
 0xe30   :  { %v4698_v8 = vpack.c.bf16 %v4690_v18, %v4690_v18 }
 0xe32   :  { %9205 = vmatmul.mubr.msk.bf16.vlgmr.msra.gmra.mrb[176].mxu1 %vm598_vm2, %v4698_v8  ;;  %v5377_v12 = vpop.permute.xlu1 %5376 }
 0xe33   :  { %9215 = vmatpush3.bf16.xpose.msra.mxu1 %v5182_v27  ;;  %9216 = vmatprep.mubr.msk.bf16.mxu1 %vm10063_vm1, %v12214_v56  ;;  %v5382_v20 = vsel %vm598_vm2, %v5377_v12, 0 }
 0xe34   :  { %9226 = vmatprep.subr.bf16.mxu1 %v12214_v56 }
 0xe36   :  { %v5375_v30 = vpop.permute.xlu1 %5374 }
 0xe3a   :  { %9217 = vmatmul.mubr.msk.bf16.vlgmr.msra.gmra.mrb[180].mxu1 %vm598_vm2, %v5175_v19  ;;  %v5477_v26 = vpop.permute.xlu1 %5476 }
 0xe3b   :  { %9227 = vmatpush3.bf16.xpose.msra.mxu1 %v5282_v25  ;;  %9228 = vmatprep.mubr.msk.bf16.mxu1 %vm10063_vm1, %v12214_v56  ;;  %v5482_v21 = vsel %vm598_vm2, %v5477_v26, 0 }
 0xe3c   :  { %9238 = vmatprep.subr.bf16.mxu1 %v12214_v56 }
 0xe3e   :  { %v5475_v3 = vpop.permute.xlu1 %5474 }
 0xe42   :  { %9229 = vmatmul.mubr.msk.bf16.vlgmr.msra.gmra.mrb[184].mxu1 %vm598_vm2, %v5275_v42  ;;  %v5669_v44 = vpop.permute.xlu1 %5668 }
 0xe43   :  { %9239 = vmatpush3.bf16.xpose.msra.mxu1 %v5382_v20  ;;  %9240 = vmatprep.mubr.msk.bf16.mxu1 %vm10063_vm1, %v12214_v56  ;;  %v5674_v58 = vsel %vm1066_vm3, %v5669_v44, 0 }
 0xe44   :  { %9250 = vmatprep.subr.bf16.mxu1 %v12214_v56 }
 0xe4a   :  { %9241 = vmatmul.mubr.msk.bf16.vlgmr.msra.gmra.mrb[188].mxu1 %vm598_vm2, %v5375_v30 }
 0xe4b   :  { %9251 = vmatpush3.bf16.xpose.msra.mxu1 %v5482_v21  ;;  %9252 = vmatprep.mubr.msk.bf16.mxu1 %vm10063_vm1, %v12214_v56 }
 0xe4c   :  { %9262 = vmatprep.subr.bf16.mxu1 %v12214_v56 }
 0xe52   :  { %9253 = vmatmul.mubr.msk.bf16.vlgmr.msra.gmra.mrb[192].mxu1 %vm598_vm2, %v5475_v3 }
 0xe53   :  { %9263 = vmatpush3.bf16.msra.mxu1 %v5674_v58  ;;  %9264 = vmatprep.mubr.msk.bf16.mxu1 %vm10063_vm1, %v12214_v56 }
 0xe54   :  { %9274 = vmatprep.subr.bf16.mxu1 %v12214_v56 }
 0xe62   :  { %v11446_v17 = vpop.f32.mrb[148].mxu0 }
 0xe63   :  { %v9164_v31 = vpop.f32.mrb[149].mxu0 }
 0xe64   :  { %v4744_v57 = vpop.f32.mrb[150].mxu0 }
 0xe65   :  { %v9165_v50 = vpop.f32.mrb[151].mxu0 }
 0xe6a   :  { %v11448_v41 = vpop.f32.mrb[152].mxu0 }
 0xe6b   :  { %v9176_v19 = vpop.f32.mrb[153].mxu0 }
 0xe6c   :  { %v4840_v28 = vpop.f32.mrb[154].mxu0 }
 0xe6d   :  { %v9177_v36 = vpop.f32.mrb[155].mxu0 }
 0xe93   :  { %v11450_v18 = vpop.f32.mrb[164].mxu1 }
 0xe94   :  { %12215 = vst [vmem:[#allocation32_spill] sm:$0xff] %v11450_v18  ;;  %v9170_v8 = vpop.f32.mrb[165].mxu1 }
 0xe95   :  { %v4792_v42 = vpop.f32.mrb[166].mxu1 }
 0xe96   :  { %v9171_v27 = vpop.f32.mrb[167].mxu1 }
 0xe9b   :  { %v11452_v12 = vpop.f32.mrb[168].mxu1 }
 0xe9c   :  { %12216 = vst [vmem:[#allocation33_spill] sm:$0xff] %v11452_v12  ;;  %v9182_v25 = vpop.f32.mrb[169].mxu1 }
 0xe9d   :  { %v4888_v30 = vpop.f32.mrb[170].mxu1 }
 0xe9e   :  { %v9183_v20 = vpop.f32.mrb[171].mxu1 }
 0xe9f   :  { %v11454_v26 = vpop.f32.mrb[156].mxu0 }
 0xea0   :  { %12217 = vst [vmem:[#allocation34_spill] sm:$0xff] %v11454_v26  ;;  %v9188_v3 = vpop.f32.mrb[157].mxu0 }
 0xea1   :  { %v4936_v21 = vpop.f32.mrb[158].mxu0 }
 0xea2   :  { %v9189_v44 = vpop.f32.mrb[159].mxu0 }
 0xed0   :  { %v11456_v58 = vpop.f32.mrb[172].mxu1 }
 0xed1   :  { %12218 = vst [vmem:[#allocation35_spill] sm:$0xff] %v11456_v58  ;;  %v9194_v31 = vpop.f32.mrb[173].mxu1 }
 0xed2   :  { %v4984_v57 = vpop.f32.mrb[174].mxu1 }
 0xed3   :  { %v9195_v50 = vpop.f32.mrb[175].mxu1 }
 0xed4   :  { %v11458_v19 = vpop.f32.mrb[160].mxu0 }
 0xed5   :  { %12219 = vst [vmem:[#allocation36_spill] sm:$0xff] %v11458_v19  ;;  %v9200_v28 = vpop.f32.mrb[161].mxu0 }
 0xed6   :  { %v5032_v36 = vpop.f32.mrb[162].mxu0 }
 0xed7   :  { %v9201_v8 = vpop.f32.mrb[163].mxu0 }
 0xedc   :  { %v5168_v42 = vpop.f32.mrb[164].mxu0 }
 0xedd   :  { %v9212_v27 = vpop.f32.mrb[165].mxu0  ;;  %v5524_v25 = vsel %vm598_vm2, %v5168_v42, -inf }
 0xede   :  { %5525 = vmax.xlane.f32.xlu0 %v5524_v25  ;;  %v5171_v30 = vpop.f32.mrb[166].mxu0 }
 0xedf   :  { %v9213_v20 = vpop.f32.mrb[167].mxu0 }
 0xee4   :  { %v5268_v3 = vpop.f32.mrb[168].mxu0 }
 0xee5   :  { %v9224_v21 = vpop.f32.mrb[169].mxu0  ;;  %v5530_v44 = vsel %vm598_vm2, %v5268_v3, -inf }
 0xee6   :  { %5531 = vmax.xlane.f32.xlu0 %v5530_v44  ;;  %v5271_v31 = vpop.f32.mrb[170].mxu0 }
 0xee7   :  { %v9225_v57 = vpop.f32.mrb[171].mxu0 }
 0xeec   :  { %v11462_v50 = vpop.f32.mrb[172].mxu0 }
 0xeed   :  { %v9236_v58 = vpop.f32.mrb[173].mxu0 }
 0xeee   :  { %v5371_v28 = vpop.f32.mrb[174].mxu0 }
 0xeef   :  { %v9237_v36 = vpop.f32.mrb[175].mxu0 }
 0xef4   :  { %v11464_v8 = vpop.f32.mrb[176].mxu0 }
 0xef5   :  { %v9248_v27 = vpop.f32.mrb[177].mxu0 }
 0xef6   :  { %v5471_v12 = vpop.f32.mrb[178].mxu0 }
 0xef7   :  { %v9249_v18 = vpop.f32.mrb[179].mxu0 }
 0xef8   :  { %v5536_v18 = vsel %vm598_vm2, %v11462_v50, -inf }
 0xf05   :  { %v11466_v25 = vpop.f32.mrb[176].mxu1 }
 0xf06   :  { %12220 = vst [vmem:[#allocation37_spill] sm:$0xff] %v11466_v25  ;;  %v9206_v30 = vpop.f32.mrb[177].mxu1 }
 0xf07   :  { %v5080_v20 = vpop.f32.mrb[178].mxu1 }
 0xf08   :  { %v9207_v21 = vpop.f32.mrb[179].mxu1 }
 0xf0d   :  { %v5218_v19 = vpop.f32.mrb[180].mxu1 }
 0xf0e   :  { %v9218_v23 = vpop.f32.mrb[181].mxu1  ;;  %v5527_v44 = vsel %vm598_vm2, %v5218_v19, -inf }
 0xf0f   :  { %5528 = vmax.xlane.f32.xlu1 %v5527_v44  ;;  %v5221_v31 = vpop.f32.mrb[182].mxu1  ;;  %v5542_v23 = vsel %vm598_vm2, %v11464_v8, -inf }
 0xf10   :  { %v9219_v57 = vpop.f32.mrb[183].mxu1 }
 0xf15   :  { %v5318_v58 = vpop.f32.mrb[184].mxu1 }
 0xf16   :  { %v9230_v28 = vpop.f32.mrb[185].mxu1  ;;  %v5533_v36 = vsel %vm598_vm2, %v5318_v58, -inf }
 0xf17   :  { %5534 = vmax.xlane.f32.xlu0 %v5533_v36  ;;  %v5321_v27 = vpop.f32.mrb[186].mxu1 }
 0xf18   :  { %v9231_v12 = vpop.f32.mrb[187].mxu1 }
 0xf1b   :  { %5537 = vmax.xlane.f32.xlu0 %v5536_v18 }
 0xf1d   :  { %v5418_v30 = vpop.f32.mrb[188].mxu1 }
 0xf1e   :  { %v9242_v20 = vpop.f32.mrb[189].mxu1  ;;  %v5539_v21 = vsel %vm598_vm2, %v5418_v30, -inf }
 0xf1f   :  { %5543 = vmax.xlane.f32.xlu0 %v5542_v23  ;;  %5540 = vmax.xlane.f32.xlu1 %v5539_v21  ;;  %v5421_v44 = vpop.f32.mrb[190].mxu1 }
 0xf20   :  { %v9243_v31 = vpop.f32.mrb[191].mxu1 }
 0xf25   :  { %v11475_v57 = vpop.f32.mrb[192].mxu1 }
 0xf26   :  { %v9254_v28 = vpop.f32.mrb[193].mxu1  ;;  %v5545_v12 = vsel %vm598_vm2, %v11475_v57, -inf }
 0xf27   :  { %v5521_v36 = vpop.f32.mrb[194].mxu1 }
 0xf28   :  { %v9255_v27 = vpop.f32.mrb[195].mxu1 }
 0xf30   :  { %5860 = vrot.lane.b32.xlu1 %v10543_v15, %s10068_s26 }
 0xf35   :  { %5812 = vrot.lane.b32.xlu0 %v10517_v39, %s10068_s26 }
 0xf54   :  { %5546 = vmax.xlane.f32.xlu1 %v5545_v12  ;;  %v5717_v12 = vpop.permute.xlu1 %5716 }
 0xf6b   :  { %v5526_v18 = vpop.xlane.xlu0 %5525 }
 0xf6c   :  { %v5548_v20 = vsub.f32 %v5168_v42, %v5526_v18  ;;  %v11491_v42 = vpop.permute.xlu1 %5764 }
 0xf6e   :  { %v5556_v23 = vmul.f32 1.442695, %v5548_v20 }
 0xf70   :  { %9751 = vpow2.f32 %v5556_v23 }
 0xf73   :  { %v5532_v21 = vpop.xlane.xlu0 %5531 }
 0xf74   :  { %v5550_v44 = vsub.f32 %v5268_v3, %v5532_v21 }
 0xf76   :  { %v5560_v31 = vmul.f32 1.442695, %v5550_v44 }
 0xf78   :  { %9753 = vpow2.f32 %v5560_v31 }
 0xf7a   :  { %v11483_v28 = vpop.eup %9751 }
 0xf7b   :  { %v5572_v36 = vsel %vm598_vm2, %v11483_v28, 0.0 }
 0xf7c   :  { %5573 = vadd.xlane.f32.xlu0 %v5572_v36 }
 0xf82   :  { %v11487_v27 = vpop.eup %9753 }
 0xf83   :  { %v5578_v25 = vsel %vm598_vm2, %v11487_v27, 0.0 }
 0xf84   :  { %5579 = vadd.xlane.f32.xlu0 %v5578_v25 }
 0xf9c   :  { %v5529_v18 = vpop.xlane.xlu1 %5528 }
 0xf9d   :  { %v5549_v20 = vsub.f32 %v5218_v19, %v5529_v18 }
 0xf9f   :  { %v5558_v3 = vmul.f32 1.442695, %v5549_v20 }
 0xfa1   :  { %9755 = vpow2.f32 %v5558_v3 }
 0xfa4   :  { %v5535_v23 = vpop.xlane.xlu0 %5534 }
 0xfa5   :  { %v5551_v21 = vsub.f32 %v5318_v58, %v5535_v23 }
 0xfa7   :  { %v5562_v44 = vmul.f32 1.442695, %v5551_v21 }
 0xfa8   :  { %v5538_v31 = vpop.xlane.xlu0 %5537 }
 0xfa9   :  { %9757 = vpow2.f32 %v5562_v44  ;;  %v5552_v36 = vsub.f32 %v11462_v50, %v5538_v31 }
 0xfab   :  { %v11494_v26 = vpop.eup %9755  ;;  %v5564_v1 = vmul.f32 1.442695, %v5552_v36 }
 0xfac   :  { %v5575_v25 = vsel %vm598_vm2, %v11494_v26, 0.0  ;;  %v5544_v20 = vpop.xlane.xlu0 %5543 }
 0xfad   :  { %9759 = vpow2.f32 %v5564_v1  ;;  %5576 = vadd.xlane.f32.xlu1 %v5575_v25  ;;  %v5541_v1 = vpop.xlane.xlu1 %5540  ;;  %v5554_v3 = vsub.f32 %v11464_v8, %v5544_v20 }
 0xfae   :  { %v5553_v50 = vsub.f32 %v5418_v30, %v5541_v1 }
 0xfaf   :  { %v5568_v21 = vmul.f32 1.442695, %v5554_v3 }
 0xfb0   :  { %v5566_v23 = vmul.f32 1.442695, %v5553_v50  ;;  %v5813_v30 = vpop.permute.xlu0 %5812 }
 0xfb1   :  { %v11521_v8 = vpop.permute.xlu1 %5860 }
 0xfb2   :  { %9761 = vpow2.f32 %v5566_v23 }
 0xfb3   :  { %v11498_v55 = vpop.eup %9757  ;;  %9763 = vpow2.f32 %v5568_v21 }
 0xfb4   :  { %v5581_v19 = vsel %vm598_vm2, %v11498_v55, 0.0 }
 0xfb5   :  { %5582 = vadd.xlane.f32.xlu1 %v5581_v19 }
 0xfb7   :  { %v11502_v58 = vpop.eup %9759 }
 0xfb8   :  { %v5584_v18 = vsel %vm598_vm2, %v11502_v58, 0.0 }
 0xfb9   :  { %5585 = vadd.xlane.f32.xlu0 %v5584_v18 }
 0xfbc   :  { %v11511_v44 = vpop.eup %9761 }
 0xfbd   :  { %v5587_v31 = vsel %vm598_vm2, %v11511_v44, 0.0  ;;  %v11515_v36 = vpop.eup %9763 }
 0xfbe   :  { %v5590_v25 = vsel %vm598_vm2, %v11515_v36, 0.0 }
 0xfc6   :  { %5956 = vrot.lane.b32.xlu1 %v10575_v47, %s10068_s26 }
 0xfcf   :  { %5908 = vrot.lane.b32.xlu0 %v10538_v54, %s10068_s26 }
 0xfe1   :  { %v5547_v19 = vpop.xlane.xlu1 %5546 }
 0xfe2   :  { %v5555_v18 = vsub.f32 %v11475_v57, %v5547_v19  ;;  %v5722_v57 = vsel %vm1066_vm3, %v5717_v12, 0 }
 0xfe4   :  { %v5570_v50 = vmul.f32 1.442695, %v5555_v18  ;;  %v5818_v18 = vsel %vm1066_vm3, %v5813_v30, 0 }
 0xfea   :  { %5588 = vadd.xlane.f32.xlu1 %v5587_v31 }
 0xfee   :  { %5591 = vadd.xlane.f32.xlu0 %v5590_v25 }
 0xffb   :  { %6097 = vrot.lane.b32.xlu1 %v10310_v46, %s10069_s28 }
0x1004   :  { %6047 = vrot.lane.b32.xlu0 %v10299_v38, %s10069_s28 }
0x1008   :  { %6045 = vrot.lane.b32.xlu0 %v10315_v51, %s10069_s28 }
0x1009   :  { %v5574_v1 = vpop.xlane.xlu0 %5573 }
0x100a   :  { %9765 = vrcp.f32 %v5574_v1 }
0x100b   :  { %9767 = vpow2.f32 %v5570_v50 }
0x100c   :  { %6147 = vrot.lane.b32.xlu0 %v10292_v35, %s10069_s28 }
0x1010   :  { %6145 = vrot.lane.b32.xlu0 %v10313_v49, %s10069_s28 }
0x1011   :  { %v5580_v20 = vpop.xlane.xlu0 %5579 }
0x1012   :  { %9769 = vrcp.f32 %v5580_v20 }
0x1014   :  { %v9766_v3 = vpop.eup %9765  ;;  %6247 = vrot.lane.b32.xlu0 %v10318_v53, %s10069_s28 }
0x1015   :  { %v5604_v23 = vmul.f32 %v9766_v3, %v11483_v28  ;;  %v11541_v31 = vpop.eup %9767 }
0x1016   :  { %v5593_v19 = vsel %vm598_vm2, %v11541_v31, 0.0 }
0x1017   :  { %v5612_v21 = vpack.c.bf16 %v5604_v23, %v5604_v23  ;;  %v5770_v23 = vsel %vm1066_vm3, %v11491_v42, 0  ;;  %v5866_v42 = vsel %vm1066_vm3, %v11521_v8, 0 }
0x1018   :  { %6245 = vrot.lane.b32.xlu0 %v10343_v62, %s10069_s28 }
0x1019   :  { %9259 = vmatmul.mubr.msk.bf16.vlgmr.msra.gmra.mrb[180].mxu0 %vm598_vm2, %v5612_v21 }
0x101a   :  { %9269 = vmatpush3.bf16.msra.mxu0 %v5722_v57  ;;  %9270 = vmatprep.mubr.msk.bf16.mxu0 %vm10063_vm1, %v12214_v56 }
0x101b   :  { %9280 = vmatprep.subr.bf16.mxu0 %v12214_v56 }
0x101c   :  { %v9770_v25 = vpop.eup %9769  ;;  %6347 = vrot.lane.b32.xlu0 %v10333_v59, %s10069_s28 }
0x101d   :  { %v5606_v28 = vmul.f32 %v9770_v25, %v11487_v27 }
0x101f   :  { %5594 = vadd.xlane.f32.xlu1 %v5593_v19  ;;  %v5614_v12 = vpack.c.bf16 %v5606_v28, %v5606_v28 }
0x1020   :  { %6345 = vrot.lane.b32.xlu0 %v10366_v6, %s10069_s28 }
0x1021   :  { %9271 = vmatmul.mubr.msk.bf16.vlgmr.msra.gmra.mrb[184].mxu0 %vm598_vm2, %v5614_v12 }
0x1022   :  { %9281 = vmatpush3.bf16.msra.mxu0 %v5818_v18  ;;  %9282 = vmatprep.mubr.msk.bf16.mxu0 %vm10063_vm1, %v12214_v56 }
0x1023   :  { %9292 = vmatprep.subr.bf16.mxu0 %v12214_v56 }
0x1024   :  { %6541 = vrot.lane.b32.xlu0 %v10413_v33, %s10069_s28 }
0x1030   :  { %6095 = vrot.lane.b32.xlu1 %v10341_v61, %s10069_s28 }
0x1034   :  { %6197 = vrot.lane.b32.xlu1 %v10339_v60, %s10069_s28 }
0x1038   :  { %6195 = vrot.lane.b32.xlu1 %v10364_v5, %s10069_s28 }
0x103a   :  { %v5577_v27 = vpop.xlane.xlu1 %5576 }
0x103b   :  { %9771 = vrcp.f32 %v5577_v27 }
0x103c   :  { %6297 = vrot.lane.b32.xlu1 %v10356_v4, %s10069_s28 }
0x1040   :  { %6295 = vrot.lane.b32.xlu1 %v10384_v11, %s10069_s28 }
0x1042   :  { %v5583_v30 = vpop.xlane.xlu1 %5582 }
0x1043   :  { %9773 = vrcp.f32 %v5583_v30 }
0x1044   :  { %6397 = vrot.lane.b32.xlu1 %v10379_v10, %s10069_s28 }
0x1045   :  { %v9772_v1 = vpop.eup %9771 }
0x1046   :  { %v5586_v50 = vpop.xlane.xlu0 %5585  ;;  %v5605_v20 = vmul.f32 %v9772_v1, %v11494_v26 }
0x1047   :  { %9775 = vrcp.f32 %v5586_v50 }
0x1048   :  { %6395 = vrot.lane.b32.xlu1 %v10395_v14, %s10069_s28  ;;  %v5613_v3 = vpack.c.bf16 %v5605_v20, %v5605_v20 }
0x104a   :  { %9265 = vmatmul.mubr.msk.bf16.vlgmr.msra.gmra.mrb[196].mxu1 %vm598_vm2, %v5613_v3  ;;  %v5909_v19 = vpop.permute.xlu0 %5908 }
0x104b   :  { %9275 = vmatpush3.bf16.msra.mxu1 %v5770_v23  ;;  %9276 = vmatprep.mubr.msk.bf16.mxu1 %vm10063_vm1, %v12214_v56  ;;  %v5914_v12 = vsel %vm1066_vm3, %v5909_v19, 0 }
0x104c   :  { %6589 = vrot.lane.b32.xlu1 %v10415_v34, %s10069_s28  ;;  %9286 = vmatprep.subr.bf16.mxu1 %v12214_v56 }
0x104d   :  { %v9774_v26 = vpop.eup %9773 }
0x104e   :  { %v5607_v21 = vmul.f32 %v9774_v26, %v11498_v55 }
0x1050   :  { %6637 = vrot.lane.b32.xlu1 %v10497_v48, %s10069_s28  ;;  %v5615_v57 = vpack.c.bf16 %v5607_v21, %v5607_v21 }
0x1051   :  { %v9776_v25 = vpop.eup %9775 }
0x1052   :  { %9277 = vmatmul.mubr.msk.bf16.vlgmr.msra.gmra.mrb[200].mxu1 %vm598_vm2, %v5615_v57  ;;  %v5608_v28 = vmul.f32 %v9776_v25, %v11502_v58  ;;  %v5957_v58 = vpop.permute.xlu1 %5956 }
0x1053   :  { %9287 = vmatpush3.bf16.msra.mxu1 %v5866_v42  ;;  %9288 = vmatprep.mubr.msk.bf16.mxu1 %vm10063_vm1, %v12214_v56  ;;  %v5962_v23 = vsel %vm1066_vm3, %v5957_v58, 0 }
0x1054   :  { %6685 = vrot.lane.b32.xlu1 %v10513_v2, %s10069_s28  ;;  %v5616_v55 = vpack.c.bf16 %v5608_v28, %v5608_v28  ;;  %9298 = vmatprep.subr.bf16.mxu1 %v12214_v56 }
0x1056   :  { %9283 = vmatmul.mubr.msk.bf16.vlgmr.msra.gmra.mrb[188].mxu0 %vm598_vm2, %v5616_v55 }
0x1057   :  { %9293 = vmatpush3.bf16.msra.mxu0 %v5914_v12  ;;  %9294 = vmatprep.mubr.msk.bf16.mxu0 %vm10063_vm1, %v12214_v56 }
0x1058   :  { %9304 = vmatprep.subr.bf16.mxu0 %v12214_v56 }
0x1077   :  { %v5589_v8 = vpop.xlane.xlu1 %5588 }
0x1078   :  { %9777 = vrcp.f32 %v5589_v8 }
0x107b   :  { %v5592_v18 = vpop.xlane.xlu0 %5591  ;;  %v6098_v8 = vpop.permute.xlu1 %6097 }
0x107c   :  { %9779 = vrcp.f32 %v5592_v18 }
0x107f   :  { %v6048_v27 = vpop.permute.xlu0 %6047 }
0x1080   :  { %v6053_v25 = vsel %vm598_vm2, %v6048_v27, 0 }
0x1082   :  { %v9778_v30 = vpop.eup %9777 }
0x1083   :  { %v6046_v1 = vpop.permute.xlu0 %6045  ;;  %v5609_v50 = vmul.f32 %v9778_v30, %v11511_v44 }
0x1085   :  { %v5617_v20 = vpack.c.bf16 %v5609_v50, %v5609_v50 }
0x1086   :  { %v9780_v3 = vpop.eup %9779 }
0x1087   :  { %v6148_v26 = vpop.permute.xlu0 %6147  ;;  %9289 = vmatmul.mubr.msk.bf16.vlgmr.msra.gmra.mrb[204].mxu1 %vm598_vm2, %v5617_v20  ;;  %v5610_v21 = vmul.f32 %v9780_v3, %v11515_v36 }
0x1088   :  { %9299 = vmatpush3.bf16.msra.mxu1 %v5962_v23  ;;  %9300 = vmatprep.mubr.msk.bf16.mxu1 %vm10063_vm1, %v12214_v56  ;;  %v6153_v36 = vsel %vm598_vm2, %v6148_v26, 0 }
0x1089   :  { %v5618_v57 = vpack.c.bf16 %v5610_v21, %v5610_v21  ;;  %9310 = vmatprep.subr.bf16.mxu1 %v12214_v56  ;;  %v6103_v21 = vsel %vm598_vm2, %v6098_v8, 0 }
0x108b   :  { %9295 = vmatmul.mubr.msk.bf16.vlgmr.msra.gmra.mrb[192].mxu0 %vm598_vm2, %v5618_v57  ;;  %v6146_v44 = vpop.permute.xlu0 %6145 }
0x108c   :  { %9305 = vmatpush3.bf16.xpose.msra.mxu0 %v6053_v25  ;;  %9306 = vmatprep.mubr.msk.bf16.mxu0 %vm10063_vm1, %v12214_v56 }
0x108d   :  { %9316 = vmatprep.subr.bf16.mxu0 %v12214_v56 }
0x108f   :  { %v6248_v42 = vpop.permute.xlu0 %6247 }
0x1090   :  { %v6253_v19 = vsel %vm598_vm2, %v6248_v42, 0 }
0x1093   :  { %9307 = vmatmul.mubr.msk.bf16.vlgmr.msra.gmra.mrb[196].mxu0 %vm598_vm2, %v6046_v1  ;;  %v6246_v28 = vpop.permute.xlu0 %6245 }
0x1094   :  { %9317 = vmatpush3.bf16.xpose.msra.mxu0 %v6153_v36  ;;  %9318 = vmatprep.mubr.msk.bf16.mxu0 %vm10063_vm1, %v12214_v56 }
0x1095   :  { %9328 = vmatprep.subr.bf16.mxu0 %v12214_v56 }
0x1097   :  { %v6348_v55 = vpop.permute.xlu0 %6347 }
0x1098   :  { %v6353_v58 = vsel %vm598_vm2, %v6348_v55, 0 }
0x109b   :  { %9319 = vmatmul.mubr.msk.bf16.vlgmr.msra.gmra.mrb[200].mxu0 %vm598_vm2, %v6146_v44  ;;  %v6346_v12 = vpop.permute.xlu0 %6345 }
0x109c   :  { %9329 = vmatpush3.bf16.xpose.msra.mxu0 %v6253_v19  ;;  %9330 = vmatprep.mubr.msk.bf16.mxu0 %vm10063_vm1, %v12214_v56 }
0x109d   :  { %9340 = vmatprep.subr.bf16.mxu0 %v12214_v56 }
0x109f   :  { %v6542_v18 = vpop.permute.xlu0 %6541 }
0x10a0   :  { %v6547_v27 = vsel %vm1066_vm3, %v6542_v18, 0 }
0x10a3   :  { %9331 = vmatmul.mubr.msk.bf16.vlgmr.msra.gmra.mrb[204].mxu0 %vm598_vm2, %v6246_v28 }
0x10a4   :  { %9341 = vmatpush3.bf16.xpose.msra.mxu0 %v6353_v58  ;;  %9342 = vmatprep.mubr.msk.bf16.mxu0 %vm10063_vm1, %v12214_v56 }
0x10a5   :  { %9352 = vmatprep.subr.bf16.mxu0 %v12214_v56 }
0x10ab   :  { %9343 = vmatmul.mubr.msk.bf16.vlgmr.msra.gmra.mrb[208].mxu0 %vm598_vm2, %v6346_v12 }
0x10ac   :  { %9353 = vmatpush3.bf16.msra.mxu0 %v6547_v27  ;;  %v5595_v30 = vpop.xlane.xlu1 %5594  ;;  %9354 = vmatprep.mubr.msk.bf16.mxu0 %vm10063_vm1, %v12214_v56 }
0x10ad   :  { %9781 = vrcp.f32 %v5595_v30  ;;  %9364 = vmatprep.subr.bf16.mxu0 %v12214_v56 }
0x10b0   :  { %v6096_v1 = vpop.permute.xlu1 %6095 }
0x10b4   :  { %v6198_v50 = vpop.permute.xlu1 %6197 }
0x10b5   :  { %v6203_v25 = vsel %vm598_vm2, %v6198_v50, 0 }
0x10b7   :  { %v9782_v20 = vpop.eup %9781 }
0x10b8   :  { %v5611_v3 = vmul.f32 %v9782_v20, %v11541_v31  ;;  %v6196_v26 = vpop.permute.xlu1 %6195 }
0x10ba   :  { %v5619_v23 = vpack.c.bf16 %v5611_v3, %v5611_v3 }
0x10bc   :  { %9301 = vmatmul.mubr.msk.bf16.vlgmr.msra.gmra.mrb[208].mxu1 %vm598_vm2, %v5619_v23  ;;  %v6298_v57 = vpop.permute.xlu1 %6297 }
0x10bd   :  { %9311 = vmatpush3.bf16.xpose.msra.mxu1 %v6103_v21  ;;  %9312 = vmatprep.mubr.msk.bf16.mxu1 %vm10063_vm1, %v12214_v56  ;;  %v6303_v44 = vsel %vm598_vm2, %v6298_v57, 0 }
0x10be   :  { %9322 = vmatprep.subr.bf16.mxu1 %v12214_v56 }
0x10c0   :  { %v6296_v31 = vpop.permute.xlu1 %6295 }
0x10c4   :  { %9313 = vmatmul.mubr.msk.bf16.vlgmr.msra.gmra.mrb[212].mxu1 %vm598_vm2, %v6096_v1  ;;  %v6398_v42 = vpop.permute.xlu1 %6397 }
0x10c5   :  { %9323 = vmatpush3.bf16.xpose.msra.mxu1 %v6203_v25  ;;  %9324 = vmatprep.mubr.msk.bf16.mxu1 %vm10063_vm1, %v12214_v56  ;;  %v6403_v28 = vsel %vm598_vm2, %v6398_v42, 0 }
0x10c6   :  { %9334 = vmatprep.subr.bf16.mxu1 %v12214_v56 }
0x10c8   :  { %v6396_v36 = vpop.permute.xlu1 %6395 }
0x10cc   :  { %9325 = vmatmul.mubr.msk.bf16.vlgmr.msra.gmra.mrb[216].mxu1 %vm598_vm2, %v6196_v26  ;;  %v6590_v19 = vpop.permute.xlu1 %6589 }
0x10cd   :  { %9335 = vmatpush3.bf16.xpose.msra.mxu1 %v6303_v44  ;;  %9336 = vmatprep.mubr.msk.bf16.mxu1 %vm10063_vm1, %v12214_v56  ;;  %v6595_v55 = vsel %vm1066_vm3, %v6590_v19, 0 }
0x10ce   :  { %9346 = vmatprep.subr.bf16.mxu1 %v12214_v56 }
0x10d4   :  { %9337 = vmatmul.mubr.msk.bf16.vlgmr.msra.gmra.mrb[220].mxu1 %vm598_vm2, %v6296_v31 }
0x10d5   :  { %9347 = vmatpush3.bf16.xpose.msra.mxu1 %v6403_v28  ;;  %9348 = vmatprep.mubr.msk.bf16.mxu1 %vm10063_vm1, %v12214_v56 }
0x10d6   :  { %9358 = vmatprep.subr.bf16.mxu1 %v12214_v56 }
0x10dc   :  { %9349 = vmatmul.mubr.msk.bf16.vlgmr.msra.gmra.mrb[224].mxu1 %vm598_vm2, %v6396_v36 }
0x10dd   :  { %9359 = vmatpush3.bf16.msra.mxu1 %v6595_v55  ;;  %9360 = vmatprep.mubr.msk.bf16.mxu1 %vm10063_vm1, %v12214_v56 }
0x10de   :  { %9370 = vmatprep.subr.bf16.mxu1 %v12214_v56 }
0x10ec   :  { %v11656_v12 = vpop.f32.mrb[180].mxu0 }
0x10ed   :  { %v9260_v58 = vpop.f32.mrb[181].mxu0 }
0x10ee   :  { %v5665_v8 = vpop.f32.mrb[182].mxu0 }
0x10ef   :  { %v9261_v18 = vpop.f32.mrb[183].mxu0 }
0x10f4   :  { %v11658_v27 = vpop.f32.mrb[184].mxu0 }
0x10f5   :  { %v9272_v30 = vpop.f32.mrb[185].mxu0 }
0x10f6   :  { %v5761_v1 = vpop.f32.mrb[186].mxu0 }
0x10f7   :  { %v9273_v50 = vpop.f32.mrb[187].mxu0 }
0x111d   :  { %v11660_v20 = vpop.f32.mrb[196].mxu1 }
0x111e   :  { %12221 = vst [vmem:[#allocation38_spill] sm:$0xff] %v11660_v20  ;;  %v9266_v3 = vpop.f32.mrb[197].mxu1 }
0x111f   :  { %v5713_v23 = vpop.f32.mrb[198].mxu1 }
0x1120   :  { %v9267_v26 = vpop.f32.mrb[199].mxu1 }
0x1125   :  { %v11662_v21 = vpop.f32.mrb[200].mxu1 }
0x1126   :  { %12222 = vst [vmem:[#allocation39_spill] sm:$0xff] %v11662_v21  ;;  %v9278_v57 = vpop.f32.mrb[201].mxu1 }
0x1127   :  { %v5809_v25 = vpop.f32.mrb[202].mxu1 }
0x1128   :  { %v9279_v31 = vpop.f32.mrb[203].mxu1 }
0x1129   :  { %v11664_v44 = vpop.f32.mrb[188].mxu0 }
0x112a   :  { %12223 = vst [vmem:[#allocation40_spill] sm:$0xff] %v11664_v44  ;;  %v9284_v42 = vpop.f32.mrb[189].mxu0 }
0x112b   :  { %v5857_v36 = vpop.f32.mrb[190].mxu0 }
0x112c   :  { %v9285_v28 = vpop.f32.mrb[191].mxu0 }
0x115a   :  { %v11666_v19 = vpop.f32.mrb[204].mxu1 }
0x115b   :  { %12224 = vst [vmem:[#allocation41_spill] sm:$0xff] %v11666_v19  ;;  %v9290_v55 = vpop.f32.mrb[205].mxu1 }
0x115c   :  { %v5905_v58 = vpop.f32.mrb[206].mxu1 }
0x115d   :  { %v9291_v8 = vpop.f32.mrb[207].mxu1 }
0x115e   :  { %v11668_v18 = vpop.f32.mrb[192].mxu0 }
0x115f   :  { %12225 = vst [vmem:[#allocation42_spill] sm:$0xff] %v11668_v18  ;;  %v9296_v30 = vpop.f32.mrb[193].mxu0 }
0x1160   :  { %v5953_v1 = vpop.f32.mrb[194].mxu0 }
0x1161   :  { %v9297_v50 = vpop.f32.mrb[195].mxu0 }
0x1166   :  { %v6089_v3 = vpop.f32.mrb[196].mxu0 }
0x1167   :  { %v9308_v23 = vpop.f32.mrb[197].mxu0  ;;  %v6445_v26 = vsel %vm598_vm2, %v6089_v3, -inf }
0x1168   :  { %6446 = vmax.xlane.f32.xlu0 %v6445_v26  ;;  %v6092_v57 = vpop.f32.mrb[198].mxu0 }
0x1169   :  { %v9309_v25 = vpop.f32.mrb[199].mxu0 }
0x116e   :  { %v6189_v31 = vpop.f32.mrb[200].mxu0 }
0x116f   :  { %v9320_v42 = vpop.f32.mrb[201].mxu0  ;;  %v6451_v36 = vsel %vm598_vm2, %v6189_v31, -inf }
0x1170   :  { %6452 = vmax.xlane.f32.xlu0 %v6451_v36  ;;  %v6192_v28 = vpop.f32.mrb[202].mxu0 }
0x1171   :  { %v9321_v55 = vpop.f32.mrb[203].mxu0 }
0x1176   :  { %v11672_v58 = vpop.f32.mrb[204].mxu0 }
0x1177   :  { %v9332_v8 = vpop.f32.mrb[205].mxu0 }
0x1178   :  { %v6292_v30 = vpop.f32.mrb[206].mxu0 }
0x1179   :  { %v9333_v1 = vpop.f32.mrb[207].mxu0 }
0x117e   :  { %v11674_v50 = vpop.f32.mrb[208].mxu0 }
0x117f   :  { %v9344_v23 = vpop.f32.mrb[209].mxu0 }
0x1180   :  { %v6392_v19 = vpop.f32.mrb[210].mxu0 }
0x1181   :  { %v9345_v21 = vpop.f32.mrb[211].mxu0 }
0x1182   :  { %v6457_v21 = vsel %vm598_vm2, %v11672_v58, -inf }
0x118f   :  { %v11676_v26 = vpop.f32.mrb[208].mxu1 }
0x1190   :  { %12226 = vst [vmem:[#allocation43_spill] sm:$0xff] %v11676_v26  ;;  %v9302_v57 = vpop.f32.mrb[209].mxu1 }
0x1191   :  { %v6001_v25 = vpop.f32.mrb[210].mxu1 }
0x1192   :  { %v9303_v42 = vpop.f32.mrb[211].mxu1 }
0x1197   :  { %v6139_v20 = vpop.f32.mrb[212].mxu1 }
0x1198   :  { %v9314_v18 = vpop.f32.mrb[213].mxu1  ;;  %v6448_v36 = vsel %vm598_vm2, %v6139_v20, -inf }
0x1199   :  { %6449 = vmax.xlane.f32.xlu1 %v6448_v36  ;;  %v6142_v28 = vpop.f32.mrb[214].mxu1  ;;  %v6463_v18 = vsel %vm598_vm2, %v11674_v50, -inf }
0x119a   :  { %v9315_v55 = vpop.f32.mrb[215].mxu1 }
0x119f   :  { %v6239_v8 = vpop.f32.mrb[216].mxu1 }
0x11a0   :  { %v9326_v30 = vpop.f32.mrb[217].mxu1  ;;  %v6454_v1 = vsel %vm598_vm2, %v6239_v8, -inf }
0x11a1   :  { %6455 = vmax.xlane.f32.xlu0 %v6454_v1  ;;  %v6242_v23 = vpop.f32.mrb[218].mxu1 }
0x11a2   :  { %v9327_v19 = vpop.f32.mrb[219].mxu1 }
0x11a5   :  { %6458 = vmax.xlane.f32.xlu0 %v6457_v21 }
0x11a7   :  { %v6339_v57 = vpop.f32.mrb[220].mxu1 }
0x11a8   :  { %v9338_v25 = vpop.f32.mrb[221].mxu1  ;;  %v6460_v42 = vsel %vm598_vm2, %v6339_v57, -inf }
0x11a9   :  { %6464 = vmax.xlane.f32.xlu0 %v6463_v18  ;;  %6461 = vmax.xlane.f32.xlu1 %v6460_v42  ;;  %v6342_v36 = vpop.f32.mrb[222].mxu1 }
0x11aa   :  { %v9339_v28 = vpop.f32.mrb[223].mxu1 }
0x11af   :  { %v11685_v55 = vpop.f32.mrb[224].mxu1 }
0x11b0   :  { %v9350_v30 = vpop.f32.mrb[225].mxu1  ;;  %v6466_v19 = vsel %vm598_vm2, %v11685_v55, -inf }
0x11b1   :  { %v6442_v1 = vpop.f32.mrb[226].mxu1 }
0x11b2   :  { %v9351_v23 = vpop.f32.mrb[227].mxu1 }
0x11ba   :  { %6781 = vrot.lane.b32.xlu1 %v10543_v15, %s10069_s28 }
0x11bf   :  { %6733 = vrot.lane.b32.xlu0 %v10517_v39, %s10069_s28 }
0x11de   :  { %6467 = vmax.xlane.f32.xlu1 %v6466_v19  ;;  %v6638_v19 = vpop.permute.xlu1 %6637 }
0x11f5   :  { %v6447_v21 = vpop.xlane.xlu0 %6446 }
0x11f6   :  { %v6469_v25 = vsub.f32 %v6089_v3, %v6447_v21  ;;  %v11701_v3 = vpop.permute.xlu1 %6685 }
0x11f8   :  { %v6477_v18 = vmul.f32 1.442695, %v6469_v25 }
0x11fa   :  { %9783 = vpow2.f32 %v6477_v18 }
0x11fd   :  { %v6453_v42 = vpop.xlane.xlu0 %6452 }
0x11fe   :  { %v6471_v36 = vsub.f32 %v6189_v31, %v6453_v42 }
0x1200   :  { %v6481_v28 = vmul.f32 1.442695, %v6471_v36 }
0x1202   :  { %9785 = vpow2.f32 %v6481_v28 }
0x1204   :  { %v11693_v30 = vpop.eup %9783 }
0x1205   :  { %v6493_v1 = vsel %vm598_vm2, %v11693_v30, 0.0 }
0x1206   :  { %6494 = vadd.xlane.f32.xlu0 %v6493_v1 }
0x120c   :  { %v11697_v23 = vpop.eup %9785 }
0x120d   :  { %v6499_v26 = vsel %vm598_vm2, %v11697_v23, 0.0 }
0x120e   :  { %6500 = vadd.xlane.f32.xlu0 %v6499_v26 }
0x1226   :  { %v6450_v21 = vpop.xlane.xlu1 %6449 }
0x1227   :  { %v6470_v25 = vsub.f32 %v6139_v20, %v6450_v21 }
0x1229   :  { %v6479_v31 = vmul.f32 1.442695, %v6470_v25 }
0x122b   :  { %9787 = vpow2.f32 %v6479_v31 }
0x122e   :  { %v6456_v18 = vpop.xlane.xlu0 %6455 }
0x122f   :  { %v6472_v42 = vsub.f32 %v6239_v8, %v6456_v18 }
0x1231   :  { %v6483_v36 = vmul.f32 1.442695, %v6472_v42 }
0x1232   :  { %v6459_v28 = vpop.xlane.xlu0 %6458 }
0x1233   :  { %9789 = vpow2.f32 %v6483_v36  ;;  %v6473_v1 = vsub.f32 %v11672_v58, %v6459_v28 }
0x1235   :  { %v11704_v44 = vpop.eup %9787  ;;  %v6485_v43 = vmul.f32 1.442695, %v6473_v1 }
0x1236   :  { %v6496_v26 = vsel %vm598_vm2, %v11704_v44, 0.0  ;;  %v6465_v25 = vpop.xlane.xlu0 %6464 }
0x1237   :  { %9791 = vpow2.f32 %v6485_v43  ;;  %6497 = vadd.xlane.f32.xlu1 %v6496_v26  ;;  %v6462_v43 = vpop.xlane.xlu1 %6461  ;;  %v6475_v31 = vsub.f32 %v11674_v50, %v6465_v25 }
0x1238   :  { %v6474_v58 = vsub.f32 %v6339_v57, %v6462_v43 }
0x1239   :  { %v6489_v42 = vmul.f32 1.442695, %v6475_v31 }
0x123a   :  { %v6487_v18 = vmul.f32 1.442695, %v6474_v58  ;;  %v6734_v57 = vpop.permute.xlu0 %6733 }
0x123b   :  { %v6782_v50 = vpop.permute.xlu1 %6781 }
0x123c   :  { %9793 = vpow2.f32 %v6487_v18  ;;  %v6787_v18 = vsel %vm1066_vm3, %v6782_v50, 0 }
0x123d   :  { %v11708_v45 = vpop.eup %9789  ;;  %9795 = vpow2.f32 %v6489_v42 }
0x123e   :  { %v6502_v20 = vsel %vm598_vm2, %v11708_v45, 0.0 }
0x123f   :  { %6503 = vadd.xlane.f32.xlu1 %v6502_v20 }
0x1241   :  { %v11712_v8 = vpop.eup %9791 }
0x1242   :  { %v6505_v21 = vsel %vm598_vm2, %v11712_v8, 0.0 }
0x1243   :  { %6506 = vadd.xlane.f32.xlu0 %v6505_v21 }
0x1246   :  { %v11721_v36 = vpop.eup %9793 }
0x1247   :  { %v6508_v28 = vsel %vm598_vm2, %v11721_v36, 0.0  ;;  %v11725_v1 = vpop.eup %9795 }
0x1248   :  { %v6511_v26 = vsel %vm598_vm2, %v11725_v1, 0.0 }
0x1250   :  { %6877 = vrot.lane.b32.xlu1 %v10575_v47, %s10069_s28 }
0x1259   :  { %6829 = vrot.lane.b32.xlu0 %v10538_v54, %s10069_s28 }
0x126b   :  { %v6468_v20 = vpop.xlane.xlu1 %6467 }
0x126c   :  { %v6476_v21 = vsub.f32 %v11685_v55, %v6468_v20  ;;  %v6643_v55 = vsel %vm1066_vm3, %v6638_v19, 0  ;;  %v6739_v19 = vsel %vm1066_vm3, %v6734_v57, 0 }
0x126e   :  { %v6491_v58 = vmul.f32 1.442695, %v6476_v21 }
0x1274   :  { %6509 = vadd.xlane.f32.xlu1 %v6508_v28 }
0x1278   :  { %6512 = vadd.xlane.f32.xlu0 %v6511_v26 }
0x1285   :  { %7018 = vrot.lane.b32.xlu1 %v10310_v46, %s10070_s12 }
0x128e   :  { %6968 = vrot.lane.b32.xlu0 %v10299_v38, %s10070_s12 }
0x1292   :  { %6966 = vrot.lane.b32.xlu0 %v10315_v51, %s10070_s12 }
0x1293   :  { %v6495_v43 = vpop.xlane.xlu0 %6494 }
0x1294   :  { %9797 = vrcp.f32 %v6495_v43 }
0x1295   :  { %9799 = vpow2.f32 %v6491_v58 }
0x1296   :  { %7068 = vrot.lane.b32.xlu0 %v10292_v35, %s10070_s12 }
0x129a   :  { %7066 = vrot.lane.b32.xlu0 %v10313_v49, %s10070_s12 }
0x129b   :  { %v6501_v46 = vpop.xlane.xlu0 %6500 }
0x129c   :  { %9801 = vrcp.f32 %v6501_v46 }
0x129e   :  { %v9798_v38 = vpop.eup %9797  ;;  %7168 = vrot.lane.b32.xlu0 %v10318_v53, %s10070_s12 }
0x129f   :  { %v6525_v51 = vmul.f32 %v9798_v38, %v11693_v30  ;;  %v11749_v35 = vpop.eup %9799 }
0x12a1   :  { %v6533_v25 = vpack.c.bf16 %v6525_v51, %v6525_v51 }
0x12a2   :  { %7166 = vrot.lane.b32.xlu0 %v10343_v62, %s10070_s12  ;;  %v6514_v62 = vsel %vm598_vm2, %v11749_v35, 0.0 }
0x12a3   :  { %9355 = vmatmul.mubr.msk.bf16.vlgmr.msra.gmra.mrb[212].mxu0 %vm598_vm2, %v6533_v25 }
0x12a4   :  { %9365 = vmatpush3.bf16.msra.mxu0 %v6643_v55  ;;  %9366 = vmatprep.mubr.msk.bf16.mxu0 %vm10063_vm1, %v12214_v56 }
0x12a5   :  { %9376 = vmatprep.subr.bf16.mxu0 %v12214_v56 }
0x12a6   :  { %v9802_v49 = vpop.eup %9801  ;;  %7268 = vrot.lane.b32.xlu0 %v10333_v59, %s10070_s12 }
0x12a7   :  { %v6527_v53 = vmul.f32 %v9802_v49, %v11697_v23 }
0x12a9   :  { %6515 = vadd.xlane.f32.xlu1 %v6514_v62  ;;  %v6535_v30 = vpack.c.bf16 %v6527_v53, %v6527_v53 }
0x12aa   :  { %7266 = vrot.lane.b32.xlu0 %v10366_v6, %s10070_s12 }
0x12ab   :  { %9367 = vmatmul.mubr.msk.bf16.vlgmr.msra.gmra.mrb[216].mxu0 %vm598_vm2, %v6535_v30 }
0x12ac   :  { %9377 = vmatpush3.bf16.msra.mxu0 %v6739_v19  ;;  %9378 = vmatprep.mubr.msk.bf16.mxu0 %vm10063_vm1, %v12214_v56 }
0x12ad   :  { %9388 = vmatprep.subr.bf16.mxu0 %v12214_v56 }
0x12ba   :  { %7016 = vrot.lane.b32.xlu1 %v10341_v61, %s10070_s12 }
0x12be   :  { %7118 = vrot.lane.b32.xlu1 %v10339_v60, %s10070_s12 }
0x12c2   :  { %7116 = vrot.lane.b32.xlu1 %v10364_v5, %s10070_s12 }
0x12c4   :  { %v6498_v59 = vpop.xlane.xlu1 %6497 }
0x12c5   :  { %9803 = vrcp.f32 %v6498_v59 }
0x12c6   :  { %7218 = vrot.lane.b32.xlu1 %v10356_v4, %s10070_s12  ;;  %v6691_v4 = vsel %vm1066_vm3, %v11701_v3, 0 }
0x12ca   :  { %7216 = vrot.lane.b32.xlu1 %v10384_v11, %s10070_s12 }
0x12cc   :  { %v6504_v6 = vpop.xlane.xlu1 %6503 }
0x12cd   :  { %9805 = vrcp.f32 %v6504_v6 }
0x12ce   :  { %7318 = vrot.lane.b32.xlu1 %v10379_v10, %s10070_s12 }
0x12cf   :  { %v9804_v61 = vpop.eup %9803 }
0x12d0   :  { %v6507_v23 = vpop.xlane.xlu0 %6506  ;;  %v6526_v60 = vmul.f32 %v9804_v61, %v11704_v44 }
0x12d1   :  { %9807 = vrcp.f32 %v6507_v23 }
0x12d2   :  { %7316 = vrot.lane.b32.xlu1 %v10395_v14, %s10070_s12  ;;  %v6534_v5 = vpack.c.bf16 %v6526_v60, %v6526_v60 }
0x12d4   :  { %9361 = vmatmul.mubr.msk.bf16.vlgmr.msra.gmra.mrb[228].mxu1 %vm598_vm2, %v6534_v5  ;;  %v6830_v3 = vpop.permute.xlu0 %6829 }
0x12d5   :  { %9371 = vmatpush3.bf16.msra.mxu1 %v6691_v4  ;;  %9372 = vmatprep.mubr.msk.bf16.mxu1 %vm10063_vm1, %v12214_v56  ;;  %v6835_v28 = vsel %vm1066_vm3, %v6830_v3, 0 }
0x12d6   :  { %9382 = vmatprep.subr.bf16.mxu1 %v12214_v56 }
0x12d7   :  { %v9806_v10 = vpop.eup %9805 }
0x12d8   :  { %v6528_v11 = vmul.f32 %v9806_v10, %v11708_v45  ;;  %v6878_v45 = vpop.permute.xlu1 %6877 }
0x12d9   :  { %v6883_v46 = vsel %vm1066_vm3, %v6878_v45, 0 }
0x12da   :  { %v6536_v44 = vpack.c.bf16 %v6528_v11, %v6528_v11 }
0x12db   :  { %v9808_v31 = vpop.eup %9807 }
0x12dc   :  { %9373 = vmatmul.mubr.msk.bf16.vlgmr.msra.gmra.mrb[232].mxu1 %vm598_vm2, %v6536_v44  ;;  %v6529_v14 = vmul.f32 %v9808_v31, %v11712_v8 }
0x12dd   :  { %9383 = vmatpush3.bf16.msra.mxu1 %v6787_v18  ;;  %9384 = vmatprep.mubr.msk.bf16.mxu1 %vm10063_vm1, %v12214_v56 }
0x12de   :  { %v6537_v42 = vpack.c.bf16 %v6529_v14, %v6529_v14  ;;  %9394 = vmatprep.subr.bf16.mxu1 %v12214_v56 }
0x12e0   :  { %9379 = vmatmul.mubr.msk.bf16.vlgmr.msra.gmra.mrb[220].mxu0 %vm598_vm2, %v6537_v42 }
0x12e1   :  { %9389 = vmatpush3.bf16.msra.mxu0 %v6835_v28  ;;  %9390 = vmatprep.mubr.msk.bf16.mxu0 %vm10063_vm1, %v12214_v56 }
0x12e2   :  { %9400 = vmatprep.subr.bf16.mxu0 %v12214_v56 }
0x1301   :  { %v6510_v8 = vpop.xlane.xlu1 %6509 }
0x1302   :  { %9809 = vrcp.f32 %v6510_v8 }
0x1305   :  { %v6513_v26 = vpop.xlane.xlu0 %6512  ;;  %v7019_v59 = vpop.permute.xlu1 %7018 }
0x1306   :  { %9811 = vrcp.f32 %v6513_v26  ;;  %v7024_v11 = vsel %vm598_vm2, %v7019_v59, 0 }
0x1309   :  { %v6969_v50 = vpop.permute.xlu0 %6968 }
0x130a   :  { %v6974_v55 = vsel %vm598_vm2, %v6969_v50, 0 }
0x130c   :  { %v9810_v57 = vpop.eup %9809 }
0x130d   :  { %v6967_v20 = vpop.permute.xlu0 %6966  ;;  %v6530_v21 = vmul.f32 %v9810_v57, %v11721_v36 }
0x130f   :  { %v6538_v43 = vpack.c.bf16 %v6530_v21, %v6530_v21 }
0x1310   :  { %v9812_v58 = vpop.eup %9811 }
0x1311   :  { %v6531_v38 = vmul.f32 %v9812_v58, %v11725_v1  ;;  %9385 = vmatmul.mubr.msk.bf16.vlgmr.msra.gmra.mrb[236].mxu1 %vm598_vm2, %v6538_v43  ;;  %v7069_v51 = vpop.permute.xlu0 %7068 }
0x1312   :  { %9395 = vmatpush3.bf16.msra.mxu1 %v6883_v46  ;;  %9396 = vmatprep.mubr.msk.bf16.mxu1 %vm10063_vm1, %v12214_v56  ;;  %v7074_v1 = vsel %vm598_vm2, %v7069_v51, 0 }
0x1313   :  { %v6539_v25 = vpack.c.bf16 %v6531_v38, %v6531_v38  ;;  %9406 = vmatprep.subr.bf16.mxu1 %v12214_v56 }
0x1315   :  { %9391 = vmatmul.mubr.msk.bf16.vlgmr.msra.gmra.mrb[224].mxu0 %vm598_vm2, %v6539_v25  ;;  %v7067_v36 = vpop.permute.xlu0 %7066 }
0x1316   :  { %9401 = vmatpush3.bf16.xpose.msra.mxu0 %v6974_v55  ;;  %9402 = vmatprep.mubr.msk.bf16.mxu0 %vm10063_vm1, %v12214_v56 }
0x1317   :  { %9412 = vmatprep.subr.bf16.mxu0 %v12214_v56 }
0x1319   :  { %v7169_v49 = vpop.permute.xlu0 %7168 }
0x131a   :  { %v7174_v62 = vsel %vm598_vm2, %v7169_v49, 0 }
0x131d   :  { %9403 = vmatmul.mubr.msk.bf16.vlgmr.msra.gmra.mrb[228].mxu0 %vm598_vm2, %v6967_v20  ;;  %v7167_v53 = vpop.permute.xlu0 %7166 }
0x131e   :  { %9413 = vmatpush3.bf16.xpose.msra.mxu0 %v7074_v1  ;;  %9414 = vmatprep.mubr.msk.bf16.mxu0 %vm10063_vm1, %v12214_v56 }
0x131f   :  { %9424 = vmatprep.subr.bf16.mxu0 %v12214_v56 }
0x1321   :  { %v7269_v30 = vpop.permute.xlu0 %7268 }
0x1322   :  { %v7274_v19 = vsel %vm598_vm2, %v7269_v30, 0 }
0x1325   :  { %9415 = vmatmul.mubr.msk.bf16.vlgmr.msra.gmra.mrb[232].mxu0 %vm598_vm2, %v7067_v36  ;;  %v7267_v6 = vpop.permute.xlu0 %7266 }
0x1326   :  { %9425 = vmatpush3.bf16.xpose.msra.mxu0 %v7174_v62  ;;  %9426 = vmatprep.mubr.msk.bf16.mxu0 %vm10063_vm1, %v12214_v56 }
0x1327   :  { %9436 = vmatprep.subr.bf16.mxu0 %v12214_v56 }
0x132d   :  { %9427 = vmatmul.mubr.msk.bf16.vlgmr.msra.gmra.mrb[236].mxu0 %vm598_vm2, %v7167_v53 }
0x132e   :  { %9437 = vmatpush3.bf16.xpose.msra.mxu0 %v7274_v19  ;;  %9438 = vmatprep.mubr.msk.bf16.mxu0 %vm10063_vm1, %v12214_v56 }
0x132f   :  { %9448 = vmatprep.subr.bf16.mxu0 %v12214_v56 }
0x1335   :  { %9439 = vmatmul.mubr.msk.bf16.vlgmr.msra.gmra.mrb[240].mxu0 %vm598_vm2, %v7267_v6 }
0x1336   :  { %v6516_v61 = vpop.xlane.xlu1 %6515  ;;  %9450 = vmatprep.mubr.msk.bf16.mxu0 %vm10063_vm1, %v12214_v56 }
0x1337   :  { %9813 = vrcp.f32 %v6516_v61 }
0x133a   :  { %v7017_v23 = vpop.permute.xlu1 %7016 }
0x133e   :  { %v7119_v4 = vpop.permute.xlu1 %7118 }
0x133f   :  { %v7124_v31 = vsel %vm598_vm2, %v7119_v4, 0 }
0x1341   :  { %v9814_v60 = vpop.eup %9813 }
0x1342   :  { %v6532_v5 = vmul.f32 %v9814_v60, %v11749_v35  ;;  %v7117_v44 = vpop.permute.xlu1 %7116 }
0x1344   :  { %v6540_v10 = vpack.c.bf16 %v6532_v5, %v6532_v5 }
0x1346   :  { %9397 = vmatmul.mubr.msk.bf16.vlgmr.msra.gmra.mrb[240].mxu1 %vm598_vm2, %v6540_v10  ;;  %v7219_v18 = vpop.permute.xlu1 %7218 }
0x1347   :  { %9407 = vmatpush3.bf16.xpose.msra.mxu1 %v7024_v11  ;;  %9408 = vmatprep.mubr.msk.bf16.mxu1 %vm10063_vm1, %v12214_v56  ;;  %v7224_v14 = vsel %vm598_vm2, %v7219_v18, 0 }
0x1348   :  { %9418 = vmatprep.subr.bf16.mxu1 %v12214_v56 }
0x134a   :  { %v7217_v35 = vpop.permute.xlu1 %7216 }
0x134e   :  { %9409 = vmatmul.mubr.msk.bf16.vlgmr.msra.gmra.mrb[244].mxu1 %vm598_vm2, %v7017_v23  ;;  %v7319_v3 = vpop.permute.xlu1 %7318 }
0x134f   :  { %9419 = vmatpush3.bf16.xpose.msra.mxu1 %v7124_v31  ;;  %9420 = vmatprep.mubr.msk.bf16.mxu1 %vm10063_vm1, %v12214_v56  ;;  %v7324_v42 = vsel %vm598_vm2, %v7319_v3, 0 }
0x1350   :  { %9430 = vmatprep.subr.bf16.mxu1 %v12214_v56 }
0x1352   :  { %v7317_v28 = vpop.permute.xlu1 %7316 }
0x1356   :  { %9421 = vmatmul.mubr.msk.bf16.vlgmr.msra.gmra.mrb[248].mxu1 %vm598_vm2, %v7117_v44 }
0x1357   :  { %9431 = vmatpush3.bf16.xpose.msra.mxu1 %v7224_v14  ;;  %9432 = vmatprep.mubr.msk.bf16.mxu1 %vm10063_vm1, %v12214_v56 }
0x1358   :  { %9442 = vmatprep.subr.bf16.mxu1 %v12214_v56 }
0x135e   :  { %9433 = vmatmul.mubr.msk.bf16.vlgmr.msra.gmra.mrb[252].mxu1 %vm598_vm2, %v7217_v35 }
0x135f   :  { %9443 = vmatpush3.bf16.xpose.msra.mxu1 %v7324_v42  ;;  %9444 = vmatprep.mubr.msk.bf16.mxu1 %vm10063_vm1, %v12214_v56 }
0x1360   :  { %9454 = vmatprep.subr.bf16.mxu1 %v12214_v56 }
0x1366   :  { %9445 = vmatmul.mubr.msk.bf16.vlgmr.msra.gmra.mrb[0].mxu1 %vm598_vm2, %v7317_v28 }
0x1367   :  { %9456 = vmatprep.mubr.msk.bf16.mxu1 %vm10063_vm1, %v12214_v56 }
0x1376   :  { %v11851_v45 = vpop.f32.mrb[212].mxu0 }
0x1377   :  { %v9356_v8 = vpop.f32.mrb[213].mxu0 }
0x1378   :  { %v6586_v26 = vpop.f32.mrb[214].mxu0 }
0x1379   :  { %v9357_v50 = vpop.f32.mrb[215].mxu0 }
0x137e   :  { %v11853_v57 = vpop.f32.mrb[216].mxu0 }
0x137f   :  { %v9368_v20 = vpop.f32.mrb[217].mxu0 }
0x1380   :  { %v6682_v21 = vpop.f32.mrb[218].mxu0 }
0x1381   :  { %v9369_v43 = vpop.f32.mrb[219].mxu0 }
0x13a7   :  { %v11855_v58 = vpop.f32.mrb[228].mxu1 }
0x13a8   :  { %v9362_v46 = vpop.f32.mrb[229].mxu1 }
0x13a9   :  { %v6634_v38 = vpop.f32.mrb[230].mxu1 }
0x13aa   :  { %v9363_v51 = vpop.f32.mrb[231].mxu1 }
0x13af   :  { %v11857_v25 = vpop.f32.mrb[232].mxu1 }
0x13b0   :  { %v9374_v55 = vpop.f32.mrb[233].mxu1 }
0x13b1   :  { %v6730_v36 = vpop.f32.mrb[234].mxu1 }
0x13b2   :  { %v9375_v1 = vpop.f32.mrb[235].mxu1 }
0x13b3   :  { %v11859_v49 = vpop.f32.mrb[220].mxu0 }
0x13b4   :  { %v9380_v53 = vpop.f32.mrb[221].mxu0 }
0x13b5   :  { %v6778_v62 = vpop.f32.mrb[222].mxu0 }
0x13b6   :  { %v9381_v30 = vpop.f32.mrb[223].mxu0 }
0x13e4   :  { %v11861_v19 = vpop.f32.mrb[236].mxu1 }
0x13e5   :  { %v9386_v59 = vpop.f32.mrb[237].mxu1 }
0x13e6   :  { %v6826_v6 = vpop.f32.mrb[238].mxu1 }
0x13e7   :  { %v9387_v61 = vpop.f32.mrb[239].mxu1 }
0x13e8   :  { %v11863_v23 = vpop.f32.mrb[224].mxu0 }
0x13e9   :  { %v9392_v60 = vpop.f32.mrb[225].mxu0 }
0x13ea   :  { %v6874_v5 = vpop.f32.mrb[226].mxu0 }
0x13eb   :  { %v9393_v4 = vpop.f32.mrb[227].mxu0 }
0x13f0   :  { %v7010_v10 = vpop.f32.mrb[228].mxu0 }
0x13f1   :  { %v9404_v11 = vpop.f32.mrb[229].mxu0  ;;  %v7366_v44 = vsel %vm598_vm2, %v7010_v10, -inf }
0x13f2   :  { %7367 = vmax.xlane.f32.xlu0 %v7366_v44  ;;  %v7013_v31 = vpop.f32.mrb[230].mxu0 }
0x13f3   :  { %v9405_v18 = vpop.f32.mrb[231].mxu0 }
0x13f8   :  { %v7110_v35 = vpop.f32.mrb[232].mxu0 }
0x13f9   :  { %v9416_v14 = vpop.f32.mrb[233].mxu0  ;;  %v7372_v3 = vsel %vm598_vm2, %v7110_v35, -inf }
0x13fa   :  { %7373 = vmax.xlane.f32.xlu0 %v7372_v3  ;;  %v7113_v42 = vpop.f32.mrb[234].mxu0 }
0x13fb   :  { %v9417_v28 = vpop.f32.mrb[235].mxu0 }
0x1400   :  { %v11867_v8 = vpop.f32.mrb[236].mxu0 }
0x1401   :  { %v9428_v26 = vpop.f32.mrb[237].mxu0  ;;  %v7378_v44 = vsel %vm598_vm2, %v11867_v8, -inf }
0x1402   :  { %v7213_v50 = vpop.f32.mrb[238].mxu0 }
0x1403   :  { %v9429_v20 = vpop.f32.mrb[239].mxu0 }
0x1408   :  { %v11869_v21 = vpop.f32.mrb[240].mxu0 }
0x1409   :  { %v9440_v43 = vpop.f32.mrb[241].mxu0  ;;  %v7384_v14 = vsel %vm598_vm2, %v11869_v21, -inf }
0x140a   :  { %v7313_v46 = vpop.f32.mrb[242].mxu0 }
0x140b   :  { %v9441_v38 = vpop.f32.mrb[243].mxu0 }
0x1419   :  { %v11871_v51 = vpop.f32.mrb[240].mxu1 }
0x141a   :  { %v9398_v55 = vpop.f32.mrb[241].mxu1 }
0x141b   :  { %v6922_v36 = vpop.f32.mrb[242].mxu1 }
0x141c   :  { %v9399_v1 = vpop.f32.mrb[243].mxu1 }
0x1421   :  { %v7060_v53 = vpop.f32.mrb[244].mxu1 }
0x1422   :  { %v9410_v62 = vpop.f32.mrb[245].mxu1  ;;  %v7369_v30 = vsel %vm598_vm2, %v7060_v53, -inf }
0x1423   :  { %7370 = vmax.xlane.f32.xlu1 %v7369_v30  ;;  %v7063_v59 = vpop.f32.mrb[246].mxu1 }
0x1424   :  { %v9411_v6 = vpop.f32.mrb[247].mxu1 }
0x1429   :  { %v11874_v61 = vpop.f32.mrb[248].mxu1 }
0x142a   :  { %v9422_v60 = vpop.f32.mrb[249].mxu1  ;;  %v7375_v5 = vsel %vm598_vm2, %v11874_v61, -inf }
0x142b   :  { %7376 = vmax.xlane.f32.xlu0 %v7375_v5  ;;  %v7163_v4 = vpop.f32.mrb[250].mxu1 }
0x142c   :  { %v9423_v11 = vpop.f32.mrb[251].mxu1 }
0x142f   :  { %7379 = vmax.xlane.f32.xlu0 %v7378_v44 }
0x1431   :  { %v11880_v31 = vpop.f32.mrb[252].mxu1 }
0x1432   :  { %v9434_v18 = vpop.f32.mrb[253].mxu1  ;;  %v7381_v3 = vsel %vm598_vm2, %v11880_v31, -inf }
0x1433   :  { %7385 = vmax.xlane.f32.xlu0 %v7384_v14  ;;  %7382 = vmax.xlane.f32.xlu1 %v7381_v3  ;;  %v7263_v42 = vpop.f32.mrb[254].mxu1 }
0x1434   :  { %v9435_v28 = vpop.f32.mrb[255].mxu1 }
0x1439   :  { %v11886_v26 = vpop.f32.mrb[0].mxu1 }
0x143a   :  { %v9446_v50 = vpop.f32.mrb[1].mxu1  ;;  %v7387_v46 = vsel %vm598_vm2, %v11886_v26, -inf }
0x143b   :  { %v7363_v20 = vpop.f32.mrb[2].mxu1 }
0x143c   :  { %v9447_v43 = vpop.f32.mrb[3].mxu1 }
0x1444   :  { %7510 = vrot.lane.b32.xlu1 %v10415_v34, %s10070_s12 }
0x1448   :  { %7558 = vrot.lane.b32.xlu1 %v10497_v48, %s10070_s12 }
0x1449   :  { %7462 = vrot.lane.b32.xlu0 %v10413_v33, %s10070_s12 }
0x146c   :  { %7388 = vmax.xlane.f32.xlu1 %v7387_v46 }
0x147d   :  { %7606 = vrot.lane.b32.xlu1 %v10513_v2, %s10070_s12 }
0x147f   :  { %v7368_v38 = vpop.xlane.xlu0 %7367 }
0x1480   :  { %v7390_v55 = vsub.f32 %v7010_v10, %v7368_v38 }
0x1482   :  { %v7398_v36 = vmul.f32 1.442695, %v7390_v55 }
0x1484   :  { %9815 = vpow2.f32 %v7398_v36 }
0x1487   :  { %v7374_v1 = vpop.xlane.xlu0 %7373 }
0x1488   :  { %v7392_v62 = vsub.f32 %v7110_v35, %v7374_v1 }
0x148a   :  { %v7402_v34 = vmul.f32 1.442695, %v7392_v62 }
0x148c   :  { %9817 = vpow2.f32 %v7402_v34  ;;  %v12233_v34 = vld [vmem:[#allocation36_spill] sm:$0xff] }
0x148e   :  { %v11898_v30 = vpop.eup %9815 }
0x148f   :  { %v7414_v33 = vsel %vm598_vm2, %v11898_v30, 0.0 }
0x1490   :  { %7415 = vadd.xlane.f32.xlu0 %v7414_v33  ;;  %v12235_v33 = vld [vmem:[#allocation40_spill] sm:$0xff] }
0x1496   :  { %v11902_v48 = vpop.eup %9817 }
0x1497   :  { %v7420_v59 = vsel %vm598_vm2, %v11902_v48, 0.0 }
0x1498   :  { %7421 = vadd.xlane.f32.xlu0 %v7420_v59  ;;  %v12237_v59 = vld [vmem:[#allocation42_spill] sm:$0xff] }
0x14ae   :  { %7654 = vrot.lane.b32.xlu0 %v10517_v39, %s10070_s12 }
0x14b0   :  { %v7371_v2 = vpop.xlane.xlu1 %7370 }
0x14b1   :  { %v7391_v10 = vsub.f32 %v7060_v53, %v7371_v2  ;;  %v12238_v2 = vld [vmem:[#allocation38_spill] sm:$0xff] }
0x14b3   :  { %v7400_v35 = vmul.f32 1.442695, %v7391_v10  ;;  %v12239_v10 = vld [vmem:[#allocation39_spill] sm:$0xff] }
0x14b5   :  { %9819 = vpow2.f32 %v7400_v35 }
0x14b8   :  { %v7377_v6 = vpop.xlane.xlu0 %7376 }
0x14b9   :  { %v7393_v46 = vsub.f32 %v11874_v61, %v7377_v6 }
0x14bb   :  { %v7404_v38 = vmul.f32 1.442695, %v7393_v46 }
0x14bc   :  { %v7380_v60 = vpop.xlane.xlu0 %7379 }
0x14bd   :  { %v7394_v5 = vsub.f32 %v11867_v8, %v7380_v60  ;;  %v12240_v60 = vld [vmem:[#allocation21_spill] sm:$0xff] }
0x14bf   :  { %v11909_v4 = vpop.eup %9819  ;;  %v7406_v11 = vmul.f32 1.442695, %v7394_v5  ;;  %v12242_v5 = vld [vmem:[#allocation24_spill] sm:$0xff] }
0x14c0   :  { %v7386_v44 = vpop.xlane.xlu0 %7385  ;;  %v7383_v18 = vpop.xlane.xlu1 %7382  ;;  %v7417_v14 = vsel %vm598_vm2, %v11909_v4, 0.0 }
0x14c1   :  { %9821 = vpow2.f32 %v7406_v11  ;;  %v7396_v3 = vsub.f32 %v11869_v21, %v7386_v44  ;;  %7418 = vadd.xlane.f32.xlu1 %v7417_v14  ;;  %v7395_v55 = vsub.f32 %v11880_v31, %v7383_v18 }
0x14c3   :  { %v7410_v39 = vmul.f32 1.442695, %v7396_v3  ;;  %v7408_v36 = vmul.f32 1.442695, %v7395_v55  ;;  %v12244_v3 = vld [vmem:[#allocation29_spill] sm:$0xff] }
0x14c4   :  { %v7463_v53 = vpop.permute.xlu0 %7462  ;;  %v7511_v42 = vpop.permute.xlu1 %7510  ;;  %v12247_v55 = vld [vmem:[#allocation37_spill] sm:$0xff] }
0x14c5   :  { %9823 = vpow2.f32 %v7410_v39  ;;  %v7468_v28 = vsel %vm1066_vm3, %v7463_v53, 0  ;;  %v7516_v8 = vsel %vm1066_vm3, %v7511_v42, 0  ;;  %v12245_v39 = vld [vmem:[#allocation31_spill] sm:$0xff] }
0x14c6   :  { %9449 = vmatpush3.bf16.msra.mxu0 %v7468_v28  ;;  %9455 = vmatpush3.bf16.msra.mxu1 %v7516_v8  ;;  %9825 = vpow2.f32 %v7404_v38  ;;  %v12246_v8 = vld [vmem:[#allocation35_spill] sm:$0xff] }
0x14c7   :  { %9460 = vmatprep.subr.bf16.mxu0 %v12214_v56  ;;  %9466 = vmatprep.subr.bf16.mxu1 %v12214_v56  ;;  %9827 = vpow2.f32 %v7408_v36 }
0x14cb   :  { %v11918_v50 = vpop.eup %9821 }
0x14cc   :  { %v7426_v21 = vsel %vm598_vm2, %v11918_v50, 0.0 }
0x14cd   :  { %7427 = vadd.xlane.f32.xlu0 %v7426_v21 }
0x14cf   :  { %v11922_v20 = vpop.eup %9823 }
0x14d0   :  { %v7432_v43 = vsel %vm598_vm2, %v11922_v20, 0.0  ;;  %v11936_v1 = vpop.eup %9825 }
0x14d1   :  { %7433 = vadd.xlane.f32.xlu0 %v7432_v43  ;;  %v11942_v61 = vpop.eup %9827 }
0x14d2   :  { %7702 = vrot.lane.b32.xlu1 %v10543_v15, %s10070_s12  ;;  %v7559_v15 = vpop.permute.xlu1 %7558 }
0x14e7   :  { %7750 = vrot.lane.b32.xlu0 %v10538_v54, %s10070_s12  ;;  %v7423_v54 = vsel %vm598_vm2, %v11936_v1, 0.0 }
0x14eb   :  { %2328 = vrot.lane.b32.xlu0 %v10808_v13, %s10071_s7 }
0x14ef   :  { %2332 = vrot.lane.b32.xlu0 %v10815_v24, %s10071_s7  ;;  %v7429_v24 = vsel %vm598_vm2, %v11942_v61, 0.0 }
0x14f3   :  { %3249 = vrot.lane.b32.xlu0 %v11026_v16, %s10072_s25 }
0x14f6   :  { %7424 = vadd.xlane.f32.xlu1 %v7423_v54 }
0x14f7   :  { %3253 = vrot.lane.b32.xlu0 %v11028_v37, %s10072_s25 }
0x14f9   :  { %v7389_v13 = vpop.xlane.xlu1 %7388 }
0x14fa   :  { %v7397_v31 = vsub.f32 %v11886_v26, %v7389_v13  ;;  %7430 = vadd.xlane.f32.xlu1 %v7429_v24  ;;  %v12249_v24 = vld [vmem:[#allocation43_spill] sm:$0xff] }
0x14fb   :  { %4170 = vrot.lane.b32.xlu0 %v11236_v32, %s10073_s13 }
0x14fc   :  { %v7412_v16 = vmul.f32 1.442695, %v7397_v31 }
0x14fd   :  { %v7607_v35 = vpop.permute.xlu1 %7606 }
0x14fe   :  { %9829 = vpow2.f32 %v7412_v16  ;;  %v7612_v18 = vsel %vm1066_vm3, %v7607_v35, 0 }
0x14ff   :  { %4174 = vrot.lane.b32.xlu0 %v11238_v52, %s10073_s13 }
0x1503   :  { %5091 = vrot.lane.b32.xlu0 %v11446_v17, %s10074_s2 }
0x1507   :  { %5095 = vrot.lane.b32.xlu0 %v11448_v41, %s10074_s2 }
0x1508   :  { %v11957_v37 = vpop.eup %9829 }
0x1509   :  { %v7435_v26 = vsel %vm598_vm2, %v11957_v37, 0.0 }
0x150a   :  { %7436 = vadd.xlane.f32.xlu1 %v7435_v26 }
0x150b   :  { %6012 = vrot.lane.b32.xlu0 %v11656_v12, %s10075_s14 }
0x150f   :  { %6016 = vrot.lane.b32.xlu0 %v11658_v27, %s10075_s14  ;;  %v12231_v27 = vld [vmem:[#allocation34_spill] sm:$0xff] }
0x1513   :  { %6933 = vrot.lane.b32.xlu0 %v11851_v45, %s10076_s15  ;;  %v12232_v45 = vld [vmem:[#allocation27_spill] sm:$0xff] }
0x1517   :  { %6937 = vrot.lane.b32.xlu0 %v11853_v57, %s10076_s15 }
0x151b   :  { %2336 = vrot.lane.b32.xlu0 %v10824_v40, %s10071_s7  ;;  %7798 = vrot.lane.b32.xlu1 %v10575_v47, %s10070_s12 }
0x151d   :  { %v7416_v32 = vpop.xlane.xlu0 %7415 }
0x151e   :  { %9831 = vrcp.f32 %v7416_v32 }
0x151f   :  { %2340 = vrot.lane.b32.xlu0 %v10828_v0, %s10071_s7  ;;  %2330 = vrot.lane.b32.xlu1 %v10820_v22, %s10071_s7  ;;  %v12227_v0 = vld [vmem:[#allocation28_spill] sm:$0xff]  ;;  %v12228_v22 = vld [vmem:[#allocation23_spill] sm:$0xff] }
0x1523   :  { %3257 = vrot.lane.b32.xlu0 %v11034_v9, %s10072_s25  ;;  %2334 = vrot.lane.b32.xlu1 %v10822_v29, %s10071_s7  ;;  %v7564_v29 = vsel %vm1066_vm3, %v7559_v15, 0  ;;  %v12248_v15 = vld [vmem:[#allocation41_spill] sm:$0xff] }
0x1525   :  { %v7422_v52 = vpop.xlane.xlu0 %7421 }
0x1526   :  { %9833 = vrcp.f32 %v7422_v52 }
0x1527   :  { %3261 = vrot.lane.b32.xlu0 %v11038_v63, %s10072_s25  ;;  %3251 = vrot.lane.b32.xlu1 %v11030_v7, %s10072_s25  ;;  %v12229_v7 = vld [vmem:[#allocation30_spill] sm:$0xff] }
0x1528   :  { %v9832_v47 = vpop.eup %9831  ;;  %v12230_v63 = vld [vmem:[#allocation26_spill] sm:$0xff] }
0x1529   :  { %v7446_v40 = vmul.f32 %v9832_v47, %v11898_v30  ;;  %v7655_v12 = vpop.permute.xlu0 %7654  ;;  %v12234_v30 = vld [vmem:[#allocation32_spill] sm:$0xff] }
0x152a   :  { %v7660_v62 = vsel %vm1066_vm3, %v7655_v12, 0 }
0x152b   :  { %4178 = vrot.lane.b32.xlu0 %v12227_v0, %s10073_s13  ;;  %3255 = vrot.lane.b32.xlu1 %v12228_v22, %s10072_s25  ;;  %v7454_v9 = vpack.c.bf16 %v7446_v40, %v7446_v40 }
0x152d   :  { %9451 = vmatmul.mubr.msk.bf16.vlgmr.msra.gmra.mrb[244].mxu0 %vm598_vm2, %v7454_v9 }
0x152e   :  { %9461 = vmatpush3.bf16.msra.mxu0 %v7564_v29  ;;  %9462 = vmatprep.mubr.msk.bf16.mxu0 %vm10063_vm1, %v12214_v56 }
0x152f   :  { %4182 = vrot.lane.b32.xlu0 %v12229_v7, %s10073_s13  ;;  %4172 = vrot.lane.b32.xlu1 %v12230_v63, %s10073_s13 }
0x1530   :  { %v9834_v17 = vpop.eup %9833  ;;  %9472 = vmatprep.subr.bf16.mxu0 %v12214_v56 }
0x1531   :  { %v7448_v41 = vmul.f32 %v9834_v17, %v11902_v48  ;;  %v12236_v48 = vld [vmem:[#allocation33_spill] sm:$0xff] }
0x1533   :  { %5099 = vrot.lane.b32.xlu0 %v12231_v27, %s10074_s2  ;;  %4176 = vrot.lane.b32.xlu1 %v12232_v45, %s10073_s13  ;;  %v7456_v57 = vpack.c.bf16 %v7448_v41, %v7448_v41 }
0x1535   :  { %9463 = vmatmul.mubr.msk.bf16.vlgmr.msra.gmra.mrb[248].mxu0 %vm598_vm2, %v7456_v57 }
0x1536   :  { %9473 = vmatpush3.bf16.msra.mxu0 %v7660_v62  ;;  %9474 = vmatprep.mubr.msk.bf16.mxu0 %vm10063_vm1, %v12214_v56 }
0x1537   :  { %5103 = vrot.lane.b32.xlu0 %v12233_v34, %s10074_s2  ;;  %5093 = vrot.lane.b32.xlu1 %v12234_v30, %s10074_s2 }
0x1538   :  { %9484 = vmatprep.subr.bf16.mxu0 %v12214_v56 }
0x153b   :  { %6020 = vrot.lane.b32.xlu0 %v12235_v33, %s10075_s14  ;;  %5097 = vrot.lane.b32.xlu1 %v12236_v48, %s10074_s2 }
0x153f   :  { %6024 = vrot.lane.b32.xlu0 %v12237_v59, %s10075_s14  ;;  %6014 = vrot.lane.b32.xlu1 %v12238_v2, %s10075_s14 }
0x1543   :  { %6941 = vrot.lane.b32.xlu0 %v11859_v49, %s10076_s15  ;;  %6018 = vrot.lane.b32.xlu1 %v12239_v10, %s10075_s14  ;;  %v12241_v49 = vld [vmem:[#allocation22_spill] sm:$0xff] }
0x1547   :  { %6945 = vrot.lane.b32.xlu0 %v11863_v23, %s10076_s15  ;;  %6935 = vrot.lane.b32.xlu1 %v11855_v58, %s10076_s15  ;;  %v12243_v58 = vld [vmem:[#allocation25_spill] sm:$0xff] }
0x154b   :  { %6939 = vrot.lane.b32.xlu1 %v11857_v25, %s10076_s15 }
0x154e   :  { %v7419_v6 = vpop.xlane.xlu1 %7418 }
0x154f   :  { %9835 = vrcp.f32 %v7419_v6  ;;  %2338 = vrot.lane.b32.xlu1 %v12240_v60, %s10071_s7 }
0x1552   :  { %v7703_v26 = vpop.permute.xlu1 %7702 }
0x1553   :  { %2342 = vrot.lane.b32.xlu1 %v12241_v49, %s10071_s7  ;;  %v7708_v63 = vsel %vm1066_vm3, %v7703_v26, 0 }
0x1557   :  { %3259 = vrot.lane.b32.xlu1 %v12242_v5, %s10072_s25 }
0x1559   :  { %v9836_v11 = vpop.eup %9835 }
0x155a   :  { %v7447_v23 = vmul.f32 %v9836_v11, %v11909_v4  ;;  %v7428_v44 = vpop.xlane.xlu0 %7427 }
0x155b   :  { %9837 = vrcp.f32 %v7428_v44  ;;  %3263 = vrot.lane.b32.xlu1 %v12243_v58, %s10072_s25 }
0x155c   :  { %v7455_v25 = vpack.c.bf16 %v7447_v23, %v7447_v23 }
0x155e   :  { %v7434_v14 = vpop.xlane.xlu0 %7433  ;;  %9457 = vmatmul.mubr.msk.bf16.vlgmr.msra.gmra.mrb[4].mxu1 %vm598_vm2, %v7455_v25 }
0x155f   :  { %9839 = vrcp.f32 %v7434_v14  ;;  %9467 = vmatpush3.bf16.msra.mxu1 %v7612_v18  ;;  %4180 = vrot.lane.b32.xlu1 %v12244_v3, %s10073_s13 }
0x1560   :  { %9468 = vmatprep.mubr.msk.bf16.mxu1 %vm10063_vm1, %v12214_v56  ;;  %9478 = vmatprep.subr.bf16.mxu1 %v12214_v56 }
0x1562   :  { %v7751_v4 = vpop.permute.xlu0 %7750 }
0x1563   :  { %4184 = vrot.lane.b32.xlu1 %v12245_v39, %s10073_s13  ;;  %v7756_v46 = vsel %vm1066_vm3, %v7751_v4, 0 }
0x1565   :  { %v9838_v53 = vpop.eup %9837 }
0x1566   :  { %v7450_v42 = vmul.f32 %v9838_v53, %v11918_v50  ;;  %v2329_v28 = vpop.permute.xlu0 %2328 }
0x1567   :  { %2353 = vst.msk [vmem:[#allocation2] sm:$0xff] %vm2352_vm4, %v2329_v28  ;;  %5101 = vrot.lane.b32.xlu1 %v12246_v8, %s10074_s2 }
0x1568   :  { %v7458_v21 = vpack.c.bf16 %v7450_v42, %v7450_v42 }
0x1569   :  { %v9840_v43 = vpop.eup %9839 }
0x156a   :  { %v2333_v38 = vpop.permute.xlu0 %2332  ;;  %9475 = vmatmul.mubr.msk.bf16.vlgmr.msra.gmra.mrb[252].mxu0 %vm598_vm2, %v7458_v21  ;;  %v7452_v50 = vmul.f32 %v9840_v43, %v11922_v20 }
0x156b   :  { %2355 = vst.msk [vmem:[#allocation2 + $0x10] sm:$0xff] %vm2352_vm4, %v2333_v38  ;;  %9485 = vmatpush3.bf16.msra.mxu0 %v7756_v46  ;;  %5105 = vrot.lane.b32.xlu1 %v12247_v55, %s10074_s2 }
0x156c   :  { %9486 = vmatprep.mubr.msk.bf16.mxu0 %vm10063_vm1, %v12214_v56  ;;  %v7460_v54 = vpack.c.bf16 %v7452_v50, %v7452_v50 }
0x156e   :  { %v3250_v36 = vpop.permute.xlu0 %3249 }
0x156f   :  { %3274 = vst.msk [vmem:[#allocation2] sm:$0xff] %vm3273_vm5, %v3250_v36  ;;  %6022 = vrot.lane.b32.xlu1 %v12248_v15, %s10075_s14 }
0x1572   :  { %v3254_v13 = vpop.permute.xlu0 %3253  ;;  %9487 = vmatmul.mubr.msk.bf16.vlgmr.msra.gmra.mrb[0].mxu0 %vm598_vm2, %v7460_v54 }
0x1573   :  { %3276 = vst.msk [vmem:[#allocation2 + $0x10] sm:$0xff] %vm3273_vm5, %v3254_v13  ;;  %6026 = vrot.lane.b32.xlu1 %v12249_v24, %s10075_s14 }
0x1576   :  { %v4171_v20 = vpop.permute.xlu0 %4170 }
0x1577   :  { %4195 = vst.msk [vmem:[#allocation2] sm:$0xff] %vm4194_vm6, %v4171_v20  ;;  %6943 = vrot.lane.b32.xlu1 %v11861_v19, %s10076_s15 }
0x157a   :  { %v4175_v31 = vpop.permute.xlu0 %4174 }
0x157b   :  { %4197 = vst.msk [vmem:[#allocation2 + $0x10] sm:$0xff] %vm4194_vm6, %v4175_v31  ;;  %6947 = vrot.lane.b32.xlu1 %v11871_v51, %s10076_s15 }
0x157e   :  { %v5092_v16 = vpop.permute.xlu0 %5091 }
0x157f   :  { %5116 = vst.msk [vmem:[#allocation2] sm:$0xff] %vm5115_vm7, %v5092_v16 }
0x1582   :  { %v5096_v32 = vpop.permute.xlu0 %5095 }
0x1583   :  { %5118 = vst.msk [vmem:[#allocation2 + $0x10] sm:$0xff] %vm5115_vm7, %v5096_v32  ;;  %v7425_v52 = vpop.xlane.xlu1 %7424 }
0x1584   :  { %9841 = vrcp.f32 %v7425_v52 }
0x1586   :  { %v6013_v47 = vpop.permute.xlu0 %6012 }
0x1587   :  { %6037 = vst.msk [vmem:[#allocation2] sm:$0xff] %vm6036_vm8, %v6013_v47  ;;  %v7431_v19 = vpop.xlane.xlu1 %7430 }
0x1588   :  { %9843 = vrcp.f32 %v7431_v19 }
0x158a   :  { %v6017_v40 = vpop.permute.xlu0 %6016 }
0x158b   :  { %6039 = vst.msk [vmem:[#allocation2 + $0x10] sm:$0xff] %vm6036_vm8, %v6017_v40  ;;  %v9583_v40 = vld [vmem:[%s12198_s9] sm:$0xff]  }
0x158c   :  { %9496 = vmatprep.subr.bf16.mxu0 %v9583_v40 }
0x158d   :  { %9497 = vmatpush3.bf16.msra.mxu0 %v9583_v40 }
0x158e   :  { %v9842_v51 = vpop.eup %9841  ;;  %v6934_v0 = vpop.permute.xlu0 %6933 }
0x158f   :  { %v7449_v22 = vmul.f32 %v9842_v51, %v11936_v1  ;;  %6958 = vst.msk [vmem:[#allocation2] sm:$0xff] %vm6957_vm9, %v6934_v0  ;;  %v9584_v51 = vld [vmem:[%s12198_s9 + $0x8] sm:$0xff]  }
0x1590   :  { %9498 = vmatprep.subr.bf16.mxu0 %v9584_v51 }
0x1591   :  { %v7457_v9 = vpack.c.bf16 %v7449_v22, %v7449_v22  ;;  %9499 = vmatpush3.bf16.msra.mxu0 %v9584_v51 }
0x1592   :  { %v9844_v29 = vpop.eup %9843  ;;  %v6938_v7 = vpop.permute.xlu0 %6937 }
0x1593   :  { %6960 = vst.msk [vmem:[#allocation2 + $0x10] sm:$0xff] %vm6957_vm9, %v6938_v7  ;;  %9469 = vmatmul.mubr.msk.bf16.vlgmr.msra.gmra.mrb[8].mxu1 %vm598_vm2, %v7457_v9  ;;  %v7451_v17 = vmul.f32 %v9844_v29, %v11942_v61 }
0x1594   :  { %9479 = vmatpush3.bf16.msra.mxu1 %v7708_v63  ;;  %9480 = vmatprep.mubr.msk.bf16.mxu1 %vm10063_vm1, %v12214_v56 }
0x1595   :  { %9490 = vmatprep.subr.bf16.mxu1 %v12214_v56  ;;  %v7459_v12 = vpack.c.bf16 %v7451_v17, %v7451_v17 }
0x1596   :  { %v2337_v1 = vpop.permute.xlu0 %2336 }
0x1597   :  { %2357 = vst.msk [vmem:[#allocation2 + $0x20] sm:$0xff] %vm2352_vm4, %v2337_v1  ;;  %v7437_v41 = vpop.xlane.xlu1 %7436 }
0x1598   :  { %9845 = vrcp.f32 %v7437_v41  ;;  %v9585_v41 = vld [vmem:[%s12198_s9 + $0x10] sm:$0xff]  }
0x1599   :  { %9500 = vmatprep.subr.bf16.mxu0 %v9585_v41 }
0x159a   :  { %v2341_v27 = vpop.permute.xlu0 %2340  ;;  %9501 = vmatpush3.bf16.msra.mxu0 %v9585_v41 }
0x159b   :  { %2359 = vst.msk [vmem:[#allocation2 + $0x30] sm:$0xff] %vm2352_vm4, %v2341_v27  ;;  %9481 = vmatmul.mubr.msk.bf16.vlgmr.msra.gmra.mrb[12].mxu1 %vm598_vm2, %v7459_v12  ;;  %v7799_v45 = vpop.permute.xlu1 %7798  ;;  %v9586_v12 = vld [vmem:[%s12198_s9 + $0x18] sm:$0xff]  }
0x159c   :  { %v7804_v57 = vsel %vm1066_vm3, %v7799_v45, 0  ;;  %9492 = vmatprep.mubr.msk.bf16.mxu1 %vm10063_vm1, %v12214_v56  ;;  %9502 = vmatprep.subr.bf16.mxu0 %v9586_v12 }
0x159d   :  { %9491 = vmatpush3.bf16.msra.mxu1 %v7804_v57 }
0x159e   :  { %v3258_v61 = vpop.permute.xlu0 %3257  ;;  %9503 = vmatpush3.bf16.msra.mxu0 %v9586_v12 }
0x159f   :  { %3278 = vst.msk [vmem:[#allocation2 + $0x20] sm:$0xff] %vm3273_vm5, %v3258_v61  ;;  %v2331_v62 = vpop.permute.xlu1 %2330 }
0x15a0   :  { %2354 = vst.msk [vmem:[#allocation2 + $0x8] sm:$0xff] %vm2352_vm4, %v2331_v62 }
0x15a2   :  { %v9846_v34 = vpop.eup %9845  ;;  %v3262_v30 = vpop.permute.xlu0 %3261 }
0x15a3   :  { %v7453_v33 = vmul.f32 %v9846_v34, %v11957_v37  ;;  %3280 = vst.msk [vmem:[#allocation2 + $0x30] sm:$0xff] %vm3273_vm5, %v3262_v30  ;;  %v2335_v48 = vpop.permute.xlu1 %2334  ;;  %v9587_v34 = vld [vmem:[#allocation14] sm:$0xff]  }
0x15a4   :  { %2356 = vst.msk [vmem:[#allocation2 + $0x18] sm:$0xff] %vm2352_vm4, %v2335_v48  ;;  %9512 = vmatprep.subr.bf16.mxu0 %v9587_v34 }
0x15a5   :  { %v7461_v59 = vpack.c.bf16 %v7453_v33, %v7453_v33 }
0x15a6   :  { %v4179_v2 = vpop.permute.xlu0 %4178 }
0x15a7   :  { %4199 = vst.msk [vmem:[#allocation2 + $0x20] sm:$0xff] %vm4194_vm6, %v4179_v2  ;;  %9493 = vmatmul.mubr.msk.bf16.vlgmr.msra.gmra.mrb[16].mxu1 %vm598_vm2, %v7461_v59  ;;  %v3252_v56 = vpop.permute.xlu1 %3251 }
0x15a8   :  { %3275 = vst.msk [vmem:[#allocation2 + $0x8] sm:$0xff] %vm3273_vm5, %v3252_v56 }
0x15aa   :  { %v4183_v10 = vpop.permute.xlu0 %4182 }
0x15ab   :  { %4201 = vst.msk [vmem:[#allocation2 + $0x30] sm:$0xff] %vm4194_vm6, %v4183_v10  ;;  %v3256_v35 = vpop.permute.xlu1 %3255 }
0x15ac   :  { %3277 = vst.msk [vmem:[#allocation2 + $0x18] sm:$0xff] %vm3273_vm5, %v3256_v35 }
0x15ae   :  { %v5100_v37 = vpop.permute.xlu0 %5099 }
0x15af   :  { %5120 = vst.msk [vmem:[#allocation2 + $0x20] sm:$0xff] %vm5115_vm7, %v5100_v37  ;;  %v4173_v6 = vpop.permute.xlu1 %4172 }
0x15b0   :  { %4196 = vst.msk [vmem:[#allocation2 + $0x8] sm:$0xff] %vm4194_vm6, %v4173_v6 }
0x15b2   :  { %v5104_v60 = vpop.permute.xlu0 %5103 }
0x15b3   :  { %5122 = vst.msk [vmem:[#allocation2 + $0x30] sm:$0xff] %vm5115_vm7, %v5104_v60  ;;  %v4177_v49 = vpop.permute.xlu1 %4176 }
0x15b4   :  { %4198 = vst.msk [vmem:[#allocation2 + $0x18] sm:$0xff] %vm4194_vm6, %v4177_v49 }
0x15b6   :  { %v6021_v5 = vpop.permute.xlu0 %6020 }
0x15b7   :  { %6041 = vst.msk [vmem:[#allocation2 + $0x20] sm:$0xff] %vm6036_vm8, %v6021_v5  ;;  %v5094_v11 = vpop.permute.xlu1 %5093 }
0x15b8   :  { %5117 = vst.msk [vmem:[#allocation2 + $0x8] sm:$0xff] %vm5115_vm7, %v5094_v11 }
0x15ba   :  { %v6025_v23 = vpop.permute.xlu0 %6024 }
0x15bb   :  { %6043 = vst.msk [vmem:[#allocation2 + $0x30] sm:$0xff] %vm6036_vm8, %v6025_v23  ;;  %v5098_v44 = vpop.permute.xlu1 %5097 }
0x15bc   :  { %5119 = vst.msk [vmem:[#allocation2 + $0x18] sm:$0xff] %vm5115_vm7, %v5098_v44 }
0x15be   :  { %v6942_v58 = vpop.permute.xlu0 %6941 }
0x15bf   :  { %6962 = vst.msk [vmem:[#allocation2 + $0x20] sm:$0xff] %vm6957_vm9, %v6942_v58  ;;  %v6015_v25 = vpop.permute.xlu1 %6014 }
0x15c0   :  { %6038 = vst.msk [vmem:[#allocation2 + $0x8] sm:$0xff] %vm6036_vm8, %v6015_v25 }
0x15c2   :  { %v6946_v18 = vpop.permute.xlu0 %6945 }
0x15c3   :  { %6964 = vst.msk [vmem:[#allocation2 + $0x30] sm:$0xff] %vm6957_vm9, %v6946_v18  ;;  %v6019_v14 = vpop.permute.xlu1 %6018 }
0x15c4   :  { %6040 = vst.msk [vmem:[#allocation2 + $0x18] sm:$0xff] %vm6036_vm8, %v6019_v14 }
0x15c7   :  { %v6936_v3 = vpop.permute.xlu1 %6935 }
0x15c8   :  { %6959 = vst.msk [vmem:[#allocation2 + $0x8] sm:$0xff] %vm6957_vm9, %v6936_v3  ;;  %v9588_v3 = vld [vmem:[#allocation14 + $0x8] sm:$0xff]  }
0x15cb   :  { %v6940_v4 = vpop.permute.xlu1 %6939 }
0x15cc   :  { %6961 = vst.msk [vmem:[#allocation2 + $0x18] sm:$0xff] %vm6957_vm9, %v6940_v4  ;;  %v9589_v4 = vld [vmem:[#allocation14 + $0x10] sm:$0xff]  }
0x15cf   :  { %v2339_v39 = vpop.permute.xlu1 %2338 }
0x15d0   :  { %2358 = vst.msk [vmem:[#allocation2 + $0x28] sm:$0xff] %vm2352_vm4, %v2339_v39 }
0x15d3   :  { %v2343_v53 = vpop.permute.xlu1 %2342 }
0x15d4   :  { %2360 = vst.msk [vmem:[#allocation2 + $0x38] sm:$0xff] %vm2352_vm4, %v2343_v53 }
0x15d7   :  { %v3260_v42 = vpop.permute.xlu1 %3259 }
0x15d8   :  { %3279 = vst.msk [vmem:[#allocation2 + $0x28] sm:$0xff] %vm3273_vm5, %v3260_v42 }
0x15db   :  { %v3264_v28 = vpop.permute.xlu1 %3263 }
0x15dc   :  { %3281 = vst.msk [vmem:[#allocation2 + $0x38] sm:$0xff] %vm3273_vm5, %v3264_v28  ;;  %v9590_v28 = vld [vmem:[#allocation14 + $0x18] sm:$0xff]  }
0x15df   :  { %v4181_v8 = vpop.permute.xlu1 %4180 }
0x15e0   :  { %4200 = vst.msk [vmem:[#allocation2 + $0x28] sm:$0xff] %vm4194_vm6, %v4181_v8 }
0x15e3   :  { %v4185_v21 = vpop.permute.xlu1 %4184 }
0x15e4   :  { %4202 = vst.msk [vmem:[#allocation2 + $0x38] sm:$0xff] %vm4194_vm6, %v4185_v21 }
0x15e7   :  { %v5102_v43 = vpop.permute.xlu1 %5101 }
0x15e8   :  { %5121 = vst.msk [vmem:[#allocation2 + $0x28] sm:$0xff] %vm5115_vm7, %v5102_v43 }
0x15eb   :  { %v5106_v46 = vpop.permute.xlu1 %5105 }
0x15ec   :  { %5123 = vst.msk [vmem:[#allocation2 + $0x38] sm:$0xff] %vm5115_vm7, %v5106_v46 }
0x15ef   :  { %v6023_v38 = vpop.permute.xlu1 %6022 }
0x15f0   :  { %6042 = vst.msk [vmem:[#allocation2 + $0x28] sm:$0xff] %vm6036_vm8, %v6023_v38  ;;  %v9863_v38 = vld [vmem:[#allocation3] sm:$0xff]  }
0x15f3   :  { %v6027_v55 = vpop.permute.xlu1 %6026 }
0x15f4   :  { %6044 = vst.msk [vmem:[#allocation2 + $0x38] sm:$0xff] %vm6036_vm8, %v6027_v55  ;;  %v9864_v55 = vld [vmem:[#allocation3 + $0x8] sm:$0xff]  }
0x15f7   :  { %v6944_v50 = vpop.permute.xlu1 %6943 }
0x15f8   :  { %6963 = vst.msk [vmem:[#allocation2 + $0x28] sm:$0xff] %vm6957_vm9, %v6944_v50  ;;  %v9865_v50 = vld [vmem:[#allocation3 + $0x10] sm:$0xff]  }
0x15fb   :  { %v6948_v36 = vpop.permute.xlu1 %6947 }
0x15fc   :  { %6965 = vst.msk [vmem:[#allocation2 + $0x38] sm:$0xff] %vm6957_vm9, %v6948_v36  ;;  %v9866_v36 = vld [vmem:[#allocation3 + $0x18] sm:$0xff]  }
0x1600   :  { %v7504_v15 = vpop.f32.mrb[244].mxu0 }
0x1601   :  { %7854 = vrot.lane.b32.xlu0 %v7504_v15, %s10077_s17  ;;  %v9452_v54 = vpop.f32.mrb[245].mxu0  ;;  %v8359_v15 = vld [vmem:[%s12199_s10] ss:$0 sm:$0xff]  ;;  %s10078_s10 = smov [#allocation15]  }
0x1602   :  { %v7507_v13 = vpop.f32.mrb[246].mxu0  ;;  %s8141_s16 = sshll.u32 %s10078_s10, 4  ;;  %s8142_s16 = int_to_ptr.vmem [resolvable:$true] %s8141_s16 }
0x1603   :  { %v9453_v24 = vpop.f32.mrb[247].mxu0  ;;  %s10021_s8 = scalar_lea.vmem %s8142_s16, 1024  ;;  %p10026_p1 = scmp.lt.s32.totalorder %s8142_s16, %s8142_s16 }
0x1604   :  { %p10022_p0 = scmp.ne.s32.totalorder %s8142_s16, %s10021_s8  ;;  %p10027_p2 = scmp.lt.s32.totalorder %s10021_s8, %s10021_s8 }
0x1606   :  { %p10028_p3 = por %p10027_p2, %p10026_p1 }
0x1608   :  { %v7600_v20 = vpop.f32.mrb[248].mxu0  ;;  %p10029_p4 = pnand %p10028_p3, %p10022_p0 }
0x1609   :  { %7858 = vrot.lane.b32.xlu0 %v7600_v20, %s10077_s17  ;;  %v9464_v31 = vpop.f32.mrb[249].mxu0 }
0x160a   :  { %v7603_v16 = vpop.f32.mrb[250].mxu0 }
0x160b   :  { %v9465_v26 = vpop.f32.mrb[251].mxu0 }
0x1631   :  { %v7552_v32 = vpop.f32.mrb[4].mxu1 }
0x1632   :  { %7856 = vrot.lane.b32.xlu1 %v7552_v32, %s10077_s17  ;;  %v9458_v52 = vpop.f32.mrb[5].mxu1 }
0x1633   :  { %v7555_v47 = vpop.f32.mrb[6].mxu1 }
0x1634   :  { %v9459_v19 = vpop.f32.mrb[7].mxu1 }
0x163d   :  { %v7696_v0 = vpop.f32.mrb[252].mxu0 }
0x163e   :  { %7862 = vrot.lane.b32.xlu0 %v7696_v0, %s10077_s17  ;;  %v9476_v22 = vpop.f32.mrb[253].mxu0 }
0x163f   :  { %v7699_v9 = vpop.f32.mrb[254].mxu0 }
0x1640   :  { %v9477_v29 = vpop.f32.mrb[255].mxu0 }
0x1645   :  { %v7792_v7 = vpop.f32.mrb[0].mxu0 }
0x1646   :  { %7866 = vrot.lane.b32.xlu0 %v7792_v7, %s10077_s17  ;;  %v9488_v63 = vpop.f32.mrb[1].mxu0 }
0x1647   :  { %v7795_v17 = vpop.f32.mrb[2].mxu0 }
0x1648   :  { %v9489_v1 = vpop.f32.mrb[3].mxu0 }
0x1666   :  { %v7648_v27 = vpop.f32.mrb[8].mxu1 }
0x1667   :  { %7860 = vrot.lane.b32.xlu1 %v7648_v27, %s10077_s17  ;;  %v9470_v45 = vpop.f32.mrb[9].mxu1 }
0x1668   :  { %v7651_v57 = vpop.f32.mrb[10].mxu1 }
0x1669   :  { %v9471_v61 = vpop.f32.mrb[11].mxu1 }
0x166e   :  { %v7744_v62 = vpop.f32.mrb[12].mxu1 }
0x166f   :  { %7864 = vrot.lane.b32.xlu1 %v7744_v62, %s10077_s17  ;;  %v9482_v30 = vpop.f32.mrb[13].mxu1 }
0x1670   :  { %v7747_v33 = vpop.f32.mrb[14].mxu1 }
0x1671   :  { %v9483_v48 = vpop.f32.mrb[15].mxu1 }
0x1673   :  { %v7855_v59 = vpop.permute.xlu0 %7854 }
0x1674   :  { %7879 = vst.msk [vmem:[#allocation2] sm:$0xff] %vm7878_vm10, %v7855_v59 }
0x167a   :  { %v7840_v2 = vpop.f32.mrb[16].mxu1 }
0x167b   :  { %v7859_v56 = vpop.permute.xlu0 %7858  ;;  %7868 = vrot.lane.b32.xlu1 %v7840_v2, %s10077_s17  ;;  %v9494_v10 = vpop.f32.mrb[17].mxu1  ;;  %v7887_v60 = vld [vmem:[#allocation2] sm:$0xff] }
0x167c   :  { %7881 = vst.msk [vmem:[#allocation2 + $0x10] sm:$0xff] %vm7878_vm10, %v7859_v56  ;;  %v7843_v35 = vpop.f32.mrb[18].mxu1 }
0x167d   :  { %v9495_v37 = vpop.f32.mrb[19].mxu1 }
0x1683   :  { %v7889_v58 = vld [vmem:[#allocation2 + $0x10] sm:$0xff] }
0x16a4   :  { %v7857_v6 = vpop.permute.xlu1 %7856 }
0x16a5   :  { %7880 = vst.msk [vmem:[#allocation2 + $0x8] sm:$0xff] %vm7878_vm10, %v7857_v6 }
0x16ac   :  { %v7888_v49 = vld [vmem:[#allocation2 + $0x8] sm:$0xff] }
0x16ad   :  { %v7895_v5 = vpack.c.bf16 %v7888_v49, %v7887_v60 }
0x16af   :  { %9504 = vmatprep.mubr.msk.bf16.mxu0 %vm208_vm0, %v7895_v5 }
0x16b0   :  { %v7863_v11 = vpop.permute.xlu0 %7862 }
0x16b1   :  { %7883 = vst.msk [vmem:[#allocation2 + $0x20] sm:$0xff] %vm7878_vm10, %v7863_v11 }
0x16b8   :  { %v7867_v23 = vpop.permute.xlu0 %7866  ;;  %v7891_v39 = vld [vmem:[#allocation2 + $0x20] sm:$0xff] }
0x16b9   :  { %7885 = vst.msk [vmem:[#allocation2 + $0x30] sm:$0xff] %vm7878_vm10, %v7867_v23 }
0x16c0   :  { %v7893_v21 = vld [vmem:[#allocation2 + $0x30] sm:$0xff] }
0x16d9   :  { %v7861_v44 = vpop.permute.xlu1 %7860 }
0x16da   :  { %7882 = vst.msk [vmem:[#allocation2 + $0x18] sm:$0xff] %vm7878_vm10, %v7861_v44 }
0x16e1   :  { %v7890_v25 = vld [vmem:[#allocation2 + $0x18] sm:$0xff]  ;;  %v7865_v18 = vpop.permute.xlu1 %7864 }
0x16e2   :  { %v7896_v14 = vpack.c.bf16 %v7890_v25, %v7889_v58  ;;  %7884 = vst.msk [vmem:[#allocation2 + $0x28] sm:$0xff] %vm7878_vm10, %v7865_v18 }
0x16e4   :  { %9505 = vmatmul.mubr.msk.bf16.vlgmr.msra.gmra.mrb[4].mxu0 %vm208_vm0, %v7896_v14 }
0x16e5   :  { %9513 = vmatpush3.bf16.msra.mxu0 %v9587_v34 }
0x16e6   :  { %9514 = vmatprep.subr.bf16.mxu0 %v9588_v3 }
0x16e9   :  { %v7892_v53 = vld [vmem:[#allocation2 + $0x28] sm:$0xff]  ;;  %9515 = vmatpush3.bf16.msra.mxu0 %v9588_v3 }
0x16ea   :  { %v7897_v42 = vpack.c.bf16 %v7892_v53, %v7891_v39  ;;  %9516 = vmatprep.subr.bf16.mxu0 %v9589_v4 }
0x16ec   :  { %9508 = vmatprep.mubr.msk.bf16.mxu0 %vm208_vm0, %v7897_v42 }
0x16ed   :  { %v7869_v8 = vpop.permute.xlu1 %7868  ;;  %9517 = vmatpush3.bf16.msra.mxu0 %v9589_v4 }
0x16ee   :  { %7886 = vst.msk [vmem:[#allocation2 + $0x38] sm:$0xff] %vm7878_vm10, %v7869_v8  ;;  %9518 = vmatprep.subr.bf16.mxu0 %v9590_v28 }
0x16f1   :  { %9519 = vmatpush3.bf16.msra.mxu0 %v9590_v28 }
0x16f5   :  { %v7894_v43 = vld [vmem:[#allocation2 + $0x38] sm:$0xff] }
0x16f6   :  { %v7898_v46 = vpack.c.bf16 %v7894_v43, %v7893_v21 }
0x16f8   :  { %9509 = vmatmul.mubr.msk.bf16.gmra.mrb[8].mxu0 %vm208_vm0, %v7898_v46 }
0x16f9   :  { %9520 = vmatprep.mubr.msk.bf16.mxu0 %vm208_vm0, %v9863_v38 }
0x1700   :  { %9521 = vmatmul.mubr.msk.bf16.vlgmr.msra.gmra.mrb[4].mxu0 %vm208_vm0, %v9864_v55 }
0x1701   :  { %9524 = vmatprep.mubr.msk.bf16.mxu0 %vm208_vm0, %v9865_v50 }
0x1708   :  { %9525 = vmatmul.mubr.msk.bf16.gmra.mrb[8].mxu0 %vm208_vm0, %v9866_v36 }
0x17d3   :  { %v9522_v54 = vpop.f32.mrb[4].mxu0 }
0x17d4   :  { %v8114_v13 = vadd.f32 %v9522_v54, %v8359_v15  ;;  %v8074_v24 = vpop.f32.mrb[5].mxu0 }
0x17d5   :  { %v8112_v20 = vadd.f32 %v8359_v15, %v8074_v24  ;;  %v9523_v31 = vpop.f32.mrb[6].mxu0 }
0x17d6   :  { %9847 = vtanh.f32 %v8114_v13  ;;  %v8115_v16 = vadd.f32 %v9523_v31, %v8359_v15  ;;  %v8077_v26 = vpop.f32.mrb[7].mxu0 }
0x17d7   :  { %9849 = vtanh.f32 %v8112_v20  ;;  %v8113_v32 = vadd.f32 %v8359_v15, %v8077_v26 }
0x17d8   :  { %9851 = vtanh.f32 %v8115_v16 }
0x17d9   :  { %9853 = vtanh.f32 %v8113_v32 }
0x17db   :  { %v9526_v52 = vpop.f32.mrb[8].mxu0 }
0x17dc   :  { %v8118_v47 = vadd.f32 %v9526_v52, %v8359_v15  ;;  %v8090_v19 = vpop.f32.mrb[9].mxu0 }
0x17dd   :  { %v8116_v40 = vadd.f32 %v8359_v15, %v8090_v19  ;;  %v9527_v51 = vpop.f32.mrb[10].mxu0 }
0x17de   :  { %9855 = vtanh.f32 %v8118_v47  ;;  %v8119_v0 = vadd.f32 %v9527_v51, %v8359_v15  ;;  %v8093_v22 = vpop.f32.mrb[11].mxu0 }
0x17df   :  { %9857 = vtanh.f32 %v8116_v40  ;;  %v8117_v9 = vadd.f32 %v8359_v15, %v8093_v22 }
0x17e0   :  { %v9848_v29 = vpop.eup %9847  ;;  %9859 = vtanh.f32 %v8119_v0 }
0x17e1   :  { %v9850_v7 = vpop.eup %9849  ;;  %8130 = vst.msk [vmem:[#allocation15 + $0x10] sm:$0xff] %vm208_vm0, %v9848_v29  ;;  %9861 = vtanh.f32 %v8117_v9 }
0x17e2   :  { %v9852_v63 = vpop.eup %9851  ;;  %8128 = vst.msk [vmem:[#allocation15] sm:$0xff] %vm208_vm0, %v9850_v7 }
0x17e3   :  { %v9854_v17 = vpop.eup %9853  ;;  %8131 = vst.msk [vmem:[#allocation15 + $0x18] sm:$0xff] %vm208_vm0, %v9852_v63 }
0x17e4   :  { %8129 = vst.msk [vmem:[#allocation15 + $0x8] sm:$0xff] %vm208_vm0, %v9854_v17 }
0x17e8   :  { %v9856_v1 = vpop.eup %9855 }
0x17e9   :  { %v9858_v41 = vpop.eup %9857  ;;  %8134 = vst.msk [vmem:[#allocation15 + $0x30] sm:$0xff] %vm208_vm0, %v9856_v1 }
0x17ea   :  { %v9860_v12 = vpop.eup %9859  ;;  %8132 = vst.msk [vmem:[#allocation15 + $0x20] sm:$0xff] %vm208_vm0, %v9858_v41 }
0x17eb   :  { %v9862_v27 = vpop.eup %9861  ;;  %8135 = vst.msk [vmem:[#allocation15 + $0x38] sm:$0xff] %vm208_vm0, %v9860_v12 }
0x17ec   :  { %8133 = vst.msk [vmem:[#allocation15 + $0x28] sm:$0xff] %vm208_vm0, %v9862_v27 }
0x17ed   :  { %10032 = shalt.err (!%p10029_p4)
}
0x17ee   :  { %s10033_s1 = scalar_lea.hbm %s12200_s11, 1024 }
0x17ef   :  { %p10034_p5 = scmp.ne.s32.totalorder %s12200_s11, %s10033_s1  ;;  %p10037_p6 = scmp.lt.u32.totalorder %s10033_s1, %s12200_s11 }
0x17f1   :  { %p10039_p7 = pnand %p10037_p6, %p10034_p5 }
0x17f3   :  { %10042 = shalt.err (!%p10039_p7)
}
0x17f4   :  { %s10079_s26 = smov 128  }
0x17f5   :  { %8147 = dma.vmem_to_hbm [thread:$0]  %s8142_s16, 1024, %s12200_s11, [#allocation5], %s10079_s26, %s10079_s26, %s10071_s7  }
0x17f6   :  { %10051 = dma.done.wait [#allocation5], 1024  }
0x17f7   :  { %10052 = vsyncadd [#allocation5], 4294966272 }
0x17f8   :  { %8151 = vsyncpa [#allocation4], 1 }
0x17f9   :  { %8152 = vsyncpa [#allocation7], 1 }
0x17fa   :  { %8153 = vsyncpa [#allocation10], 1 }
0x17fb   :  { %8154 = vsyncpa [#allocation13], 1 }
0x17fc   :  { %8155 = vsyncpa [#allocation5], 1 }

</bundles_post_ra>
